<compile_context>
chip_gen: v5e
topology: v5e:2x2
jax: 0.10.0
libtpu: 0.0.40
codegen_flags: <defaults>
</compile_context>

<pallas_src>
import functools

import jax
import jax.numpy as jnp
from jax.experimental import pallas as pl
from jax.experimental.pallas import tpu as pltpu


# ----------------------------------------------------------------------------
# Fused Pallas kernel: whole Net5 forward for one batch tile
# ----------------------------------------------------------------------------
def _net5_kernel(x_ref,
                 w1_ref, s1_ref, h1_ref,
                 w2_ref, s2_ref, h2_ref,
                 w3_ref, s3_ref, h3_ref,
                 w4_ref, h4_ref,
                 w5_ref, s5_ref, h5_ref,
                 fw1_ref, fb1_ref, fw2_ref, fb2_ref, fw3_ref, fb3_ref,
                 out_ref,
                 a1_ref, a2_ref, a3_ref, p1_ref, a4_ref, a5_ref, g_ref,
                 *, bt):
    f32 = jnp.float32

    def conv3x3(in_ref, dst_ref, w_ref, oh, ow, scale, shift, relu_first,
                row_off=0, col_off=0):
        """Shift-and-accumulate 3x3 conv (block-diagonal packed weights)."""
        lout = w_ref.shape[-1]

        @pl.loop(0, oh)
        def _row(i):
            acc = jnp.zeros((ow, lout), f32)
            for t in range(9):
                ki, kj = divmod(t, 3)
                xs = in_ref[i + ki, kj:kj + ow, :]
                acc = acc + jnp.dot(xs, w_ref[t], preferred_element_type=f32)
            if relu_first:                     # Conv -> ReLU -> BN
                y = jnp.maximum(acc, 0.0) * scale + shift
            else:                              # Conv (+folded BN) -> ReLU
                y = jnp.maximum(acc + shift, 0.0)
            dst_ref[i + row_off, col_off:col_off + ow, :] = y

    # zero the padded conv1-output scratch so its border is a valid zero pad
    a1_ref[...] = jnp.zeros_like(a1_ref)

    # convblock1: 1 -> 16, 3x3, pad=1, Conv -> ReLU -> BN
    conv3x3(x_ref, a1_ref, w1_ref, 28, 28, s1_ref[...], h1_ref[...],
            relu_first=True, row_off=1, col_off=1)

    # convblock2: 16 -> 32, 3x3, pad=1, Conv -> ReLU -> BN
    conv3x3(a1_ref, a2_ref, w2_ref, 28, 28, s2_ref[...], h2_ref[...],
            relu_first=True)

    # convblock3: 32 -> 10, 1x1, Conv -> ReLU -> BN
    s3 = s3_ref[...]
    h3 = h3_ref[...]

    @pl.loop(0, 28)
    def _c3(i):
        acc = jnp.dot(a2_ref[i, :, :], w3_ref[...], preferred_element_type=f32)
        a3_ref[i, :, :] = jnp.maximum(acc, 0.0) * s3 + h3

    # pool1: MaxPool2d(2, 2): 28x28 -> 14x14
    @pl.loop(0, 14)
    def _p1(io):
        r = jnp.maximum(a3_ref[2 * io, :, :], a3_ref[2 * io + 1, :, :])
        for jo in range(14):
            p1_ref[io, jo:jo + 1, :] = jnp.maximum(
                r[2 * jo:2 * jo + 1, :], r[2 * jo + 1:2 * jo + 2, :])

    # convblock4: 10 -> 16, 3x3 valid, Conv -> BN -> ReLU (BN folded into w/b)
    conv3x3(p1_ref, a4_ref, w4_ref, 12, 12, None, h4_ref[...],
            relu_first=False)

    # convblock5: 16 -> 32, 3x3 valid, Conv -> ReLU -> BN
    conv3x3(a4_ref, a5_ref, w5_ref, 10, 10, s5_ref[...], h5_ref[...],
            relu_first=True)

    # pool2 (MaxPool 2x2) + gap (AvgPool over the full 5x5 map), fused
    acc = jnp.zeros((1, a5_ref.shape[-1]), f32)
    for io in range(5):
        r0 = a5_ref[2 * io, :, :]
        r1 = a5_ref[2 * io + 1, :, :]
        for jo in range(5):
            m = jnp.maximum(
                jnp.maximum(r0[2 * jo:2 * jo + 1, :],
                            r0[2 * jo + 1:2 * jo + 2, :]),
                jnp.maximum(r1[2 * jo:2 * jo + 1, :],
                            r1[2 * jo + 1:2 * jo + 2, :]))
            acc = acc + m
    gap = acc * (1.0 / 25.0)                     # (1, bt*32), lane-packed

    # unpack lane-packed per-image features -> (bt, 32)
    for b in range(bt):
        g_ref[b:b + 1, :] = gap[:, b * 32:(b + 1) * 32]

    # FC head (32 -> 64 -> 64 -> 10) + log_softmax
    g = g_ref[...]
    h = jnp.dot(g, fw1_ref[...], preferred_element_type=f32) + fb1_ref[...]
    h = jnp.maximum(h, 0.0)
    h = jnp.dot(h, fw2_ref[...], preferred_element_type=f32) + fb2_ref[...]
    h = jnp.maximum(h, 0.0)
    y = jnp.dot(h, fw3_ref[...], preferred_element_type=f32) + fb3_ref[...]
    m = jnp.max(y, axis=-1, keepdims=True)
    z = y - m
    lse = jnp.log(jnp.sum(jnp.exp(z), axis=-1, keepdims=True))
    out_ref[...] = z - lse


# ----------------------------------------------------------------------------
# Wrapper: parameter packing + pallas_call plumbing
# ----------------------------------------------------------------------------
def _bn_affine(gamma, beta, mean, var, eps=1e-5):
    scale = gamma / jnp.sqrt(var + eps)
    shift = beta - mean * scale
    return scale, shift


def _block_diag(w, bt):
    """(Cin, Cout) -> (bt*Cin, bt*Cout) per-image block-diagonal matrix."""
    return jnp.kron(jnp.eye(bt, dtype=w.dtype), w)


def _pack_conv3x3(w, bt):
    """(3, 3, Cin, Cout) -> (9, bt*Cin, bt*Cout) packed taps."""
    return jnp.stack([_block_diag(w[ki, kj], bt)
                      for ki in range(3) for kj in range(3)], axis=0)


def _tile_vec(v, bt):
    return jnp.tile(v, bt).reshape(1, bt * v.shape[0])


def net5_forward(x_nchw, params):
    convs, bns, fcs = params
    w1, w2, w3, w4, w5 = convs
    (fw1, fb1), (fw2, fb2), (fw3, fb3) = fcs

    B = x_nchw.shape[0]
    assert x_nchw.shape[1:] == (1, 28, 28), x_nchw.shape
    BT = B if B <= 8 else 8            # batch tile packed into lanes
    T = -(-B // BT)                    # grid size (ceil)
    Bp = T * BT

    # NCHW -> (B, 28, 28); pad batch to Bp and spatial to 30x30 (conv pad=1);
    # pack the batch tile into the lane dimension: (T*30, 30, BT).
    x = x_nchw.reshape(B, 28, 28).astype(jnp.float32)
    if Bp != B:
        x = jnp.concatenate(
            [x, jnp.zeros((Bp - B, 28, 28), jnp.float32)], axis=0)
    xp = jnp.pad(x, ((0, 0), (1, 1), (1, 1)))
    xp = xp.reshape(T, BT, 30, 30).transpose(0, 2, 3, 1).reshape(T * 30, 30, BT)

    # eval-mode BN affine params
    (s1, h1), (s2, h2), (s3, h3), (s4, h4), (s5, h5) = [
        _bn_affine(*p) for p in bns]

    # convblock4 is Conv -> BN -> ReLU: fold BN into the conv weights / bias.
    w4f = w4 * s4[None, None, None, :]

    packed = [
        _pack_conv3x3(w1, BT), _tile_vec(s1, BT), _tile_vec(h1, BT),
        _pack_conv3x3(w2, BT), _tile_vec(s2, BT), _tile_vec(h2, BT),
        _block_diag(w3[0, 0], BT), _tile_vec(s3, BT), _tile_vec(h3, BT),
        _pack_conv3x3(w4f, BT), _tile_vec(h4, BT),
        _pack_conv3x3(w5, BT), _tile_vec(s5, BT), _tile_vec(h5, BT),
        fw1, fb1.reshape(1, -1), fw2, fb2.reshape(1, -1), fw3,
        fb3.reshape(1, -1),
    ]

    def _const_spec(shape):
        nd = len(shape)
        return pl.BlockSpec(tuple(shape), lambda t, nd=nd: (0,) * nd)

    in_specs = [pl.BlockSpec((30, 30, BT), lambda t: (t, 0, 0))]
    in_specs += [_const_spec(a.shape) for a in packed]

    scratch_shapes = [
        pltpu.VMEM((30, 30, BT * 16), jnp.float32),   # conv1 out (zero-padded)
        pltpu.VMEM((28, 28, BT * 32), jnp.float32),   # conv2 out
        pltpu.VMEM((28, 28, BT * 10), jnp.float32),   # conv3 out
        pltpu.VMEM((14, 14, BT * 10), jnp.float32),   # pool1 out
        pltpu.VMEM((12, 12, BT * 16), jnp.float32),   # conv4 out
        pltpu.VMEM((10, 10, BT * 32), jnp.float32),   # conv5 out
        pltpu.VMEM((BT, 32), jnp.float32),            # GAP features
    ]

    flops = T * 2 * (
        28 * 9 * 28 * (BT * 1) * (BT * 16)
        + 28 * 9 * 28 * (BT * 16) * (BT * 32)
        + 28 * 28 * (BT * 32) * (BT * 10)
        + 12 * 9 * 12 * (BT * 10) * (BT * 16)
        + 10 * 9 * 10 * (BT * 16) * (BT * 32)
        + BT * (32 * 64 + 64 * 64 + 64 * 10))
    bytes_accessed = 4 * (int(xp.size) + sum(int(a.size) for a in packed)
                          + Bp * 10)

    out = pl.pallas_call(
        functools.partial(_net5_kernel, bt=BT),
        out_shape=jax.ShapeDtypeStruct((Bp, 10), jnp.float32),
        grid_spec=pltpu.PrefetchScalarGridSpec(
            num_scalar_prefetch=0,
            grid=(T,),
            in_specs=in_specs,
            out_specs=pl.BlockSpec((BT, 10), lambda t: (t, 0)),
            scratch_shapes=scratch_shapes,
        ),
        compiler_params=pltpu.CompilerParams(
            dimension_semantics=("parallel",)),
        cost_estimate=pl.CostEstimate(
            flops=int(flops),
            transcendentals=int(Bp * 16),
            bytes_accessed=int(bytes_accessed)),
    )(xp, *packed)
    return out[:B]


# ----------------------------------------------------------------------------
# Pure-JAX reference (for a numerical sanity check)
# ----------------------------------------------------------------------------
def net5_reference(x_nchw, params):
    convs, bns, fcs = params
    w1, w2, w3, w4, w5 = convs
    (fw1, fb1), (fw2, fb2), (fw3, fb3) = fcs
    affs = [_bn_affine(*p) for p in bns]
    hi = jax.lax.Precision.HIGHEST

    x = jnp.transpose(x_nchw.astype(jnp.float32), (0, 2, 3, 1))   # NHWC

    def conv(x, w, pad):
        return jax.lax.conv_general_dilated(
            x, w, window_strides=(1, 1), padding=pad,
            dimension_numbers=("NHWC", "HWIO", "NHWC"), precision=hi)

    def bn(x, i):
        s, h = affs[i]
        return x * s + h

    def maxpool(x):
        return jax.lax.reduce_window(x, -jnp.inf, jax.lax.max,
                                     (1, 2, 2, 1), (1, 2, 2, 1), "VALID")

    x = bn(jnp.maximum(conv(x, w1, [(1, 1), (1, 1)]), 0.0), 0)
    x = bn(jnp.maximum(conv(x, w2, [(1, 1), (1, 1)]), 0.0), 1)
    x = bn(jnp.maximum(conv(x, w3, [(0, 0), (0, 0)]), 0.0), 2)
    x = maxpool(x)
    x = jnp.maximum(bn(conv(x, w4, [(0, 0), (0, 0)]), 3), 0.0)
    x = bn(jnp.maximum(conv(x, w5, [(0, 0), (0, 0)]), 0.0), 4)
    x = maxpool(x)
    x = jnp.mean(x, axis=(1, 2))                  # AvgPool2d(5) on a 5x5 map
    x = jnp.maximum(jnp.dot(x, fw1, precision=hi) + fb1, 0.0)
    x = jnp.maximum(jnp.dot(x, fw2, precision=hi) + fb2, 0.0)
    x = jnp.dot(x, fw3, precision=hi) + fb3
    return jax.nn.log_softmax(x, axis=-1)


# ----------------------------------------------------------------------------
# Deterministic synthetic parameters (shapes per Net5.__init__)
# ----------------------------------------------------------------------------
def init_params(key):
    kconv = jax.random.split(jax.random.fold_in(key, 0), 5)
    kbn = jax.random.split(jax.random.fold_in(key, 1), 5)
    kfc = jax.random.split(jax.random.fold_in(key, 2), 6)

    conv_shapes = [(3, 3, 1, 16), (3, 3, 16, 32), (1, 1, 32, 10),
                   (3, 3, 10, 16), (3, 3, 16, 32)]
    convs = []
    for k, shp in zip(kconv, conv_shapes):
        fan_in = shp[0] * shp[1] * shp[2]
        convs.append(jax.random.normal(k, shp, jnp.float32)
                     / jnp.sqrt(float(fan_in)))

    bns = []
    for k, c in zip(kbn, [16, 32, 10, 16, 32]):
        k1, k2, k3, k4 = jax.random.split(k, 4)
        gamma = 1.0 + 0.1 * jax.random.normal(k1, (c,), jnp.float32)
        beta = 0.1 * jax.random.normal(k2, (c,), jnp.float32)
        mean = 0.1 * jax.random.normal(k3, (c,), jnp.float32)
        var = 1.0 + 0.1 * jax.random.uniform(k4, (c,), jnp.float32)
        bns.append((gamma, beta, mean, var))

    fcs = []
    for i, (fi, fo) in enumerate([(32, 64), (64, 64), (64, 10)]):
        w = jax.random.normal(kfc[2 * i], (fi, fo), jnp.float32) \
            / jnp.sqrt(float(fi))
        b = 0.01 * jax.random.normal(kfc[2 * i + 1], (fo,), jnp.float32)
        fcs.append((w, b))
    return convs, bns, fcs


if __name__ == "__main__":
    key = jax.random.PRNGKey(0)
    kx, kp = jax.random.split(key)
    x = jax.random.normal(kx, (2, 1, 28, 28), jnp.float32)   # MNIST-like input
    params = init_params(kp)

    out = net5_forward(x, params)
    out = jax.block_until_ready(out)

    assert out.shape == (2, 10), out.shape
    assert bool(jnp.all(jnp.isfinite(out)))
    # log_softmax rows should exponentiate-sum to ~1
    assert bool(jnp.allclose(jnp.sum(jnp.exp(out), axis=-1), 1.0, atol=1e-4))

    # numerical check against a plain-JAX reference of Net5
    ref = net5_reference(x, params)
    max_err = float(jnp.max(jnp.abs(out - ref)))
    assert max_err < 8e-2, max_err

    print("KERNEL_OK")
</pallas_src>

<mosaic_0001>
module attributes {stable_mosaic.version = 11 : i64} {
  func.func @_net5_kernel(%arg0: i32, %arg1: memref<30x30x2xf32, #tpu.memory_space<vmem>>, %arg2: memref<9x2x32xf32, #tpu.memory_space<vmem>>, %arg3: memref<1x32xf32, #tpu.memory_space<vmem>>, %arg4: memref<1x32xf32, #tpu.memory_space<vmem>>, %arg5: memref<9x32x64xf32, #tpu.memory_space<vmem>>, %arg6: memref<1x64xf32, #tpu.memory_space<vmem>>, %arg7: memref<1x64xf32, #tpu.memory_space<vmem>>, %arg8: memref<64x20xf32, #tpu.memory_space<vmem>>, %arg9: memref<1x20xf32, #tpu.memory_space<vmem>>, %arg10: memref<1x20xf32, #tpu.memory_space<vmem>>, %arg11: memref<9x20x32xf32, #tpu.memory_space<vmem>>, %arg12: memref<1x32xf32, #tpu.memory_space<vmem>>, %arg13: memref<9x32x64xf32, #tpu.memory_space<vmem>>, %arg14: memref<1x64xf32, #tpu.memory_space<vmem>>, %arg15: memref<1x64xf32, #tpu.memory_space<vmem>>, %arg16: memref<32x64xf32, #tpu.memory_space<vmem>>, %arg17: memref<1x64xf32, #tpu.memory_space<vmem>>, %arg18: memref<64x64xf32, #tpu.memory_space<vmem>>, %arg19: memref<1x64xf32, #tpu.memory_space<vmem>>, %arg20: memref<64x10xf32, #tpu.memory_space<vmem>>, %arg21: memref<1x10xf32, #tpu.memory_space<vmem>>, %arg22: memref<2x10xf32, #tpu.memory_space<vmem>>, %arg23: memref<30x30x32xf32, #tpu.memory_space<vmem>>, %arg24: memref<28x28x64xf32, #tpu.memory_space<vmem>>, %arg25: memref<28x28x20xf32, #tpu.memory_space<vmem>>, %arg26: memref<14x14x20xf32, #tpu.memory_space<vmem>>, %arg27: memref<12x12x32xf32, #tpu.memory_space<vmem>>, %arg28: memref<10x10x64xf32, #tpu.memory_space<vmem>>, %arg29: memref<2x32xf32, #tpu.memory_space<vmem>>) attributes {dimension_semantics = [#tpu.dimension_semantics<parallel>], iteration_bounds = array<i64: 1>, scalar_prefetch = 0 : i64, scratch_operands = 7 : i64, tpu.core_type = #tpu.core_type<tc>, window_params = [{transform_indices = @transform_0, window_bounds = array<i64: 30, 30, 2>}, {pipeline_mode = #tpu.pipeline_mode<synchronous>, transform_indices = @transform_1, window_bounds = array<i64: 9, 2, 32>}, {pipeline_mode = #tpu.pipeline_mode<synchronous>, transform_indices = @transform_2, window_bounds = array<i64: 1, 32>}, {pipeline_mode = #tpu.pipeline_mode<synchronous>, transform_indices = @transform_3, window_bounds = array<i64: 1, 32>}, {pipeline_mode = #tpu.pipeline_mode<synchronous>, transform_indices = @transform_4, window_bounds = array<i64: 9, 32, 64>}, {pipeline_mode = #tpu.pipeline_mode<synchronous>, transform_indices = @transform_5, window_bounds = array<i64: 1, 64>}, {pipeline_mode = #tpu.pipeline_mode<synchronous>, transform_indices = @transform_6, window_bounds = array<i64: 1, 64>}, {pipeline_mode = #tpu.pipeline_mode<synchronous>, transform_indices = @transform_7, window_bounds = array<i64: 64, 20>}, {pipeline_mode = #tpu.pipeline_mode<synchronous>, transform_indices = @transform_8, window_bounds = array<i64: 1, 20>}, {pipeline_mode = #tpu.pipeline_mode<synchronous>, transform_indices = @transform_9, window_bounds = array<i64: 1, 20>}, {pipeline_mode = #tpu.pipeline_mode<synchronous>, transform_indices = @transform_10, window_bounds = array<i64: 9, 20, 32>}, {pipeline_mode = #tpu.pipeline_mode<synchronous>, transform_indices = @transform_11, window_bounds = array<i64: 1, 32>}, {pipeline_mode = #tpu.pipeline_mode<synchronous>, transform_indices = @transform_12, window_bounds = array<i64: 9, 32, 64>}, {pipeline_mode = #tpu.pipeline_mode<synchronous>, transform_indices = @transform_13, window_bounds = array<i64: 1, 64>}, {pipeline_mode = #tpu.pipeline_mode<synchronous>, transform_indices = @transform_14, window_bounds = array<i64: 1, 64>}, {pipeline_mode = #tpu.pipeline_mode<synchronous>, transform_indices = @transform_15, window_bounds = array<i64: 32, 64>}, {pipeline_mode = #tpu.pipeline_mode<synchronous>, transform_indices = @transform_16, window_bounds = array<i64: 1, 64>}, {pipeline_mode = #tpu.pipeline_mode<synchronous>, transform_indices = @transform_17, window_bounds = array<i64: 64, 64>}, {pipeline_mode = #tpu.pipeline_mode<synchronous>, transform_indices = @transform_18, window_bounds = array<i64: 1, 64>}, {pipeline_mode = #tpu.pipeline_mode<synchronous>, transform_indices = @transform_19, window_bounds = array<i64: 64, 10>}, {pipeline_mode = #tpu.pipeline_mode<synchronous>, transform_indices = @transform_20, window_bounds = array<i64: 1, 10>}, {transform_indices = @transform_21, window_bounds = array<i64: 2, 10>}]} {
    %cst = arith.constant 0.000000e+00 : f32
    %0 = vector.broadcast %cst : f32 to vector<30x30x32xf32>
    %c0 = arith.constant 0 : index
    %c0_0 = arith.constant 0 : index
    %c0_1 = arith.constant 0 : index
    %1 = vector.load %arg23[%c0, %c0_0, %c0_1] : memref<30x30x32xf32, #tpu.memory_space<vmem>>, vector<30x30x32xf32>
    tpu.vector_store %arg23[%c0, %c0_0, %c0_1], %0 {strides = array<i32>} : memref<30x30x32xf32, #tpu.memory_space<vmem>>, vector<30x30x32xf32>,
    %c0_2 = arith.constant 0 : index
    %c0_3 = arith.constant 0 : index
    %2 = vector.load %arg3[%c0_2, %c0_3] : memref<1x32xf32, #tpu.memory_space<vmem>>, vector<1x32xf32>
    %c0_4 = arith.constant 0 : index
    %c0_5 = arith.constant 0 : index
    %3 = vector.load %arg4[%c0_4, %c0_5] : memref<1x32xf32, #tpu.memory_space<vmem>>, vector<1x32xf32>
    %c0_i32 = arith.constant 0 : i32
    %c28_i32 = arith.constant 28 : i32
    %4 = arith.addi %c0_i32, %c28_i32 : i32
    %c1_i32 = arith.constant 1 : i32
    scf.for %arg30 = %c0_i32 to %4 step %c1_i32  : i32 {
      %c1_i32_88 = arith.constant 1 : i32
      %275 = arith.muli %arg30, %c1_i32_88 : i32
      %c0_i32_89 = arith.constant 0 : i32
      %276 = arith.addi %c0_i32_89, %275 : i32
      %cst_90 = arith.constant 0.000000e+00 : f32
      %277 = vector.broadcast %cst_90 : f32 to vector<28x32xf32>
      %c0_i32_91 = arith.constant 0 : i32
      %278 = arith.addi %276, %c0_i32_91 : i32
      %279 = arith.index_cast %278 : i32 to index
      %c0_92 = arith.constant 0 : index
      %c0_93 = arith.constant 0 : index
      %280 = vector.load %arg1[%279, %c0_92, %c0_93] : memref<30x30x2xf32, #tpu.memory_space<vmem>>, vector<1x28x2xf32>
      %281 = vector.shape_cast %280 : vector<1x28x2xf32> to vector<28x2xf32>
      %c0_94 = arith.constant 0 : index
      %c0_95 = arith.constant 0 : index
      %c0_96 = arith.constant 0 : index
      %282 = vector.load %arg2[%c0_94, %c0_95, %c0_96] : memref<9x2x32xf32, #tpu.memory_space<vmem>>, vector<1x2x32xf32>
      %283 = vector.shape_cast %282 : vector<1x2x32xf32> to vector<2x32xf32>
      %cst_97 = arith.constant dense<0.000000e+00> : vector<28x32xf32>
      %284 = tpu.matmul %281, %283, %cst_97 {dimension_numbers = #tpu.dot_dimension_numbers<[1], [0], [0], [1], [0, 0, 1, 1], [], []>} : vector<28x2xf32>, vector<2x32xf32>, vector<28x32xf32> -> vector<28x32xf32>
      %285 = arith.addf %277, %284 : vector<28x32xf32>
      %c0_i32_98 = arith.constant 0 : i32
      %286 = arith.addi %276, %c0_i32_98 : i32
      %287 = arith.index_cast %286 : i32 to index
      %c1_99 = arith.constant 1 : index
      %c0_100 = arith.constant 0 : index
      %288 = vector.load %arg1[%287, %c1_99, %c0_100] : memref<30x30x2xf32, #tpu.memory_space<vmem>>, vector<1x28x2xf32>
      %289 = vector.shape_cast %288 : vector<1x28x2xf32> to vector<28x2xf32>
      %c1_101 = arith.constant 1 : index
      %c0_102 = arith.constant 0 : index
      %c0_103 = arith.constant 0 : index
      %290 = vector.load %arg2[%c1_101, %c0_102, %c0_103] : memref<9x2x32xf32, #tpu.memory_space<vmem>>, vector<1x2x32xf32>
      %291 = vector.shape_cast %290 : vector<1x2x32xf32> to vector<2x32xf32>
      %cst_104 = arith.constant dense<0.000000e+00> : vector<28x32xf32>
      %292 = tpu.matmul %289, %291, %cst_104 {dimension_numbers = #tpu.dot_dimension_numbers<[1], [0], [0], [1], [0, 0, 1, 1], [], []>} : vector<28x2xf32>, vector<2x32xf32>, vector<28x32xf32> -> vector<28x32xf32>
      %293 = arith.addf %285, %292 : vector<28x32xf32>
      %c0_i32_105 = arith.constant 0 : i32
      %294 = arith.addi %276, %c0_i32_105 : i32
      %295 = arith.index_cast %294 : i32 to index
      %c2_106 = arith.constant 2 : index
      %c0_107 = arith.constant 0 : index
      %296 = vector.load %arg1[%295, %c2_106, %c0_107] : memref<30x30x2xf32, #tpu.memory_space<vmem>>, vector<1x28x2xf32>
      %297 = vector.shape_cast %296 : vector<1x28x2xf32> to vector<28x2xf32>
      %c2_108 = arith.constant 2 : index
      %c0_109 = arith.constant 0 : index
      %c0_110 = arith.constant 0 : index
      %298 = vector.load %arg2[%c2_108, %c0_109, %c0_110] : memref<9x2x32xf32, #tpu.memory_space<vmem>>, vector<1x2x32xf32>
      %299 = vector.shape_cast %298 : vector<1x2x32xf32> to vector<2x32xf32>
      %cst_111 = arith.constant dense<0.000000e+00> : vector<28x32xf32>
      %300 = tpu.matmul %297, %299, %cst_111 {dimension_numbers = #tpu.dot_dimension_numbers<[1], [0], [0], [1], [0, 0, 1, 1], [], []>} : vector<28x2xf32>, vector<2x32xf32>, vector<28x32xf32> -> vector<28x32xf32>
      %301 = arith.addf %293, %300 : vector<28x32xf32>
      %c1_i32_112 = arith.constant 1 : i32
      %302 = arith.addi %276, %c1_i32_112 : i32
      %303 = arith.index_cast %302 : i32 to index
      %c0_113 = arith.constant 0 : index
      %c0_114 = arith.constant 0 : index
      %304 = vector.load %arg1[%303, %c0_113, %c0_114] : memref<30x30x2xf32, #tpu.memory_space<vmem>>, vector<1x28x2xf32>
      %305 = vector.shape_cast %304 : vector<1x28x2xf32> to vector<28x2xf32>
      %c3_115 = arith.constant 3 : index
      %c0_116 = arith.constant 0 : index
      %c0_117 = arith.constant 0 : index
      %306 = vector.load %arg2[%c3_115, %c0_116, %c0_117] : memref<9x2x32xf32, #tpu.memory_space<vmem>>, vector<1x2x32xf32>
      %307 = vector.shape_cast %306 : vector<1x2x32xf32> to vector<2x32xf32>
      %cst_118 = arith.constant dense<0.000000e+00> : vector<28x32xf32>
      %308 = tpu.matmul %305, %307, %cst_118 {dimension_numbers = #tpu.dot_dimension_numbers<[1], [0], [0], [1], [0, 0, 1, 1], [], []>} : vector<28x2xf32>, vector<2x32xf32>, vector<28x32xf32> -> vector<28x32xf32>
      %309 = arith.addf %301, %308 : vector<28x32xf32>
      %c1_i32_119 = arith.constant 1 : i32
      %310 = arith.addi %276, %c1_i32_119 : i32
      %311 = arith.index_cast %310 : i32 to index
      %c1_120 = arith.constant 1 : index
      %c0_121 = arith.constant 0 : index
      %312 = vector.load %arg1[%311, %c1_120, %c0_121] : memref<30x30x2xf32, #tpu.memory_space<vmem>>, vector<1x28x2xf32>
      %313 = vector.shape_cast %312 : vector<1x28x2xf32> to vector<28x2xf32>
      %c4_122 = arith.constant 4 : index
      %c0_123 = arith.constant 0 : index
      %c0_124 = arith.constant 0 : index
      %314 = vector.load %arg2[%c4_122, %c0_123, %c0_124] : memref<9x2x32xf32, #tpu.memory_space<vmem>>, vector<1x2x32xf32>
      %315 = vector.shape_cast %314 : vector<1x2x32xf32> to vector<2x32xf32>
      %cst_125 = arith.constant dense<0.000000e+00> : vector<28x32xf32>
      %316 = tpu.matmul %313, %315, %cst_125 {dimension_numbers = #tpu.dot_dimension_numbers<[1], [0], [0], [1], [0, 0, 1, 1], [], []>} : vector<28x2xf32>, vector<2x32xf32>, vector<28x32xf32> -> vector<28x32xf32>
      %317 = arith.addf %309, %316 : vector<28x32xf32>
      %c1_i32_126 = arith.constant 1 : i32
      %318 = arith.addi %276, %c1_i32_126 : i32
      %319 = arith.index_cast %318 : i32 to index
      %c2_127 = arith.constant 2 : index
      %c0_128 = arith.constant 0 : index
      %320 = vector.load %arg1[%319, %c2_127, %c0_128] : memref<30x30x2xf32, #tpu.memory_space<vmem>>, vector<1x28x2xf32>
      %321 = vector.shape_cast %320 : vector<1x28x2xf32> to vector<28x2xf32>
      %c5_129 = arith.constant 5 : index
      %c0_130 = arith.constant 0 : index
      %c0_131 = arith.constant 0 : index
      %322 = vector.load %arg2[%c5_129, %c0_130, %c0_131] : memref<9x2x32xf32, #tpu.memory_space<vmem>>, vector<1x2x32xf32>
      %323 = vector.shape_cast %322 : vector<1x2x32xf32> to vector<2x32xf32>
      %cst_132 = arith.constant dense<0.000000e+00> : vector<28x32xf32>
      %324 = tpu.matmul %321, %323, %cst_132 {dimension_numbers = #tpu.dot_dimension_numbers<[1], [0], [0], [1], [0, 0, 1, 1], [], []>} : vector<28x2xf32>, vector<2x32xf32>, vector<28x32xf32> -> vector<28x32xf32>
      %325 = arith.addf %317, %324 : vector<28x32xf32>
      %c2_i32 = arith.constant 2 : i32
      %326 = arith.addi %276, %c2_i32 : i32
      %327 = arith.index_cast %326 : i32 to index
      %c0_133 = arith.constant 0 : index
      %c0_134 = arith.constant 0 : index
      %328 = vector.load %arg1[%327, %c0_133, %c0_134] : memref<30x30x2xf32, #tpu.memory_space<vmem>>, vector<1x28x2xf32>
      %329 = vector.shape_cast %328 : vector<1x28x2xf32> to vector<28x2xf32>
      %c6_135 = arith.constant 6 : index
      %c0_136 = arith.constant 0 : index
      %c0_137 = arith.constant 0 : index
      %330 = vector.load %arg2[%c6_135, %c0_136, %c0_137] : memref<9x2x32xf32, #tpu.memory_space<vmem>>, vector<1x2x32xf32>
      %331 = vector.shape_cast %330 : vector<1x2x32xf32> to vector<2x32xf32>
      %cst_138 = arith.constant dense<0.000000e+00> : vector<28x32xf32>
      %332 = tpu.matmul %329, %331, %cst_138 {dimension_numbers = #tpu.dot_dimension_numbers<[1], [0], [0], [1], [0, 0, 1, 1], [], []>} : vector<28x2xf32>, vector<2x32xf32>, vector<28x32xf32> -> vector<28x32xf32>
      %333 = arith.addf %325, %332 : vector<28x32xf32>
      %c2_i32_139 = arith.constant 2 : i32
      %334 = arith.addi %276, %c2_i32_139 : i32
      %335 = arith.index_cast %334 : i32 to index
      %c1_140 = arith.constant 1 : index
      %c0_141 = arith.constant 0 : index
      %336 = vector.load %arg1[%335, %c1_140, %c0_141] : memref<30x30x2xf32, #tpu.memory_space<vmem>>, vector<1x28x2xf32>
      %337 = vector.shape_cast %336 : vector<1x28x2xf32> to vector<28x2xf32>
      %c7_142 = arith.constant 7 : index
      %c0_143 = arith.constant 0 : index
      %c0_144 = arith.constant 0 : index
      %338 = vector.load %arg2[%c7_142, %c0_143, %c0_144] : memref<9x2x32xf32, #tpu.memory_space<vmem>>, vector<1x2x32xf32>
      %339 = vector.shape_cast %338 : vector<1x2x32xf32> to vector<2x32xf32>
      %cst_145 = arith.constant dense<0.000000e+00> : vector<28x32xf32>
      %340 = tpu.matmul %337, %339, %cst_145 {dimension_numbers = #tpu.dot_dimension_numbers<[1], [0], [0], [1], [0, 0, 1, 1], [], []>} : vector<28x2xf32>, vector<2x32xf32>, vector<28x32xf32> -> vector<28x32xf32>
      %341 = arith.addf %333, %340 : vector<28x32xf32>
      %c2_i32_146 = arith.constant 2 : i32
      %342 = arith.addi %276, %c2_i32_146 : i32
      %343 = arith.index_cast %342 : i32 to index
      %c2_147 = arith.constant 2 : index
      %c0_148 = arith.constant 0 : index
      %344 = vector.load %arg1[%343, %c2_147, %c0_148] : memref<30x30x2xf32, #tpu.memory_space<vmem>>, vector<1x28x2xf32>
      %345 = vector.shape_cast %344 : vector<1x28x2xf32> to vector<28x2xf32>
      %c8_149 = arith.constant 8 : index
      %c0_150 = arith.constant 0 : index
      %c0_151 = arith.constant 0 : index
      %346 = vector.load %arg2[%c8_149, %c0_150, %c0_151] : memref<9x2x32xf32, #tpu.memory_space<vmem>>, vector<1x2x32xf32>
      %347 = vector.shape_cast %346 : vector<1x2x32xf32> to vector<2x32xf32>
      %cst_152 = arith.constant dense<0.000000e+00> : vector<28x32xf32>
      %348 = tpu.matmul %345, %347, %cst_152 {dimension_numbers = #tpu.dot_dimension_numbers<[1], [0], [0], [1], [0, 0, 1, 1], [], []>} : vector<28x2xf32>, vector<2x32xf32>, vector<28x32xf32> -> vector<28x32xf32>
      %349 = arith.addf %341, %348 : vector<28x32xf32>
      %cst_153 = arith.constant 0.000000e+00 : f32
      %350 = vector.broadcast %cst_153 : f32 to vector<28x32xf32>
      %351 = arith.maximumf %349, %350 : vector<28x32xf32>
      %352 = vector.broadcast %2 : vector<1x32xf32> to vector<28x32xf32>
      %353 = arith.mulf %351, %352 : vector<28x32xf32>
      %354 = vector.broadcast %3 : vector<1x32xf32> to vector<28x32xf32>
      %355 = arith.addf %353, %354 : vector<28x32xf32>
      %c1_i32_154 = arith.constant 1 : i32
      %356 = arith.addi %276, %c1_i32_154 : i32
      %357 = arith.index_cast %356 : i32 to index
      %c1_155 = arith.constant 1 : index
      %c0_156 = arith.constant 0 : index
      %358 = vector.load %arg23[%357, %c1_155, %c0_156] : memref<30x30x32xf32, #tpu.memory_space<vmem>>, vector<1x28x32xf32>
      %359 = vector.shape_cast %358 : vector<1x28x32xf32> to vector<28x32xf32>
      %360 = vector.shape_cast %355 : vector<28x32xf32> to vector<1x28x32xf32>
      tpu.vector_store %arg23[%357, %c1_155, %c0_156], %360 {strides = array<i32>} : memref<30x30x32xf32, #tpu.memory_space<vmem>>, vector<1x28x32xf32>,
    }
    %c28_i32_6 = arith.constant 28 : i32
    %c0_7 = arith.constant 0 : index
    %c0_8 = arith.constant 0 : index
    %5 = vector.load %arg6[%c0_7, %c0_8] : memref<1x64xf32, #tpu.memory_space<vmem>>, vector<1x64xf32>
    %c0_9 = arith.constant 0 : index
    %c0_10 = arith.constant 0 : index
    %6 = vector.load %arg7[%c0_9, %c0_10] : memref<1x64xf32, #tpu.memory_space<vmem>>, vector<1x64xf32>
    %c0_i32_11 = arith.constant 0 : i32
    %c28_i32_12 = arith.constant 28 : i32
    %7 = arith.addi %c0_i32_11, %c28_i32_12 : i32
    %c1_i32_13 = arith.constant 1 : i32
    scf.for %arg30 = %c0_i32_11 to %7 step %c1_i32_13  : i32 {
      %c1_i32_88 = arith.constant 1 : i32
      %275 = arith.muli %arg30, %c1_i32_88 : i32
      %c0_i32_89 = arith.constant 0 : i32
      %276 = arith.addi %c0_i32_89, %275 : i32
      %cst_90 = arith.constant 0.000000e+00 : f32
      %277 = vector.broadcast %cst_90 : f32 to vector<28x64xf32>
      %c0_i32_91 = arith.constant 0 : i32
      %278 = arith.addi %276, %c0_i32_91 : i32
      %279 = arith.index_cast %278 : i32 to index
      %c0_92 = arith.constant 0 : index
      %c0_93 = arith.constant 0 : index
      %280 = vector.load %arg23[%279, %c0_92, %c0_93] : memref<30x30x32xf32, #tpu.memory_space<vmem>>, vector<1x28x32xf32>
      %281 = vector.shape_cast %280 : vector<1x28x32xf32> to vector<28x32xf32>
      %c0_94 = arith.constant 0 : index
      %c0_95 = arith.constant 0 : index
      %c0_96 = arith.constant 0 : index
      %282 = vector.load %arg5[%c0_94, %c0_95, %c0_96] : memref<9x32x64xf32, #tpu.memory_space<vmem>>, vector<1x32x64xf32>
      %283 = vector.shape_cast %282 : vector<1x32x64xf32> to vector<32x64xf32>
      %cst_97 = arith.constant dense<0.000000e+00> : vector<28x64xf32>
      %284 = tpu.matmul %281, %283, %cst_97 {dimension_numbers = #tpu.dot_dimension_numbers<[1], [0], [0], [1], [0, 0, 1, 1], [], []>} : vector<28x32xf32>, vector<32x64xf32>, vector<28x64xf32> -> vector<28x64xf32>
      %285 = arith.addf %277, %284 : vector<28x64xf32>
      %c0_i32_98 = arith.constant 0 : i32
      %286 = arith.addi %276, %c0_i32_98 : i32
      %287 = arith.index_cast %286 : i32 to index
      %c1_99 = arith.constant 1 : index
      %c0_100 = arith.constant 0 : index
      %288 = vector.load %arg23[%287, %c1_99, %c0_100] : memref<30x30x32xf32, #tpu.memory_space<vmem>>, vector<1x28x32xf32>
      %289 = vector.shape_cast %288 : vector<1x28x32xf32> to vector<28x32xf32>
      %c1_101 = arith.constant 1 : index
      %c0_102 = arith.constant 0 : index
      %c0_103 = arith.constant 0 : index
      %290 = vector.load %arg5[%c1_101, %c0_102, %c0_103] : memref<9x32x64xf32, #tpu.memory_space<vmem>>, vector<1x32x64xf32>
      %291 = vector.shape_cast %290 : vector<1x32x64xf32> to vector<32x64xf32>
      %cst_104 = arith.constant dense<0.000000e+00> : vector<28x64xf32>
      %292 = tpu.matmul %289, %291, %cst_104 {dimension_numbers = #tpu.dot_dimension_numbers<[1], [0], [0], [1], [0, 0, 1, 1], [], []>} : vector<28x32xf32>, vector<32x64xf32>, vector<28x64xf32> -> vector<28x64xf32>
      %293 = arith.addf %285, %292 : vector<28x64xf32>
      %c0_i32_105 = arith.constant 0 : i32
      %294 = arith.addi %276, %c0_i32_105 : i32
      %295 = arith.index_cast %294 : i32 to index
      %c2_106 = arith.constant 2 : index
      %c0_107 = arith.constant 0 : index
      %296 = vector.load %arg23[%295, %c2_106, %c0_107] : memref<30x30x32xf32, #tpu.memory_space<vmem>>, vector<1x28x32xf32>
      %297 = vector.shape_cast %296 : vector<1x28x32xf32> to vector<28x32xf32>
      %c2_108 = arith.constant 2 : index
      %c0_109 = arith.constant 0 : index
      %c0_110 = arith.constant 0 : index
      %298 = vector.load %arg5[%c2_108, %c0_109, %c0_110] : memref<9x32x64xf32, #tpu.memory_space<vmem>>, vector<1x32x64xf32>
      %299 = vector.shape_cast %298 : vector<1x32x64xf32> to vector<32x64xf32>
      %cst_111 = arith.constant dense<0.000000e+00> : vector<28x64xf32>
      %300 = tpu.matmul %297, %299, %cst_111 {dimension_numbers = #tpu.dot_dimension_numbers<[1], [0], [0], [1], [0, 0, 1, 1], [], []>} : vector<28x32xf32>, vector<32x64xf32>, vector<28x64xf32> -> vector<28x64xf32>
      %301 = arith.addf %293, %300 : vector<28x64xf32>
      %c1_i32_112 = arith.constant 1 : i32
      %302 = arith.addi %276, %c1_i32_112 : i32
      %303 = arith.index_cast %302 : i32 to index
      %c0_113 = arith.constant 0 : index
      %c0_114 = arith.constant 0 : index
      %304 = vector.load %arg23[%303, %c0_113, %c0_114] : memref<30x30x32xf32, #tpu.memory_space<vmem>>, vector<1x28x32xf32>
      %305 = vector.shape_cast %304 : vector<1x28x32xf32> to vector<28x32xf32>
      %c3_115 = arith.constant 3 : index
      %c0_116 = arith.constant 0 : index
      %c0_117 = arith.constant 0 : index
      %306 = vector.load %arg5[%c3_115, %c0_116, %c0_117] : memref<9x32x64xf32, #tpu.memory_space<vmem>>, vector<1x32x64xf32>
      %307 = vector.shape_cast %306 : vector<1x32x64xf32> to vector<32x64xf32>
      %cst_118 = arith.constant dense<0.000000e+00> : vector<28x64xf32>
      %308 = tpu.matmul %305, %307, %cst_118 {dimension_numbers = #tpu.dot_dimension_numbers<[1], [0], [0], [1], [0, 0, 1, 1], [], []>} : vector<28x32xf32>, vector<32x64xf32>, vector<28x64xf32> -> vector<28x64xf32>
      %309 = arith.addf %301, %308 : vector<28x64xf32>
      %c1_i32_119 = arith.constant 1 : i32
      %310 = arith.addi %276, %c1_i32_119 : i32
      %311 = arith.index_cast %310 : i32 to index
      %c1_120 = arith.constant 1 : index
      %c0_121 = arith.constant 0 : index
      %312 = vector.load %arg23[%311, %c1_120, %c0_121] : memref<30x30x32xf32, #tpu.memory_space<vmem>>, vector<1x28x32xf32>
      %313 = vector.shape_cast %312 : vector<1x28x32xf32> to vector<28x32xf32>
      %c4_122 = arith.constant 4 : index
      %c0_123 = arith.constant 0 : index
      %c0_124 = arith.constant 0 : index
      %314 = vector.load %arg5[%c4_122, %c0_123, %c0_124] : memref<9x32x64xf32, #tpu.memory_space<vmem>>, vector<1x32x64xf32>
      %315 = vector.shape_cast %314 : vector<1x32x64xf32> to vector<32x64xf32>
      %cst_125 = arith.constant dense<0.000000e+00> : vector<28x64xf32>
      %316 = tpu.matmul %313, %315, %cst_125 {dimension_numbers = #tpu.dot_dimension_numbers<[1], [0], [0], [1], [0, 0, 1, 1], [], []>} : vector<28x32xf32>, vector<32x64xf32>, vector<28x64xf32> -> vector<28x64xf32>
      %317 = arith.addf %309, %316 : vector<28x64xf32>
      %c1_i32_126 = arith.constant 1 : i32
      %318 = arith.addi %276, %c1_i32_126 : i32
      %319 = arith.index_cast %318 : i32 to index
      %c2_127 = arith.constant 2 : index
      %c0_128 = arith.constant 0 : index
      %320 = vector.load %arg23[%319, %c2_127, %c0_128] : memref<30x30x32xf32, #tpu.memory_space<vmem>>, vector<1x28x32xf32>
      %321 = vector.shape_cast %320 : vector<1x28x32xf32> to vector<28x32xf32>
      %c5_129 = arith.constant 5 : index
      %c0_130 = arith.constant 0 : index
      %c0_131 = arith.constant 0 : index
      %322 = vector.load %arg5[%c5_129, %c0_130, %c0_131] : memref<9x32x64xf32, #tpu.memory_space<vmem>>, vector<1x32x64xf32>
      %323 = vector.shape_cast %322 : vector<1x32x64xf32> to vector<32x64xf32>
      %cst_132 = arith.constant dense<0.000000e+00> : vector<28x64xf32>
      %324 = tpu.matmul %321, %323, %cst_132 {dimension_numbers = #tpu.dot_dimension_numbers<[1], [0], [0], [1], [0, 0, 1, 1], [], []>} : vector<28x32xf32>, vector<32x64xf32>, vector<28x64xf32> -> vector<28x64xf32>
      %325 = arith.addf %317, %324 : vector<28x64xf32>
      %c2_i32 = arith.constant 2 : i32
      %326 = arith.addi %276, %c2_i32 : i32
      %327 = arith.index_cast %326 : i32 to index
      %c0_133 = arith.constant 0 : index
      %c0_134 = arith.constant 0 : index
      %328 = vector.load %arg23[%327, %c0_133, %c0_134] : memref<30x30x32xf32, #tpu.memory_space<vmem>>, vector<1x28x32xf32>
      %329 = vector.shape_cast %328 : vector<1x28x32xf32> to vector<28x32xf32>
      %c6_135 = arith.constant 6 : index
      %c0_136 = arith.constant 0 : index
      %c0_137 = arith.constant 0 : index
      %330 = vector.load %arg5[%c6_135, %c0_136, %c0_137] : memref<9x32x64xf32, #tpu.memory_space<vmem>>, vector<1x32x64xf32>
      %331 = vector.shape_cast %330 : vector<1x32x64xf32> to vector<32x64xf32>
      %cst_138 = arith.constant dense<0.000000e+00> : vector<28x64xf32>
      %332 = tpu.matmul %329, %331, %cst_138 {dimension_numbers = #tpu.dot_dimension_numbers<[1], [0], [0], [1], [0, 0, 1, 1], [], []>} : vector<28x32xf32>, vector<32x64xf32>, vector<28x64xf32> -> vector<28x64xf32>
      %333 = arith.addf %325, %332 : vector<28x64xf32>
      %c2_i32_139 = arith.constant 2 : i32
      %334 = arith.addi %276, %c2_i32_139 : i32
      %335 = arith.index_cast %334 : i32 to index
      %c1_140 = arith.constant 1 : index
      %c0_141 = arith.constant 0 : index
      %336 = vector.load %arg23[%335, %c1_140, %c0_141] : memref<30x30x32xf32, #tpu.memory_space<vmem>>, vector<1x28x32xf32>
      %337 = vector.shape_cast %336 : vector<1x28x32xf32> to vector<28x32xf32>
      %c7_142 = arith.constant 7 : index
      %c0_143 = arith.constant 0 : index
      %c0_144 = arith.constant 0 : index
      %338 = vector.load %arg5[%c7_142, %c0_143, %c0_144] : memref<9x32x64xf32, #tpu.memory_space<vmem>>, vector<1x32x64xf32>
      %339 = vector.shape_cast %338 : vector<1x32x64xf32> to vector<32x64xf32>
      %cst_145 = arith.constant dense<0.000000e+00> : vector<28x64xf32>
      %340 = tpu.matmul %337, %339, %cst_145 {dimension_numbers = #tpu.dot_dimension_numbers<[1], [0], [0], [1], [0, 0, 1, 1], [], []>} : vector<28x32xf32>, vector<32x64xf32>, vector<28x64xf32> -> vector<28x64xf32>
      %341 = arith.addf %333, %340 : vector<28x64xf32>
      %c2_i32_146 = arith.constant 2 : i32
      %342 = arith.addi %276, %c2_i32_146 : i32
      %343 = arith.index_cast %342 : i32 to index
      %c2_147 = arith.constant 2 : index
      %c0_148 = arith.constant 0 : index
      %344 = vector.load %arg23[%343, %c2_147, %c0_148] : memref<30x30x32xf32, #tpu.memory_space<vmem>>, vector<1x28x32xf32>
      %345 = vector.shape_cast %344 : vector<1x28x32xf32> to vector<28x32xf32>
      %c8_149 = arith.constant 8 : index
      %c0_150 = arith.constant 0 : index
      %c0_151 = arith.constant 0 : index
      %346 = vector.load %arg5[%c8_149, %c0_150, %c0_151] : memref<9x32x64xf32, #tpu.memory_space<vmem>>, vector<1x32x64xf32>
      %347 = vector.shape_cast %346 : vector<1x32x64xf32> to vector<32x64xf32>
      %cst_152 = arith.constant dense<0.000000e+00> : vector<28x64xf32>
      %348 = tpu.matmul %345, %347, %cst_152 {dimension_numbers = #tpu.dot_dimension_numbers<[1], [0], [0], [1], [0, 0, 1, 1], [], []>} : vector<28x32xf32>, vector<32x64xf32>, vector<28x64xf32> -> vector<28x64xf32>
      %349 = arith.addf %341, %348 : vector<28x64xf32>
      %cst_153 = arith.constant 0.000000e+00 : f32
      %350 = vector.broadcast %cst_153 : f32 to vector<28x64xf32>
      %351 = arith.maximumf %349, %350 : vector<28x64xf32>
      %352 = vector.broadcast %5 : vector<1x64xf32> to vector<28x64xf32>
      %353 = arith.mulf %351, %352 : vector<28x64xf32>
      %354 = vector.broadcast %6 : vector<1x64xf32> to vector<28x64xf32>
      %355 = arith.addf %353, %354 : vector<28x64xf32>
      %c0_i32_154 = arith.constant 0 : i32
      %356 = arith.addi %276, %c0_i32_154 : i32
      %357 = arith.index_cast %356 : i32 to index
      %c0_155 = arith.constant 0 : index
      %c0_156 = arith.constant 0 : index
      %358 = vector.load %arg24[%357, %c0_155, %c0_156] : memref<28x28x64xf32, #tpu.memory_space<vmem>>, vector<1x28x64xf32>
      %359 = vector.shape_cast %358 : vector<1x28x64xf32> to vector<28x64xf32>
      %360 = vector.shape_cast %355 : vector<28x64xf32> to vector<1x28x64xf32>
      tpu.vector_store %arg24[%357, %c0_155, %c0_156], %360 {strides = array<i32>} : memref<28x28x64xf32, #tpu.memory_space<vmem>>, vector<1x28x64xf32>,
    }
    %c28_i32_14 = arith.constant 28 : i32
    %c0_15 = arith.constant 0 : index
    %c0_16 = arith.constant 0 : index
    %8 = vector.load %arg9[%c0_15, %c0_16] : memref<1x20xf32, #tpu.memory_space<vmem>>, vector<1x20xf32>
    %c0_17 = arith.constant 0 : index
    %c0_18 = arith.constant 0 : index
    %9 = vector.load %arg10[%c0_17, %c0_18] : memref<1x20xf32, #tpu.memory_space<vmem>>, vector<1x20xf32>
    %c0_i32_19 = arith.constant 0 : i32
    %c28_i32_20 = arith.constant 28 : i32
    %10 = arith.addi %c0_i32_19, %c28_i32_20 : i32
    %c1_i32_21 = arith.constant 1 : i32
    scf.for %arg30 = %c0_i32_19 to %10 step %c1_i32_21  : i32 {
      %c1_i32_88 = arith.constant 1 : i32
      %275 = arith.muli %arg30, %c1_i32_88 : i32
      %c0_i32_89 = arith.constant 0 : i32
      %276 = arith.addi %c0_i32_89, %275 : i32
      %277 = arith.index_cast %276 : i32 to index
      %c0_90 = arith.constant 0 : index
      %c0_91 = arith.constant 0 : index
      %278 = vector.load %arg24[%277, %c0_90, %c0_91] : memref<28x28x64xf32, #tpu.memory_space<vmem>>, vector<1x28x64xf32>
      %279 = vector.shape_cast %278 : vector<1x28x64xf32> to vector<28x64xf32>
      %c0_92 = arith.constant 0 : index
      %c0_93 = arith.constant 0 : index
      %280 = vector.load %arg8[%c0_92, %c0_93] : memref<64x20xf32, #tpu.memory_space<vmem>>, vector<64x20xf32>
      %cst_94 = arith.constant dense<0.000000e+00> : vector<28x20xf32>
      %281 = tpu.matmul %279, %280, %cst_94 {dimension_numbers = #tpu.dot_dimension_numbers<[1], [0], [0], [1], [0, 0, 1, 1], [], []>} : vector<28x64xf32>, vector<64x20xf32>, vector<28x20xf32> -> vector<28x20xf32>
      %cst_95 = arith.constant 0.000000e+00 : f32
      %282 = vector.broadcast %cst_95 : f32 to vector<28x20xf32>
      %283 = arith.maximumf %281, %282 : vector<28x20xf32>
      %284 = vector.broadcast %8 : vector<1x20xf32> to vector<28x20xf32>
      %285 = arith.mulf %283, %284 : vector<28x20xf32>
      %286 = vector.broadcast %9 : vector<1x20xf32> to vector<28x20xf32>
      %287 = arith.addf %285, %286 : vector<28x20xf32>
      %288 = arith.index_cast %276 : i32 to index
      %c0_96 = arith.constant 0 : index
      %c0_97 = arith.constant 0 : index
      %289 = vector.load %arg25[%288, %c0_96, %c0_97] : memref<28x28x20xf32, #tpu.memory_space<vmem>>, vector<1x28x20xf32>
      %290 = vector.shape_cast %289 : vector<1x28x20xf32> to vector<28x20xf32>
      %291 = vector.shape_cast %287 : vector<28x20xf32> to vector<1x28x20xf32>
      tpu.vector_store %arg25[%288, %c0_96, %c0_97], %291 {strides = array<i32>} : memref<28x28x20xf32, #tpu.memory_space<vmem>>, vector<1x28x20xf32>,
    }
    %c28_i32_22 = arith.constant 28 : i32
    %c0_i32_23 = arith.constant 0 : i32
    %c14_i32 = arith.constant 14 : i32
    %11 = arith.addi %c0_i32_23, %c14_i32 : i32
    %c1_i32_24 = arith.constant 1 : i32
    scf.for %arg30 = %c0_i32_23 to %11 step %c1_i32_24  : i32 {
      %c1_i32_88 = arith.constant 1 : i32
      %275 = arith.muli %arg30, %c1_i32_88 : i32
      %c0_i32_89 = arith.constant 0 : i32
      %276 = arith.addi %c0_i32_89, %275 : i32
      %c2_i32 = arith.constant 2 : i32
      %277 = arith.muli %c2_i32, %276 : i32
      %278 = arith.index_cast %277 : i32 to index
      %c0_90 = arith.constant 0 : index
      %c0_91 = arith.constant 0 : index
      %279 = vector.load %arg25[%278, %c0_90, %c0_91] : memref<28x28x20xf32, #tpu.memory_space<vmem>>, vector<1x28x20xf32>
      %280 = vector.shape_cast %279 : vector<1x28x20xf32> to vector<28x20xf32>
      %c2_i32_92 = arith.constant 2 : i32
      %281 = arith.muli %c2_i32_92, %276 : i32
      %c1_i32_93 = arith.constant 1 : i32
      %282 = arith.addi %281, %c1_i32_93 : i32
      %283 = arith.index_cast %282 : i32 to index
      %c0_94 = arith.constant 0 : index
      %c0_95 = arith.constant 0 : index
      %284 = vector.load %arg25[%283, %c0_94, %c0_95] : memref<28x28x20xf32, #tpu.memory_space<vmem>>, vector<1x28x20xf32>
      %285 = vector.shape_cast %284 : vector<1x28x20xf32> to vector<28x20xf32>
      %286 = arith.maximumf %280, %285 : vector<28x20xf32>
      %287 = vector.extract_strided_slice %286 {offsets = [0, 0], sizes = [1, 20], strides = [1, 1]} : vector<28x20xf32> to vector<1x20xf32>
      %288 = vector.extract_strided_slice %286 {offsets = [1, 0], sizes = [1, 20], strides = [1, 1]} : vector<28x20xf32> to vector<1x20xf32>
      %289 = arith.maximumf %287, %288 : vector<1x20xf32>
      %290 = arith.index_cast %276 : i32 to index
      %c0_96 = arith.constant 0 : index
      %c0_97 = arith.constant 0 : index
      %291 = vector.load %arg26[%290, %c0_96, %c0_97] : memref<14x14x20xf32, #tpu.memory_space<vmem>>, vector<1x1x20xf32>
      %292 = vector.shape_cast %291 : vector<1x1x20xf32> to vector<1x20xf32>
      %293 = vector.shape_cast %289 : vector<1x20xf32> to vector<1x1x20xf32>
      tpu.vector_store %arg26[%290, %c0_96, %c0_97], %293 {strides = array<i32>} : memref<14x14x20xf32, #tpu.memory_space<vmem>>, vector<1x1x20xf32>,
      %294 = vector.extract_strided_slice %286 {offsets = [2, 0], sizes = [1, 20], strides = [1, 1]} : vector<28x20xf32> to vector<1x20xf32>
      %295 = vector.extract_strided_slice %286 {offsets = [3, 0], sizes = [1, 20], strides = [1, 1]} : vector<28x20xf32> to vector<1x20xf32>
      %296 = arith.maximumf %294, %295 : vector<1x20xf32>
      %297 = arith.index_cast %276 : i32 to index
      %c1_98 = arith.constant 1 : index
      %c0_99 = arith.constant 0 : index
      %298 = vector.load %arg26[%297, %c1_98, %c0_99] : memref<14x14x20xf32, #tpu.memory_space<vmem>>, vector<1x1x20xf32>
      %299 = vector.shape_cast %298 : vector<1x1x20xf32> to vector<1x20xf32>
      %300 = vector.shape_cast %296 : vector<1x20xf32> to vector<1x1x20xf32>
      tpu.vector_store %arg26[%297, %c1_98, %c0_99], %300 {strides = array<i32>} : memref<14x14x20xf32, #tpu.memory_space<vmem>>, vector<1x1x20xf32>,
      %301 = vector.extract_strided_slice %286 {offsets = [4, 0], sizes = [1, 20], strides = [1, 1]} : vector<28x20xf32> to vector<1x20xf32>
      %302 = vector.extract_strided_slice %286 {offsets = [5, 0], sizes = [1, 20], strides = [1, 1]} : vector<28x20xf32> to vector<1x20xf32>
      %303 = arith.maximumf %301, %302 : vector<1x20xf32>
      %304 = arith.index_cast %276 : i32 to index
      %c2_100 = arith.constant 2 : index
      %c0_101 = arith.constant 0 : index
      %305 = vector.load %arg26[%304, %c2_100, %c0_101] : memref<14x14x20xf32, #tpu.memory_space<vmem>>, vector<1x1x20xf32>
      %306 = vector.shape_cast %305 : vector<1x1x20xf32> to vector<1x20xf32>
      %307 = vector.shape_cast %303 : vector<1x20xf32> to vector<1x1x20xf32>
      tpu.vector_store %arg26[%304, %c2_100, %c0_101], %307 {strides = array<i32>} : memref<14x14x20xf32, #tpu.memory_space<vmem>>, vector<1x1x20xf32>,
      %308 = vector.extract_strided_slice %286 {offsets = [6, 0], sizes = [1, 20], strides = [1, 1]} : vector<28x20xf32> to vector<1x20xf32>
      %309 = vector.extract_strided_slice %286 {offsets = [7, 0], sizes = [1, 20], strides = [1, 1]} : vector<28x20xf32> to vector<1x20xf32>
      %310 = arith.maximumf %308, %309 : vector<1x20xf32>
      %311 = arith.index_cast %276 : i32 to index
      %c3_102 = arith.constant 3 : index
      %c0_103 = arith.constant 0 : index
      %312 = vector.load %arg26[%311, %c3_102, %c0_103] : memref<14x14x20xf32, #tpu.memory_space<vmem>>, vector<1x1x20xf32>
      %313 = vector.shape_cast %312 : vector<1x1x20xf32> to vector<1x20xf32>
      %314 = vector.shape_cast %310 : vector<1x20xf32> to vector<1x1x20xf32>
      tpu.vector_store %arg26[%311, %c3_102, %c0_103], %314 {strides = array<i32>} : memref<14x14x20xf32, #tpu.memory_space<vmem>>, vector<1x1x20xf32>,
      %315 = vector.extract_strided_slice %286 {offsets = [8, 0], sizes = [1, 20], strides = [1, 1]} : vector<28x20xf32> to vector<1x20xf32>
      %316 = vector.extract_strided_slice %286 {offsets = [9, 0], sizes = [1, 20], strides = [1, 1]} : vector<28x20xf32> to vector<1x20xf32>
      %317 = arith.maximumf %315, %316 : vector<1x20xf32>
      %318 = arith.index_cast %276 : i32 to index
      %c4_104 = arith.constant 4 : index
      %c0_105 = arith.constant 0 : index
      %319 = vector.load %arg26[%318, %c4_104, %c0_105] : memref<14x14x20xf32, #tpu.memory_space<vmem>>, vector<1x1x20xf32>
      %320 = vector.shape_cast %319 : vector<1x1x20xf32> to vector<1x20xf32>
      %321 = vector.shape_cast %317 : vector<1x20xf32> to vector<1x1x20xf32>
      tpu.vector_store %arg26[%318, %c4_104, %c0_105], %321 {strides = array<i32>} : memref<14x14x20xf32, #tpu.memory_space<vmem>>, vector<1x1x20xf32>,
      %322 = vector.extract_strided_slice %286 {offsets = [10, 0], sizes = [1, 20], strides = [1, 1]} : vector<28x20xf32> to vector<1x20xf32>
      %323 = vector.extract_strided_slice %286 {offsets = [11, 0], sizes = [1, 20], strides = [1, 1]} : vector<28x20xf32> to vector<1x20xf32>
      %324 = arith.maximumf %322, %323 : vector<1x20xf32>
      %325 = arith.index_cast %276 : i32 to index
      %c5_106 = arith.constant 5 : index
      %c0_107 = arith.constant 0 : index
      %326 = vector.load %arg26[%325, %c5_106, %c0_107] : memref<14x14x20xf32, #tpu.memory_space<vmem>>, vector<1x1x20xf32>
      %327 = vector.shape_cast %326 : vector<1x1x20xf32> to vector<1x20xf32>
      %328 = vector.shape_cast %324 : vector<1x20xf32> to vector<1x1x20xf32>
      tpu.vector_store %arg26[%325, %c5_106, %c0_107], %328 {strides = array<i32>} : memref<14x14x20xf32, #tpu.memory_space<vmem>>, vector<1x1x20xf32>,
      %329 = vector.extract_strided_slice %286 {offsets = [12, 0], sizes = [1, 20], strides = [1, 1]} : vector<28x20xf32> to vector<1x20xf32>
      %330 = vector.extract_strided_slice %286 {offsets = [13, 0], sizes = [1, 20], strides = [1, 1]} : vector<28x20xf32> to vector<1x20xf32>
      %331 = arith.maximumf %329, %330 : vector<1x20xf32>
      %332 = arith.index_cast %276 : i32 to index
      %c6_108 = arith.constant 6 : index
      %c0_109 = arith.constant 0 : index
      %333 = vector.load %arg26[%332, %c6_108, %c0_109] : memref<14x14x20xf32, #tpu.memory_space<vmem>>, vector<1x1x20xf32>
      %334 = vector.shape_cast %333 : vector<1x1x20xf32> to vector<1x20xf32>
      %335 = vector.shape_cast %331 : vector<1x20xf32> to vector<1x1x20xf32>
      tpu.vector_store %arg26[%332, %c6_108, %c0_109], %335 {strides = array<i32>} : memref<14x14x20xf32, #tpu.memory_space<vmem>>, vector<1x1x20xf32>,
      %336 = vector.extract_strided_slice %286 {offsets = [14, 0], sizes = [1, 20], strides = [1, 1]} : vector<28x20xf32> to vector<1x20xf32>
      %337 = vector.extract_strided_slice %286 {offsets = [15, 0], sizes = [1, 20], strides = [1, 1]} : vector<28x20xf32> to vector<1x20xf32>
      %338 = arith.maximumf %336, %337 : vector<1x20xf32>
      %339 = arith.index_cast %276 : i32 to index
      %c7_110 = arith.constant 7 : index
      %c0_111 = arith.constant 0 : index
      %340 = vector.load %arg26[%339, %c7_110, %c0_111] : memref<14x14x20xf32, #tpu.memory_space<vmem>>, vector<1x1x20xf32>
      %341 = vector.shape_cast %340 : vector<1x1x20xf32> to vector<1x20xf32>
      %342 = vector.shape_cast %338 : vector<1x20xf32> to vector<1x1x20xf32>
      tpu.vector_store %arg26[%339, %c7_110, %c0_111], %342 {strides = array<i32>} : memref<14x14x20xf32, #tpu.memory_space<vmem>>, vector<1x1x20xf32>,
      %343 = vector.extract_strided_slice %286 {offsets = [16, 0], sizes = [1, 20], strides = [1, 1]} : vector<28x20xf32> to vector<1x20xf32>
      %344 = vector.extract_strided_slice %286 {offsets = [17, 0], sizes = [1, 20], strides = [1, 1]} : vector<28x20xf32> to vector<1x20xf32>
      %345 = arith.maximumf %343, %344 : vector<1x20xf32>
      %346 = arith.index_cast %276 : i32 to index
      %c8_112 = arith.constant 8 : index
      %c0_113 = arith.constant 0 : index
      %347 = vector.load %arg26[%346, %c8_112, %c0_113] : memref<14x14x20xf32, #tpu.memory_space<vmem>>, vector<1x1x20xf32>
      %348 = vector.shape_cast %347 : vector<1x1x20xf32> to vector<1x20xf32>
      %349 = vector.shape_cast %345 : vector<1x20xf32> to vector<1x1x20xf32>
      tpu.vector_store %arg26[%346, %c8_112, %c0_113], %349 {strides = array<i32>} : memref<14x14x20xf32, #tpu.memory_space<vmem>>, vector<1x1x20xf32>,
      %350 = vector.extract_strided_slice %286 {offsets = [18, 0], sizes = [1, 20], strides = [1, 1]} : vector<28x20xf32> to vector<1x20xf32>
      %351 = vector.extract_strided_slice %286 {offsets = [19, 0], sizes = [1, 20], strides = [1, 1]} : vector<28x20xf32> to vector<1x20xf32>
      %352 = arith.maximumf %350, %351 : vector<1x20xf32>
      %353 = arith.index_cast %276 : i32 to index
      %c9_114 = arith.constant 9 : index
      %c0_115 = arith.constant 0 : index
      %354 = vector.load %arg26[%353, %c9_114, %c0_115] : memref<14x14x20xf32, #tpu.memory_space<vmem>>, vector<1x1x20xf32>
      %355 = vector.shape_cast %354 : vector<1x1x20xf32> to vector<1x20xf32>
      %356 = vector.shape_cast %352 : vector<1x20xf32> to vector<1x1x20xf32>
      tpu.vector_store %arg26[%353, %c9_114, %c0_115], %356 {strides = array<i32>} : memref<14x14x20xf32, #tpu.memory_space<vmem>>, vector<1x1x20xf32>,
      %357 = vector.extract_strided_slice %286 {offsets = [20, 0], sizes = [1, 20], strides = [1, 1]} : vector<28x20xf32> to vector<1x20xf32>
      %358 = vector.extract_strided_slice %286 {offsets = [21, 0], sizes = [1, 20], strides = [1, 1]} : vector<28x20xf32> to vector<1x20xf32>
      %359 = arith.maximumf %357, %358 : vector<1x20xf32>
      %360 = arith.index_cast %276 : i32 to index
      %c10 = arith.constant 10 : index
      %c0_116 = arith.constant 0 : index
      %361 = vector.load %arg26[%360, %c10, %c0_116] : memref<14x14x20xf32, #tpu.memory_space<vmem>>, vector<1x1x20xf32>
      %362 = vector.shape_cast %361 : vector<1x1x20xf32> to vector<1x20xf32>
      %363 = vector.shape_cast %359 : vector<1x20xf32> to vector<1x1x20xf32>
      tpu.vector_store %arg26[%360, %c10, %c0_116], %363 {strides = array<i32>} : memref<14x14x20xf32, #tpu.memory_space<vmem>>, vector<1x1x20xf32>,
      %364 = vector.extract_strided_slice %286 {offsets = [22, 0], sizes = [1, 20], strides = [1, 1]} : vector<28x20xf32> to vector<1x20xf32>
      %365 = vector.extract_strided_slice %286 {offsets = [23, 0], sizes = [1, 20], strides = [1, 1]} : vector<28x20xf32> to vector<1x20xf32>
      %366 = arith.maximumf %364, %365 : vector<1x20xf32>
      %367 = arith.index_cast %276 : i32 to index
      %c11 = arith.constant 11 : index
      %c0_117 = arith.constant 0 : index
      %368 = vector.load %arg26[%367, %c11, %c0_117] : memref<14x14x20xf32, #tpu.memory_space<vmem>>, vector<1x1x20xf32>
      %369 = vector.shape_cast %368 : vector<1x1x20xf32> to vector<1x20xf32>
      %370 = vector.shape_cast %366 : vector<1x20xf32> to vector<1x1x20xf32>
      tpu.vector_store %arg26[%367, %c11, %c0_117], %370 {strides = array<i32>} : memref<14x14x20xf32, #tpu.memory_space<vmem>>, vector<1x1x20xf32>,
      %371 = vector.extract_strided_slice %286 {offsets = [24, 0], sizes = [1, 20], strides = [1, 1]} : vector<28x20xf32> to vector<1x20xf32>
      %372 = vector.extract_strided_slice %286 {offsets = [25, 0], sizes = [1, 20], strides = [1, 1]} : vector<28x20xf32> to vector<1x20xf32>
      %373 = arith.maximumf %371, %372 : vector<1x20xf32>
      %374 = arith.index_cast %276 : i32 to index
      %c12 = arith.constant 12 : index
      %c0_118 = arith.constant 0 : index
      %375 = vector.load %arg26[%374, %c12, %c0_118] : memref<14x14x20xf32, #tpu.memory_space<vmem>>, vector<1x1x20xf32>
      %376 = vector.shape_cast %375 : vector<1x1x20xf32> to vector<1x20xf32>
      %377 = vector.shape_cast %373 : vector<1x20xf32> to vector<1x1x20xf32>
      tpu.vector_store %arg26[%374, %c12, %c0_118], %377 {strides = array<i32>} : memref<14x14x20xf32, #tpu.memory_space<vmem>>, vector<1x1x20xf32>,
      %378 = vector.extract_strided_slice %286 {offsets = [26, 0], sizes = [1, 20], strides = [1, 1]} : vector<28x20xf32> to vector<1x20xf32>
      %379 = vector.extract_strided_slice %286 {offsets = [27, 0], sizes = [1, 20], strides = [1, 1]} : vector<28x20xf32> to vector<1x20xf32>
      %380 = arith.maximumf %378, %379 : vector<1x20xf32>
      %381 = arith.index_cast %276 : i32 to index
      %c13 = arith.constant 13 : index
      %c0_119 = arith.constant 0 : index
      %382 = vector.load %arg26[%381, %c13, %c0_119] : memref<14x14x20xf32, #tpu.memory_space<vmem>>, vector<1x1x20xf32>
      %383 = vector.shape_cast %382 : vector<1x1x20xf32> to vector<1x20xf32>
      %384 = vector.shape_cast %380 : vector<1x20xf32> to vector<1x1x20xf32>
      tpu.vector_store %arg26[%381, %c13, %c0_119], %384 {strides = array<i32>} : memref<14x14x20xf32, #tpu.memory_space<vmem>>, vector<1x1x20xf32>,
    }
    %c14_i32_25 = arith.constant 14 : i32
    %c0_26 = arith.constant 0 : index
    %c0_27 = arith.constant 0 : index
    %12 = vector.load %arg12[%c0_26, %c0_27] : memref<1x32xf32, #tpu.memory_space<vmem>>, vector<1x32xf32>
    %c0_i32_28 = arith.constant 0 : i32
    %c12_i32 = arith.constant 12 : i32
    %13 = arith.addi %c0_i32_28, %c12_i32 : i32
    %c1_i32_29 = arith.constant 1 : i32
    scf.for %arg30 = %c0_i32_28 to %13 step %c1_i32_29  : i32 {
      %c1_i32_88 = arith.constant 1 : i32
      %275 = arith.muli %arg30, %c1_i32_88 : i32
      %c0_i32_89 = arith.constant 0 : i32
      %276 = arith.addi %c0_i32_89, %275 : i32
      %cst_90 = arith.constant 0.000000e+00 : f32
      %277 = vector.broadcast %cst_90 : f32 to vector<12x32xf32>
      %c0_i32_91 = arith.constant 0 : i32
      %278 = arith.addi %276, %c0_i32_91 : i32
      %279 = arith.index_cast %278 : i32 to index
      %c0_92 = arith.constant 0 : index
      %c0_93 = arith.constant 0 : index
      %280 = vector.load %arg26[%279, %c0_92, %c0_93] : memref<14x14x20xf32, #tpu.memory_space<vmem>>, vector<1x12x20xf32>
      %281 = vector.shape_cast %280 : vector<1x12x20xf32> to vector<12x20xf32>
      %c0_94 = arith.constant 0 : index
      %c0_95 = arith.constant 0 : index
      %c0_96 = arith.constant 0 : index
      %282 = vector.load %arg11[%c0_94, %c0_95, %c0_96] : memref<9x20x32xf32, #tpu.memory_space<vmem>>, vector<1x20x32xf32>
      %283 = vector.shape_cast %282 : vector<1x20x32xf32> to vector<20x32xf32>
      %cst_97 = arith.constant dense<0.000000e+00> : vector<12x32xf32>
      %284 = tpu.matmul %281, %283, %cst_97 {dimension_numbers = #tpu.dot_dimension_numbers<[1], [0], [0], [1], [0, 0, 1, 1], [], []>} : vector<12x20xf32>, vector<20x32xf32>, vector<12x32xf32> -> vector<12x32xf32>
      %285 = arith.addf %277, %284 : vector<12x32xf32>
      %c0_i32_98 = arith.constant 0 : i32
      %286 = arith.addi %276, %c0_i32_98 : i32
      %287 = arith.index_cast %286 : i32 to index
      %c1_99 = arith.constant 1 : index
      %c0_100 = arith.constant 0 : index
      %288 = vector.load %arg26[%287, %c1_99, %c0_100] : memref<14x14x20xf32, #tpu.memory_space<vmem>>, vector<1x12x20xf32>
      %289 = vector.shape_cast %288 : vector<1x12x20xf32> to vector<12x20xf32>
      %c1_101 = arith.constant 1 : index
      %c0_102 = arith.constant 0 : index
      %c0_103 = arith.constant 0 : index
      %290 = vector.load %arg11[%c1_101, %c0_102, %c0_103] : memref<9x20x32xf32, #tpu.memory_space<vmem>>, vector<1x20x32xf32>
      %291 = vector.shape_cast %290 : vector<1x20x32xf32> to vector<20x32xf32>
      %cst_104 = arith.constant dense<0.000000e+00> : vector<12x32xf32>
      %292 = tpu.matmul %289, %291, %cst_104 {dimension_numbers = #tpu.dot_dimension_numbers<[1], [0], [0], [1], [0, 0, 1, 1], [], []>} : vector<12x20xf32>, vector<20x32xf32>, vector<12x32xf32> -> vector<12x32xf32>
      %293 = arith.addf %285, %292 : vector<12x32xf32>
      %c0_i32_105 = arith.constant 0 : i32
      %294 = arith.addi %276, %c0_i32_105 : i32
      %295 = arith.index_cast %294 : i32 to index
      %c2_106 = arith.constant 2 : index
      %c0_107 = arith.constant 0 : index
      %296 = vector.load %arg26[%295, %c2_106, %c0_107] : memref<14x14x20xf32, #tpu.memory_space<vmem>>, vector<1x12x20xf32>
      %297 = vector.shape_cast %296 : vector<1x12x20xf32> to vector<12x20xf32>
      %c2_108 = arith.constant 2 : index
      %c0_109 = arith.constant 0 : index
      %c0_110 = arith.constant 0 : index
      %298 = vector.load %arg11[%c2_108, %c0_109, %c0_110] : memref<9x20x32xf32, #tpu.memory_space<vmem>>, vector<1x20x32xf32>
      %299 = vector.shape_cast %298 : vector<1x20x32xf32> to vector<20x32xf32>
      %cst_111 = arith.constant dense<0.000000e+00> : vector<12x32xf32>
      %300 = tpu.matmul %297, %299, %cst_111 {dimension_numbers = #tpu.dot_dimension_numbers<[1], [0], [0], [1], [0, 0, 1, 1], [], []>} : vector<12x20xf32>, vector<20x32xf32>, vector<12x32xf32> -> vector<12x32xf32>
      %301 = arith.addf %293, %300 : vector<12x32xf32>
      %c1_i32_112 = arith.constant 1 : i32
      %302 = arith.addi %276, %c1_i32_112 : i32
      %303 = arith.index_cast %302 : i32 to index
      %c0_113 = arith.constant 0 : index
      %c0_114 = arith.constant 0 : index
      %304 = vector.load %arg26[%303, %c0_113, %c0_114] : memref<14x14x20xf32, #tpu.memory_space<vmem>>, vector<1x12x20xf32>
      %305 = vector.shape_cast %304 : vector<1x12x20xf32> to vector<12x20xf32>
      %c3_115 = arith.constant 3 : index
      %c0_116 = arith.constant 0 : index
      %c0_117 = arith.constant 0 : index
      %306 = vector.load %arg11[%c3_115, %c0_116, %c0_117] : memref<9x20x32xf32, #tpu.memory_space<vmem>>, vector<1x20x32xf32>
      %307 = vector.shape_cast %306 : vector<1x20x32xf32> to vector<20x32xf32>
      %cst_118 = arith.constant dense<0.000000e+00> : vector<12x32xf32>
      %308 = tpu.matmul %305, %307, %cst_118 {dimension_numbers = #tpu.dot_dimension_numbers<[1], [0], [0], [1], [0, 0, 1, 1], [], []>} : vector<12x20xf32>, vector<20x32xf32>, vector<12x32xf32> -> vector<12x32xf32>
      %309 = arith.addf %301, %308 : vector<12x32xf32>
      %c1_i32_119 = arith.constant 1 : i32
      %310 = arith.addi %276, %c1_i32_119 : i32
      %311 = arith.index_cast %310 : i32 to index
      %c1_120 = arith.constant 1 : index
      %c0_121 = arith.constant 0 : index
      %312 = vector.load %arg26[%311, %c1_120, %c0_121] : memref<14x14x20xf32, #tpu.memory_space<vmem>>, vector<1x12x20xf32>
      %313 = vector.shape_cast %312 : vector<1x12x20xf32> to vector<12x20xf32>
      %c4_122 = arith.constant 4 : index
      %c0_123 = arith.constant 0 : index
      %c0_124 = arith.constant 0 : index
      %314 = vector.load %arg11[%c4_122, %c0_123, %c0_124] : memref<9x20x32xf32, #tpu.memory_space<vmem>>, vector<1x20x32xf32>
      %315 = vector.shape_cast %314 : vector<1x20x32xf32> to vector<20x32xf32>
      %cst_125 = arith.constant dense<0.000000e+00> : vector<12x32xf32>
      %316 = tpu.matmul %313, %315, %cst_125 {dimension_numbers = #tpu.dot_dimension_numbers<[1], [0], [0], [1], [0, 0, 1, 1], [], []>} : vector<12x20xf32>, vector<20x32xf32>, vector<12x32xf32> -> vector<12x32xf32>
      %317 = arith.addf %309, %316 : vector<12x32xf32>
      %c1_i32_126 = arith.constant 1 : i32
      %318 = arith.addi %276, %c1_i32_126 : i32
      %319 = arith.index_cast %318 : i32 to index
      %c2_127 = arith.constant 2 : index
      %c0_128 = arith.constant 0 : index
      %320 = vector.load %arg26[%319, %c2_127, %c0_128] : memref<14x14x20xf32, #tpu.memory_space<vmem>>, vector<1x12x20xf32>
      %321 = vector.shape_cast %320 : vector<1x12x20xf32> to vector<12x20xf32>
      %c5_129 = arith.constant 5 : index
      %c0_130 = arith.constant 0 : index
      %c0_131 = arith.constant 0 : index
      %322 = vector.load %arg11[%c5_129, %c0_130, %c0_131] : memref<9x20x32xf32, #tpu.memory_space<vmem>>, vector<1x20x32xf32>
      %323 = vector.shape_cast %322 : vector<1x20x32xf32> to vector<20x32xf32>
      %cst_132 = arith.constant dense<0.000000e+00> : vector<12x32xf32>
      %324 = tpu.matmul %321, %323, %cst_132 {dimension_numbers = #tpu.dot_dimension_numbers<[1], [0], [0], [1], [0, 0, 1, 1], [], []>} : vector<12x20xf32>, vector<20x32xf32>, vector<12x32xf32> -> vector<12x32xf32>
      %325 = arith.addf %317, %324 : vector<12x32xf32>
      %c2_i32 = arith.constant 2 : i32
      %326 = arith.addi %276, %c2_i32 : i32
      %327 = arith.index_cast %326 : i32 to index
      %c0_133 = arith.constant 0 : index
      %c0_134 = arith.constant 0 : index
      %328 = vector.load %arg26[%327, %c0_133, %c0_134] : memref<14x14x20xf32, #tpu.memory_space<vmem>>, vector<1x12x20xf32>
      %329 = vector.shape_cast %328 : vector<1x12x20xf32> to vector<12x20xf32>
      %c6_135 = arith.constant 6 : index
      %c0_136 = arith.constant 0 : index
      %c0_137 = arith.constant 0 : index
      %330 = vector.load %arg11[%c6_135, %c0_136, %c0_137] : memref<9x20x32xf32, #tpu.memory_space<vmem>>, vector<1x20x32xf32>
      %331 = vector.shape_cast %330 : vector<1x20x32xf32> to vector<20x32xf32>
      %cst_138 = arith.constant dense<0.000000e+00> : vector<12x32xf32>
      %332 = tpu.matmul %329, %331, %cst_138 {dimension_numbers = #tpu.dot_dimension_numbers<[1], [0], [0], [1], [0, 0, 1, 1], [], []>} : vector<12x20xf32>, vector<20x32xf32>, vector<12x32xf32> -> vector<12x32xf32>
      %333 = arith.addf %325, %332 : vector<12x32xf32>
      %c2_i32_139 = arith.constant 2 : i32
      %334 = arith.addi %276, %c2_i32_139 : i32
      %335 = arith.index_cast %334 : i32 to index
      %c1_140 = arith.constant 1 : index
      %c0_141 = arith.constant 0 : index
      %336 = vector.load %arg26[%335, %c1_140, %c0_141] : memref<14x14x20xf32, #tpu.memory_space<vmem>>, vector<1x12x20xf32>
      %337 = vector.shape_cast %336 : vector<1x12x20xf32> to vector<12x20xf32>
      %c7_142 = arith.constant 7 : index
      %c0_143 = arith.constant 0 : index
      %c0_144 = arith.constant 0 : index
      %338 = vector.load %arg11[%c7_142, %c0_143, %c0_144] : memref<9x20x32xf32, #tpu.memory_space<vmem>>, vector<1x20x32xf32>
      %339 = vector.shape_cast %338 : vector<1x20x32xf32> to vector<20x32xf32>
      %cst_145 = arith.constant dense<0.000000e+00> : vector<12x32xf32>
      %340 = tpu.matmul %337, %339, %cst_145 {dimension_numbers = #tpu.dot_dimension_numbers<[1], [0], [0], [1], [0, 0, 1, 1], [], []>} : vector<12x20xf32>, vector<20x32xf32>, vector<12x32xf32> -> vector<12x32xf32>
      %341 = arith.addf %333, %340 : vector<12x32xf32>
      %c2_i32_146 = arith.constant 2 : i32
      %342 = arith.addi %276, %c2_i32_146 : i32
      %343 = arith.index_cast %342 : i32 to index
      %c2_147 = arith.constant 2 : index
      %c0_148 = arith.constant 0 : index
      %344 = vector.load %arg26[%343, %c2_147, %c0_148] : memref<14x14x20xf32, #tpu.memory_space<vmem>>, vector<1x12x20xf32>
      %345 = vector.shape_cast %344 : vector<1x12x20xf32> to vector<12x20xf32>
      %c8_149 = arith.constant 8 : index
      %c0_150 = arith.constant 0 : index
      %c0_151 = arith.constant 0 : index
      %346 = vector.load %arg11[%c8_149, %c0_150, %c0_151] : memref<9x20x32xf32, #tpu.memory_space<vmem>>, vector<1x20x32xf32>
      %347 = vector.shape_cast %346 : vector<1x20x32xf32> to vector<20x32xf32>
      %cst_152 = arith.constant dense<0.000000e+00> : vector<12x32xf32>
      %348 = tpu.matmul %345, %347, %cst_152 {dimension_numbers = #tpu.dot_dimension_numbers<[1], [0], [0], [1], [0, 0, 1, 1], [], []>} : vector<12x20xf32>, vector<20x32xf32>, vector<12x32xf32> -> vector<12x32xf32>
      %349 = arith.addf %341, %348 : vector<12x32xf32>
      %350 = vector.broadcast %12 : vector<1x32xf32> to vector<12x32xf32>
      %351 = arith.addf %349, %350 : vector<12x32xf32>
      %cst_153 = arith.constant 0.000000e+00 : f32
      %352 = vector.broadcast %cst_153 : f32 to vector<12x32xf32>
      %353 = arith.maximumf %351, %352 : vector<12x32xf32>
      %c0_i32_154 = arith.constant 0 : i32
      %354 = arith.addi %276, %c0_i32_154 : i32
      %355 = arith.index_cast %354 : i32 to index
      %c0_155 = arith.constant 0 : index
      %c0_156 = arith.constant 0 : index
      %356 = vector.load %arg27[%355, %c0_155, %c0_156] : memref<12x12x32xf32, #tpu.memory_space<vmem>>, vector<1x12x32xf32>
      %357 = vector.shape_cast %356 : vector<1x12x32xf32> to vector<12x32xf32>
      %358 = vector.shape_cast %353 : vector<12x32xf32> to vector<1x12x32xf32>
      tpu.vector_store %arg27[%355, %c0_155, %c0_156], %358 {strides = array<i32>} : memref<12x12x32xf32, #tpu.memory_space<vmem>>, vector<1x12x32xf32>,
    }
    %c12_i32_30 = arith.constant 12 : i32
    %c0_31 = arith.constant 0 : index
    %c0_32 = arith.constant 0 : index
    %14 = vector.load %arg14[%c0_31, %c0_32] : memref<1x64xf32, #tpu.memory_space<vmem>>, vector<1x64xf32>
    %c0_33 = arith.constant 0 : index
    %c0_34 = arith.constant 0 : index
    %15 = vector.load %arg15[%c0_33, %c0_34] : memref<1x64xf32, #tpu.memory_space<vmem>>, vector<1x64xf32>
    %c0_i32_35 = arith.constant 0 : i32
    %c10_i32 = arith.constant 10 : i32
    %16 = arith.addi %c0_i32_35, %c10_i32 : i32
    %c1_i32_36 = arith.constant 1 : i32
    scf.for %arg30 = %c0_i32_35 to %16 step %c1_i32_36  : i32 {
      %c1_i32_88 = arith.constant 1 : i32
      %275 = arith.muli %arg30, %c1_i32_88 : i32
      %c0_i32_89 = arith.constant 0 : i32
      %276 = arith.addi %c0_i32_89, %275 : i32
      %cst_90 = arith.constant 0.000000e+00 : f32
      %277 = vector.broadcast %cst_90 : f32 to vector<10x64xf32>
      %c0_i32_91 = arith.constant 0 : i32
      %278 = arith.addi %276, %c0_i32_91 : i32
      %279 = arith.index_cast %278 : i32 to index
      %c0_92 = arith.constant 0 : index
      %c0_93 = arith.constant 0 : index
      %280 = vector.load %arg27[%279, %c0_92, %c0_93] : memref<12x12x32xf32, #tpu.memory_space<vmem>>, vector<1x10x32xf32>
      %281 = vector.shape_cast %280 : vector<1x10x32xf32> to vector<10x32xf32>
      %c0_94 = arith.constant 0 : index
      %c0_95 = arith.constant 0 : index
      %c0_96 = arith.constant 0 : index
      %282 = vector.load %arg13[%c0_94, %c0_95, %c0_96] : memref<9x32x64xf32, #tpu.memory_space<vmem>>, vector<1x32x64xf32>
      %283 = vector.shape_cast %282 : vector<1x32x64xf32> to vector<32x64xf32>
      %cst_97 = arith.constant dense<0.000000e+00> : vector<10x64xf32>
      %284 = tpu.matmul %281, %283, %cst_97 {dimension_numbers = #tpu.dot_dimension_numbers<[1], [0], [0], [1], [0, 0, 1, 1], [], []>} : vector<10x32xf32>, vector<32x64xf32>, vector<10x64xf32> -> vector<10x64xf32>
      %285 = arith.addf %277, %284 : vector<10x64xf32>
      %c0_i32_98 = arith.constant 0 : i32
      %286 = arith.addi %276, %c0_i32_98 : i32
      %287 = arith.index_cast %286 : i32 to index
      %c1_99 = arith.constant 1 : index
      %c0_100 = arith.constant 0 : index
      %288 = vector.load %arg27[%287, %c1_99, %c0_100] : memref<12x12x32xf32, #tpu.memory_space<vmem>>, vector<1x10x32xf32>
      %289 = vector.shape_cast %288 : vector<1x10x32xf32> to vector<10x32xf32>
      %c1_101 = arith.constant 1 : index
      %c0_102 = arith.constant 0 : index
      %c0_103 = arith.constant 0 : index
      %290 = vector.load %arg13[%c1_101, %c0_102, %c0_103] : memref<9x32x64xf32, #tpu.memory_space<vmem>>, vector<1x32x64xf32>
      %291 = vector.shape_cast %290 : vector<1x32x64xf32> to vector<32x64xf32>
      %cst_104 = arith.constant dense<0.000000e+00> : vector<10x64xf32>
      %292 = tpu.matmul %289, %291, %cst_104 {dimension_numbers = #tpu.dot_dimension_numbers<[1], [0], [0], [1], [0, 0, 1, 1], [], []>} : vector<10x32xf32>, vector<32x64xf32>, vector<10x64xf32> -> vector<10x64xf32>
      %293 = arith.addf %285, %292 : vector<10x64xf32>
      %c0_i32_105 = arith.constant 0 : i32
      %294 = arith.addi %276, %c0_i32_105 : i32
      %295 = arith.index_cast %294 : i32 to index
      %c2_106 = arith.constant 2 : index
      %c0_107 = arith.constant 0 : index
      %296 = vector.load %arg27[%295, %c2_106, %c0_107] : memref<12x12x32xf32, #tpu.memory_space<vmem>>, vector<1x10x32xf32>
      %297 = vector.shape_cast %296 : vector<1x10x32xf32> to vector<10x32xf32>
      %c2_108 = arith.constant 2 : index
      %c0_109 = arith.constant 0 : index
      %c0_110 = arith.constant 0 : index
      %298 = vector.load %arg13[%c2_108, %c0_109, %c0_110] : memref<9x32x64xf32, #tpu.memory_space<vmem>>, vector<1x32x64xf32>
      %299 = vector.shape_cast %298 : vector<1x32x64xf32> to vector<32x64xf32>
      %cst_111 = arith.constant dense<0.000000e+00> : vector<10x64xf32>
      %300 = tpu.matmul %297, %299, %cst_111 {dimension_numbers = #tpu.dot_dimension_numbers<[1], [0], [0], [1], [0, 0, 1, 1], [], []>} : vector<10x32xf32>, vector<32x64xf32>, vector<10x64xf32> -> vector<10x64xf32>
      %301 = arith.addf %293, %300 : vector<10x64xf32>
      %c1_i32_112 = arith.constant 1 : i32
      %302 = arith.addi %276, %c1_i32_112 : i32
      %303 = arith.index_cast %302 : i32 to index
      %c0_113 = arith.constant 0 : index
      %c0_114 = arith.constant 0 : index
      %304 = vector.load %arg27[%303, %c0_113, %c0_114] : memref<12x12x32xf32, #tpu.memory_space<vmem>>, vector<1x10x32xf32>
      %305 = vector.shape_cast %304 : vector<1x10x32xf32> to vector<10x32xf32>
      %c3_115 = arith.constant 3 : index
      %c0_116 = arith.constant 0 : index
      %c0_117 = arith.constant 0 : index
      %306 = vector.load %arg13[%c3_115, %c0_116, %c0_117] : memref<9x32x64xf32, #tpu.memory_space<vmem>>, vector<1x32x64xf32>
      %307 = vector.shape_cast %306 : vector<1x32x64xf32> to vector<32x64xf32>
      %cst_118 = arith.constant dense<0.000000e+00> : vector<10x64xf32>
      %308 = tpu.matmul %305, %307, %cst_118 {dimension_numbers = #tpu.dot_dimension_numbers<[1], [0], [0], [1], [0, 0, 1, 1], [], []>} : vector<10x32xf32>, vector<32x64xf32>, vector<10x64xf32> -> vector<10x64xf32>
      %309 = arith.addf %301, %308 : vector<10x64xf32>
      %c1_i32_119 = arith.constant 1 : i32
      %310 = arith.addi %276, %c1_i32_119 : i32
      %311 = arith.index_cast %310 : i32 to index
      %c1_120 = arith.constant 1 : index
      %c0_121 = arith.constant 0 : index
      %312 = vector.load %arg27[%311, %c1_120, %c0_121] : memref<12x12x32xf32, #tpu.memory_space<vmem>>, vector<1x10x32xf32>
      %313 = vector.shape_cast %312 : vector<1x10x32xf32> to vector<10x32xf32>
      %c4_122 = arith.constant 4 : index
      %c0_123 = arith.constant 0 : index
      %c0_124 = arith.constant 0 : index
      %314 = vector.load %arg13[%c4_122, %c0_123, %c0_124] : memref<9x32x64xf32, #tpu.memory_space<vmem>>, vector<1x32x64xf32>
      %315 = vector.shape_cast %314 : vector<1x32x64xf32> to vector<32x64xf32>
      %cst_125 = arith.constant dense<0.000000e+00> : vector<10x64xf32>
      %316 = tpu.matmul %313, %315, %cst_125 {dimension_numbers = #tpu.dot_dimension_numbers<[1], [0], [0], [1], [0, 0, 1, 1], [], []>} : vector<10x32xf32>, vector<32x64xf32>, vector<10x64xf32> -> vector<10x64xf32>
      %317 = arith.addf %309, %316 : vector<10x64xf32>
      %c1_i32_126 = arith.constant 1 : i32
      %318 = arith.addi %276, %c1_i32_126 : i32
      %319 = arith.index_cast %318 : i32 to index
      %c2_127 = arith.constant 2 : index
      %c0_128 = arith.constant 0 : index
      %320 = vector.load %arg27[%319, %c2_127, %c0_128] : memref<12x12x32xf32, #tpu.memory_space<vmem>>, vector<1x10x32xf32>
      %321 = vector.shape_cast %320 : vector<1x10x32xf32> to vector<10x32xf32>
      %c5_129 = arith.constant 5 : index
      %c0_130 = arith.constant 0 : index
      %c0_131 = arith.constant 0 : index
      %322 = vector.load %arg13[%c5_129, %c0_130, %c0_131] : memref<9x32x64xf32, #tpu.memory_space<vmem>>, vector<1x32x64xf32>
      %323 = vector.shape_cast %322 : vector<1x32x64xf32> to vector<32x64xf32>
      %cst_132 = arith.constant dense<0.000000e+00> : vector<10x64xf32>
      %324 = tpu.matmul %321, %323, %cst_132 {dimension_numbers = #tpu.dot_dimension_numbers<[1], [0], [0], [1], [0, 0, 1, 1], [], []>} : vector<10x32xf32>, vector<32x64xf32>, vector<10x64xf32> -> vector<10x64xf32>
      %325 = arith.addf %317, %324 : vector<10x64xf32>
      %c2_i32 = arith.constant 2 : i32
      %326 = arith.addi %276, %c2_i32 : i32
      %327 = arith.index_cast %326 : i32 to index
      %c0_133 = arith.constant 0 : index
      %c0_134 = arith.constant 0 : index
      %328 = vector.load %arg27[%327, %c0_133, %c0_134] : memref<12x12x32xf32, #tpu.memory_space<vmem>>, vector<1x10x32xf32>
      %329 = vector.shape_cast %328 : vector<1x10x32xf32> to vector<10x32xf32>
      %c6_135 = arith.constant 6 : index
      %c0_136 = arith.constant 0 : index
      %c0_137 = arith.constant 0 : index
      %330 = vector.load %arg13[%c6_135, %c0_136, %c0_137] : memref<9x32x64xf32, #tpu.memory_space<vmem>>, vector<1x32x64xf32>
      %331 = vector.shape_cast %330 : vector<1x32x64xf32> to vector<32x64xf32>
      %cst_138 = arith.constant dense<0.000000e+00> : vector<10x64xf32>
      %332 = tpu.matmul %329, %331, %cst_138 {dimension_numbers = #tpu.dot_dimension_numbers<[1], [0], [0], [1], [0, 0, 1, 1], [], []>} : vector<10x32xf32>, vector<32x64xf32>, vector<10x64xf32> -> vector<10x64xf32>
      %333 = arith.addf %325, %332 : vector<10x64xf32>
      %c2_i32_139 = arith.constant 2 : i32
      %334 = arith.addi %276, %c2_i32_139 : i32
      %335 = arith.index_cast %334 : i32 to index
      %c1_140 = arith.constant 1 : index
      %c0_141 = arith.constant 0 : index
      %336 = vector.load %arg27[%335, %c1_140, %c0_141] : memref<12x12x32xf32, #tpu.memory_space<vmem>>, vector<1x10x32xf32>
      %337 = vector.shape_cast %336 : vector<1x10x32xf32> to vector<10x32xf32>
      %c7_142 = arith.constant 7 : index
      %c0_143 = arith.constant 0 : index
      %c0_144 = arith.constant 0 : index
      %338 = vector.load %arg13[%c7_142, %c0_143, %c0_144] : memref<9x32x64xf32, #tpu.memory_space<vmem>>, vector<1x32x64xf32>
      %339 = vector.shape_cast %338 : vector<1x32x64xf32> to vector<32x64xf32>
      %cst_145 = arith.constant dense<0.000000e+00> : vector<10x64xf32>
      %340 = tpu.matmul %337, %339, %cst_145 {dimension_numbers = #tpu.dot_dimension_numbers<[1], [0], [0], [1], [0, 0, 1, 1], [], []>} : vector<10x32xf32>, vector<32x64xf32>, vector<10x64xf32> -> vector<10x64xf32>
      %341 = arith.addf %333, %340 : vector<10x64xf32>
      %c2_i32_146 = arith.constant 2 : i32
      %342 = arith.addi %276, %c2_i32_146 : i32
      %343 = arith.index_cast %342 : i32 to index
      %c2_147 = arith.constant 2 : index
      %c0_148 = arith.constant 0 : index
      %344 = vector.load %arg27[%343, %c2_147, %c0_148] : memref<12x12x32xf32, #tpu.memory_space<vmem>>, vector<1x10x32xf32>
      %345 = vector.shape_cast %344 : vector<1x10x32xf32> to vector<10x32xf32>
      %c8_149 = arith.constant 8 : index
      %c0_150 = arith.constant 0 : index
      %c0_151 = arith.constant 0 : index
      %346 = vector.load %arg13[%c8_149, %c0_150, %c0_151] : memref<9x32x64xf32, #tpu.memory_space<vmem>>, vector<1x32x64xf32>
      %347 = vector.shape_cast %346 : vector<1x32x64xf32> to vector<32x64xf32>
      %cst_152 = arith.constant dense<0.000000e+00> : vector<10x64xf32>
      %348 = tpu.matmul %345, %347, %cst_152 {dimension_numbers = #tpu.dot_dimension_numbers<[1], [0], [0], [1], [0, 0, 1, 1], [], []>} : vector<10x32xf32>, vector<32x64xf32>, vector<10x64xf32> -> vector<10x64xf32>
      %349 = arith.addf %341, %348 : vector<10x64xf32>
      %cst_153 = arith.constant 0.000000e+00 : f32
      %350 = vector.broadcast %cst_153 : f32 to vector<10x64xf32>
      %351 = arith.maximumf %349, %350 : vector<10x64xf32>
      %352 = vector.broadcast %14 : vector<1x64xf32> to vector<10x64xf32>
      %353 = arith.mulf %351, %352 : vector<10x64xf32>
      %354 = vector.broadcast %15 : vector<1x64xf32> to vector<10x64xf32>
      %355 = arith.addf %353, %354 : vector<10x64xf32>
      %c0_i32_154 = arith.constant 0 : i32
      %356 = arith.addi %276, %c0_i32_154 : i32
      %357 = arith.index_cast %356 : i32 to index
      %c0_155 = arith.constant 0 : index
      %c0_156 = arith.constant 0 : index
      %358 = vector.load %arg28[%357, %c0_155, %c0_156] : memref<10x10x64xf32, #tpu.memory_space<vmem>>, vector<1x10x64xf32>
      %359 = vector.shape_cast %358 : vector<1x10x64xf32> to vector<10x64xf32>
      %360 = vector.shape_cast %355 : vector<10x64xf32> to vector<1x10x64xf32>
      tpu.vector_store %arg28[%357, %c0_155, %c0_156], %360 {strides = array<i32>} : memref<10x10x64xf32, #tpu.memory_space<vmem>>, vector<1x10x64xf32>,
    }
    %c10_i32_37 = arith.constant 10 : i32
    %cst_38 = arith.constant 0.000000e+00 : f32
    %17 = vector.broadcast %cst_38 : f32 to vector<1x64xf32>
    %c0_39 = arith.constant 0 : index
    %c0_40 = arith.constant 0 : index
    %c0_41 = arith.constant 0 : index
    %18 = vector.load %arg28[%c0_39, %c0_40, %c0_41] : memref<10x10x64xf32, #tpu.memory_space<vmem>>, vector<1x10x64xf32>
    %19 = vector.shape_cast %18 : vector<1x10x64xf32> to vector<10x64xf32>
    %c1 = arith.constant 1 : index
    %c0_42 = arith.constant 0 : index
    %c0_43 = arith.constant 0 : index
    %20 = vector.load %arg28[%c1, %c0_42, %c0_43] : memref<10x10x64xf32, #tpu.memory_space<vmem>>, vector<1x10x64xf32>
    %21 = vector.shape_cast %20 : vector<1x10x64xf32> to vector<10x64xf32>
    %22 = vector.extract_strided_slice %19 {offsets = [0, 0], sizes = [1, 64], strides = [1, 1]} : vector<10x64xf32> to vector<1x64xf32>
    %23 = vector.extract_strided_slice %19 {offsets = [1, 0], sizes = [1, 64], strides = [1, 1]} : vector<10x64xf32> to vector<1x64xf32>
    %24 = arith.maximumf %22, %23 : vector<1x64xf32>
    %25 = vector.extract_strided_slice %21 {offsets = [0, 0], sizes = [1, 64], strides = [1, 1]} : vector<10x64xf32> to vector<1x64xf32>
    %26 = vector.extract_strided_slice %21 {offsets = [1, 0], sizes = [1, 64], strides = [1, 1]} : vector<10x64xf32> to vector<1x64xf32>
    %27 = arith.maximumf %25, %26 : vector<1x64xf32>
    %28 = arith.maximumf %24, %27 : vector<1x64xf32>
    %29 = arith.addf %17, %28 : vector<1x64xf32>
    %30 = vector.extract_strided_slice %19 {offsets = [2, 0], sizes = [1, 64], strides = [1, 1]} : vector<10x64xf32> to vector<1x64xf32>
    %31 = vector.extract_strided_slice %19 {offsets = [3, 0], sizes = [1, 64], strides = [1, 1]} : vector<10x64xf32> to vector<1x64xf32>
    %32 = arith.maximumf %30, %31 : vector<1x64xf32>
    %33 = vector.extract_strided_slice %21 {offsets = [2, 0], sizes = [1, 64], strides = [1, 1]} : vector<10x64xf32> to vector<1x64xf32>
    %34 = vector.extract_strided_slice %21 {offsets = [3, 0], sizes = [1, 64], strides = [1, 1]} : vector<10x64xf32> to vector<1x64xf32>
    %35 = arith.maximumf %33, %34 : vector<1x64xf32>
    %36 = arith.maximumf %32, %35 : vector<1x64xf32>
    %37 = arith.addf %29, %36 : vector<1x64xf32>
    %38 = vector.extract_strided_slice %19 {offsets = [4, 0], sizes = [1, 64], strides = [1, 1]} : vector<10x64xf32> to vector<1x64xf32>
    %39 = vector.extract_strided_slice %19 {offsets = [5, 0], sizes = [1, 64], strides = [1, 1]} : vector<10x64xf32> to vector<1x64xf32>
    %40 = arith.maximumf %38, %39 : vector<1x64xf32>
    %41 = vector.extract_strided_slice %21 {offsets = [4, 0], sizes = [1, 64], strides = [1, 1]} : vector<10x64xf32> to vector<1x64xf32>
    %42 = vector.extract_strided_slice %21 {offsets = [5, 0], sizes = [1, 64], strides = [1, 1]} : vector<10x64xf32> to vector<1x64xf32>
    %43 = arith.maximumf %41, %42 : vector<1x64xf32>
    %44 = arith.maximumf %40, %43 : vector<1x64xf32>
    %45 = arith.addf %37, %44 : vector<1x64xf32>
    %46 = vector.extract_strided_slice %19 {offsets = [6, 0], sizes = [1, 64], strides = [1, 1]} : vector<10x64xf32> to vector<1x64xf32>
    %47 = vector.extract_strided_slice %19 {offsets = [7, 0], sizes = [1, 64], strides = [1, 1]} : vector<10x64xf32> to vector<1x64xf32>
    %48 = arith.maximumf %46, %47 : vector<1x64xf32>
    %49 = vector.extract_strided_slice %21 {offsets = [6, 0], sizes = [1, 64], strides = [1, 1]} : vector<10x64xf32> to vector<1x64xf32>
    %50 = vector.extract_strided_slice %21 {offsets = [7, 0], sizes = [1, 64], strides = [1, 1]} : vector<10x64xf32> to vector<1x64xf32>
    %51 = arith.maximumf %49, %50 : vector<1x64xf32>
    %52 = arith.maximumf %48, %51 : vector<1x64xf32>
    %53 = arith.addf %45, %52 : vector<1x64xf32>
    %54 = vector.extract_strided_slice %19 {offsets = [8, 0], sizes = [1, 64], strides = [1, 1]} : vector<10x64xf32> to vector<1x64xf32>
    %55 = vector.extract_strided_slice %19 {offsets = [9, 0], sizes = [1, 64], strides = [1, 1]} : vector<10x64xf32> to vector<1x64xf32>
    %56 = arith.maximumf %54, %55 : vector<1x64xf32>
    %57 = vector.extract_strided_slice %21 {offsets = [8, 0], sizes = [1, 64], strides = [1, 1]} : vector<10x64xf32> to vector<1x64xf32>
    %58 = vector.extract_strided_slice %21 {offsets = [9, 0], sizes = [1, 64], strides = [1, 1]} : vector<10x64xf32> to vector<1x64xf32>
    %59 = arith.maximumf %57, %58 : vector<1x64xf32>
    %60 = arith.maximumf %56, %59 : vector<1x64xf32>
    %61 = arith.addf %53, %60 : vector<1x64xf32>
    %c2 = arith.constant 2 : index
    %c0_44 = arith.constant 0 : index
    %c0_45 = arith.constant 0 : index
    %62 = vector.load %arg28[%c2, %c0_44, %c0_45] : memref<10x10x64xf32, #tpu.memory_space<vmem>>, vector<1x10x64xf32>
    %63 = vector.shape_cast %62 : vector<1x10x64xf32> to vector<10x64xf32>
    %c3 = arith.constant 3 : index
    %c0_46 = arith.constant 0 : index
    %c0_47 = arith.constant 0 : index
    %64 = vector.load %arg28[%c3, %c0_46, %c0_47] : memref<10x10x64xf32, #tpu.memory_space<vmem>>, vector<1x10x64xf32>
    %65 = vector.shape_cast %64 : vector<1x10x64xf32> to vector<10x64xf32>
    %66 = vector.extract_strided_slice %63 {offsets = [0, 0], sizes = [1, 64], strides = [1, 1]} : vector<10x64xf32> to vector<1x64xf32>
    %67 = vector.extract_strided_slice %63 {offsets = [1, 0], sizes = [1, 64], strides = [1, 1]} : vector<10x64xf32> to vector<1x64xf32>
    %68 = arith.maximumf %66, %67 : vector<1x64xf32>
    %69 = vector.extract_strided_slice %65 {offsets = [0, 0], sizes = [1, 64], strides = [1, 1]} : vector<10x64xf32> to vector<1x64xf32>
    %70 = vector.extract_strided_slice %65 {offsets = [1, 0], sizes = [1, 64], strides = [1, 1]} : vector<10x64xf32> to vector<1x64xf32>
    %71 = arith.maximumf %69, %70 : vector<1x64xf32>
    %72 = arith.maximumf %68, %71 : vector<1x64xf32>
    %73 = arith.addf %61, %72 : vector<1x64xf32>
    %74 = vector.extract_strided_slice %63 {offsets = [2, 0], sizes = [1, 64], strides = [1, 1]} : vector<10x64xf32> to vector<1x64xf32>
    %75 = vector.extract_strided_slice %63 {offsets = [3, 0], sizes = [1, 64], strides = [1, 1]} : vector<10x64xf32> to vector<1x64xf32>
    %76 = arith.maximumf %74, %75 : vector<1x64xf32>
    %77 = vector.extract_strided_slice %65 {offsets = [2, 0], sizes = [1, 64], strides = [1, 1]} : vector<10x64xf32> to vector<1x64xf32>
    %78 = vector.extract_strided_slice %65 {offsets = [3, 0], sizes = [1, 64], strides = [1, 1]} : vector<10x64xf32> to vector<1x64xf32>
    %79 = arith.maximumf %77, %78 : vector<1x64xf32>
    %80 = arith.maximumf %76, %79 : vector<1x64xf32>
    %81 = arith.addf %73, %80 : vector<1x64xf32>
    %82 = vector.extract_strided_slice %63 {offsets = [4, 0], sizes = [1, 64], strides = [1, 1]} : vector<10x64xf32> to vector<1x64xf32>
    %83 = vector.extract_strided_slice %63 {offsets = [5, 0], sizes = [1, 64], strides = [1, 1]} : vector<10x64xf32> to vector<1x64xf32>
    %84 = arith.maximumf %82, %83 : vector<1x64xf32>
    %85 = vector.extract_strided_slice %65 {offsets = [4, 0], sizes = [1, 64], strides = [1, 1]} : vector<10x64xf32> to vector<1x64xf32>
    %86 = vector.extract_strided_slice %65 {offsets = [5, 0], sizes = [1, 64], strides = [1, 1]} : vector<10x64xf32> to vector<1x64xf32>
    %87 = arith.maximumf %85, %86 : vector<1x64xf32>
    %88 = arith.maximumf %84, %87 : vector<1x64xf32>
    %89 = arith.addf %81, %88 : vector<1x64xf32>
    %90 = vector.extract_strided_slice %63 {offsets = [6, 0], sizes = [1, 64], strides = [1, 1]} : vector<10x64xf32> to vector<1x64xf32>
    %91 = vector.extract_strided_slice %63 {offsets = [7, 0], sizes = [1, 64], strides = [1, 1]} : vector<10x64xf32> to vector<1x64xf32>
    %92 = arith.maximumf %90, %91 : vector<1x64xf32>
    %93 = vector.extract_strided_slice %65 {offsets = [6, 0], sizes = [1, 64], strides = [1, 1]} : vector<10x64xf32> to vector<1x64xf32>
    %94 = vector.extract_strided_slice %65 {offsets = [7, 0], sizes = [1, 64], strides = [1, 1]} : vector<10x64xf32> to vector<1x64xf32>
    %95 = arith.maximumf %93, %94 : vector<1x64xf32>
    %96 = arith.maximumf %92, %95 : vector<1x64xf32>
    %97 = arith.addf %89, %96 : vector<1x64xf32>
    %98 = vector.extract_strided_slice %63 {offsets = [8, 0], sizes = [1, 64], strides = [1, 1]} : vector<10x64xf32> to vector<1x64xf32>
    %99 = vector.extract_strided_slice %63 {offsets = [9, 0], sizes = [1, 64], strides = [1, 1]} : vector<10x64xf32> to vector<1x64xf32>
    %100 = arith.maximumf %98, %99 : vector<1x64xf32>
    %101 = vector.extract_strided_slice %65 {offsets = [8, 0], sizes = [1, 64], strides = [1, 1]} : vector<10x64xf32> to vector<1x64xf32>
    %102 = vector.extract_strided_slice %65 {offsets = [9, 0], sizes = [1, 64], strides = [1, 1]} : vector<10x64xf32> to vector<1x64xf32>
    %103 = arith.maximumf %101, %102 : vector<1x64xf32>
    %104 = arith.maximumf %100, %103 : vector<1x64xf32>
    %105 = arith.addf %97, %104 : vector<1x64xf32>
    %c4 = arith.constant 4 : index
    %c0_48 = arith.constant 0 : index
    %c0_49 = arith.constant 0 : index
    %106 = vector.load %arg28[%c4, %c0_48, %c0_49] : memref<10x10x64xf32, #tpu.memory_space<vmem>>, vector<1x10x64xf32>
    %107 = vector.shape_cast %106 : vector<1x10x64xf32> to vector<10x64xf32>
    %c5 = arith.constant 5 : index
    %c0_50 = arith.constant 0 : index
    %c0_51 = arith.constant 0 : index
    %108 = vector.load %arg28[%c5, %c0_50, %c0_51] : memref<10x10x64xf32, #tpu.memory_space<vmem>>, vector<1x10x64xf32>
    %109 = vector.shape_cast %108 : vector<1x10x64xf32> to vector<10x64xf32>
    %110 = vector.extract_strided_slice %107 {offsets = [0, 0], sizes = [1, 64], strides = [1, 1]} : vector<10x64xf32> to vector<1x64xf32>
    %111 = vector.extract_strided_slice %107 {offsets = [1, 0], sizes = [1, 64], strides = [1, 1]} : vector<10x64xf32> to vector<1x64xf32>
    %112 = arith.maximumf %110, %111 : vector<1x64xf32>
    %113 = vector.extract_strided_slice %109 {offsets = [0, 0], sizes = [1, 64], strides = [1, 1]} : vector<10x64xf32> to vector<1x64xf32>
    %114 = vector.extract_strided_slice %109 {offsets = [1, 0], sizes = [1, 64], strides = [1, 1]} : vector<10x64xf32> to vector<1x64xf32>
    %115 = arith.maximumf %113, %114 : vector<1x64xf32>
    %116 = arith.maximumf %112, %115 : vector<1x64xf32>
    %117 = arith.addf %105, %116 : vector<1x64xf32>
    %118 = vector.extract_strided_slice %107 {offsets = [2, 0], sizes = [1, 64], strides = [1, 1]} : vector<10x64xf32> to vector<1x64xf32>
    %119 = vector.extract_strided_slice %107 {offsets = [3, 0], sizes = [1, 64], strides = [1, 1]} : vector<10x64xf32> to vector<1x64xf32>
    %120 = arith.maximumf %118, %119 : vector<1x64xf32>
    %121 = vector.extract_strided_slice %109 {offsets = [2, 0], sizes = [1, 64], strides = [1, 1]} : vector<10x64xf32> to vector<1x64xf32>
    %122 = vector.extract_strided_slice %109 {offsets = [3, 0], sizes = [1, 64], strides = [1, 1]} : vector<10x64xf32> to vector<1x64xf32>
    %123 = arith.maximumf %121, %122 : vector<1x64xf32>
    %124 = arith.maximumf %120, %123 : vector<1x64xf32>
    %125 = arith.addf %117, %124 : vector<1x64xf32>
    %126 = vector.extract_strided_slice %107 {offsets = [4, 0], sizes = [1, 64], strides = [1, 1]} : vector<10x64xf32> to vector<1x64xf32>
    %127 = vector.extract_strided_slice %107 {offsets = [5, 0], sizes = [1, 64], strides = [1, 1]} : vector<10x64xf32> to vector<1x64xf32>
    %128 = arith.maximumf %126, %127 : vector<1x64xf32>
    %129 = vector.extract_strided_slice %109 {offsets = [4, 0], sizes = [1, 64], strides = [1, 1]} : vector<10x64xf32> to vector<1x64xf32>
    %130 = vector.extract_strided_slice %109 {offsets = [5, 0], sizes = [1, 64], strides = [1, 1]} : vector<10x64xf32> to vector<1x64xf32>
    %131 = arith.maximumf %129, %130 : vector<1x64xf32>
    %132 = arith.maximumf %128, %131 : vector<1x64xf32>
    %133 = arith.addf %125, %132 : vector<1x64xf32>
    %134 = vector.extract_strided_slice %107 {offsets = [6, 0], sizes = [1, 64], strides = [1, 1]} : vector<10x64xf32> to vector<1x64xf32>
    %135 = vector.extract_strided_slice %107 {offsets = [7, 0], sizes = [1, 64], strides = [1, 1]} : vector<10x64xf32> to vector<1x64xf32>
    %136 = arith.maximumf %134, %135 : vector<1x64xf32>
    %137 = vector.extract_strided_slice %109 {offsets = [6, 0], sizes = [1, 64], strides = [1, 1]} : vector<10x64xf32> to vector<1x64xf32>
    %138 = vector.extract_strided_slice %109 {offsets = [7, 0], sizes = [1, 64], strides = [1, 1]} : vector<10x64xf32> to vector<1x64xf32>
    %139 = arith.maximumf %137, %138 : vector<1x64xf32>
    %140 = arith.maximumf %136, %139 : vector<1x64xf32>
    %141 = arith.addf %133, %140 : vector<1x64xf32>
    %142 = vector.extract_strided_slice %107 {offsets = [8, 0], sizes = [1, 64], strides = [1, 1]} : vector<10x64xf32> to vector<1x64xf32>
    %143 = vector.extract_strided_slice %107 {offsets = [9, 0], sizes = [1, 64], strides = [1, 1]} : vector<10x64xf32> to vector<1x64xf32>
    %144 = arith.maximumf %142, %143 : vector<1x64xf32>
    %145 = vector.extract_strided_slice %109 {offsets = [8, 0], sizes = [1, 64], strides = [1, 1]} : vector<10x64xf32> to vector<1x64xf32>
    %146 = vector.extract_strided_slice %109 {offsets = [9, 0], sizes = [1, 64], strides = [1, 1]} : vector<10x64xf32> to vector<1x64xf32>
    %147 = arith.maximumf %145, %146 : vector<1x64xf32>
    %148 = arith.maximumf %144, %147 : vector<1x64xf32>
    %149 = arith.addf %141, %148 : vector<1x64xf32>
    %c6 = arith.constant 6 : index
    %c0_52 = arith.constant 0 : index
    %c0_53 = arith.constant 0 : index
    %150 = vector.load %arg28[%c6, %c0_52, %c0_53] : memref<10x10x64xf32, #tpu.memory_space<vmem>>, vector<1x10x64xf32>
    %151 = vector.shape_cast %150 : vector<1x10x64xf32> to vector<10x64xf32>
    %c7 = arith.constant 7 : index
    %c0_54 = arith.constant 0 : index
    %c0_55 = arith.constant 0 : index
    %152 = vector.load %arg28[%c7, %c0_54, %c0_55] : memref<10x10x64xf32, #tpu.memory_space<vmem>>, vector<1x10x64xf32>
    %153 = vector.shape_cast %152 : vector<1x10x64xf32> to vector<10x64xf32>
    %154 = vector.extract_strided_slice %151 {offsets = [0, 0], sizes = [1, 64], strides = [1, 1]} : vector<10x64xf32> to vector<1x64xf32>
    %155 = vector.extract_strided_slice %151 {offsets = [1, 0], sizes = [1, 64], strides = [1, 1]} : vector<10x64xf32> to vector<1x64xf32>
    %156 = arith.maximumf %154, %155 : vector<1x64xf32>
    %157 = vector.extract_strided_slice %153 {offsets = [0, 0], sizes = [1, 64], strides = [1, 1]} : vector<10x64xf32> to vector<1x64xf32>
    %158 = vector.extract_strided_slice %153 {offsets = [1, 0], sizes = [1, 64], strides = [1, 1]} : vector<10x64xf32> to vector<1x64xf32>
    %159 = arith.maximumf %157, %158 : vector<1x64xf32>
    %160 = arith.maximumf %156, %159 : vector<1x64xf32>
    %161 = arith.addf %149, %160 : vector<1x64xf32>
    %162 = vector.extract_strided_slice %151 {offsets = [2, 0], sizes = [1, 64], strides = [1, 1]} : vector<10x64xf32> to vector<1x64xf32>
    %163 = vector.extract_strided_slice %151 {offsets = [3, 0], sizes = [1, 64], strides = [1, 1]} : vector<10x64xf32> to vector<1x64xf32>
    %164 = arith.maximumf %162, %163 : vector<1x64xf32>
    %165 = vector.extract_strided_slice %153 {offsets = [2, 0], sizes = [1, 64], strides = [1, 1]} : vector<10x64xf32> to vector<1x64xf32>
    %166 = vector.extract_strided_slice %153 {offsets = [3, 0], sizes = [1, 64], strides = [1, 1]} : vector<10x64xf32> to vector<1x64xf32>
    %167 = arith.maximumf %165, %166 : vector<1x64xf32>
    %168 = arith.maximumf %164, %167 : vector<1x64xf32>
    %169 = arith.addf %161, %168 : vector<1x64xf32>
    %170 = vector.extract_strided_slice %151 {offsets = [4, 0], sizes = [1, 64], strides = [1, 1]} : vector<10x64xf32> to vector<1x64xf32>
    %171 = vector.extract_strided_slice %151 {offsets = [5, 0], sizes = [1, 64], strides = [1, 1]} : vector<10x64xf32> to vector<1x64xf32>
    %172 = arith.maximumf %170, %171 : vector<1x64xf32>
    %173 = vector.extract_strided_slice %153 {offsets = [4, 0], sizes = [1, 64], strides = [1, 1]} : vector<10x64xf32> to vector<1x64xf32>
    %174 = vector.extract_strided_slice %153 {offsets = [5, 0], sizes = [1, 64], strides = [1, 1]} : vector<10x64xf32> to vector<1x64xf32>
    %175 = arith.maximumf %173, %174 : vector<1x64xf32>
    %176 = arith.maximumf %172, %175 : vector<1x64xf32>
    %177 = arith.addf %169, %176 : vector<1x64xf32>
    %178 = vector.extract_strided_slice %151 {offsets = [6, 0], sizes = [1, 64], strides = [1, 1]} : vector<10x64xf32> to vector<1x64xf32>
    %179 = vector.extract_strided_slice %151 {offsets = [7, 0], sizes = [1, 64], strides = [1, 1]} : vector<10x64xf32> to vector<1x64xf32>
    %180 = arith.maximumf %178, %179 : vector<1x64xf32>
    %181 = vector.extract_strided_slice %153 {offsets = [6, 0], sizes = [1, 64], strides = [1, 1]} : vector<10x64xf32> to vector<1x64xf32>
    %182 = vector.extract_strided_slice %153 {offsets = [7, 0], sizes = [1, 64], strides = [1, 1]} : vector<10x64xf32> to vector<1x64xf32>
    %183 = arith.maximumf %181, %182 : vector<1x64xf32>
    %184 = arith.maximumf %180, %183 : vector<1x64xf32>
    %185 = arith.addf %177, %184 : vector<1x64xf32>
    %186 = vector.extract_strided_slice %151 {offsets = [8, 0], sizes = [1, 64], strides = [1, 1]} : vector<10x64xf32> to vector<1x64xf32>
    %187 = vector.extract_strided_slice %151 {offsets = [9, 0], sizes = [1, 64], strides = [1, 1]} : vector<10x64xf32> to vector<1x64xf32>
    %188 = arith.maximumf %186, %187 : vector<1x64xf32>
    %189 = vector.extract_strided_slice %153 {offsets = [8, 0], sizes = [1, 64], strides = [1, 1]} : vector<10x64xf32> to vector<1x64xf32>
    %190 = vector.extract_strided_slice %153 {offsets = [9, 0], sizes = [1, 64], strides = [1, 1]} : vector<10x64xf32> to vector<1x64xf32>
    %191 = arith.maximumf %189, %190 : vector<1x64xf32>
    %192 = arith.maximumf %188, %191 : vector<1x64xf32>
    %193 = arith.addf %185, %192 : vector<1x64xf32>
    %c8 = arith.constant 8 : index
    %c0_56 = arith.constant 0 : index
    %c0_57 = arith.constant 0 : index
    %194 = vector.load %arg28[%c8, %c0_56, %c0_57] : memref<10x10x64xf32, #tpu.memory_space<vmem>>, vector<1x10x64xf32>
    %195 = vector.shape_cast %194 : vector<1x10x64xf32> to vector<10x64xf32>
    %c9 = arith.constant 9 : index
    %c0_58 = arith.constant 0 : index
    %c0_59 = arith.constant 0 : index
    %196 = vector.load %arg28[%c9, %c0_58, %c0_59] : memref<10x10x64xf32, #tpu.memory_space<vmem>>, vector<1x10x64xf32>
    %197 = vector.shape_cast %196 : vector<1x10x64xf32> to vector<10x64xf32>
    %198 = vector.extract_strided_slice %195 {offsets = [0, 0], sizes = [1, 64], strides = [1, 1]} : vector<10x64xf32> to vector<1x64xf32>
    %199 = vector.extract_strided_slice %195 {offsets = [1, 0], sizes = [1, 64], strides = [1, 1]} : vector<10x64xf32> to vector<1x64xf32>
    %200 = arith.maximumf %198, %199 : vector<1x64xf32>
    %201 = vector.extract_strided_slice %197 {offsets = [0, 0], sizes = [1, 64], strides = [1, 1]} : vector<10x64xf32> to vector<1x64xf32>
    %202 = vector.extract_strided_slice %197 {offsets = [1, 0], sizes = [1, 64], strides = [1, 1]} : vector<10x64xf32> to vector<1x64xf32>
    %203 = arith.maximumf %201, %202 : vector<1x64xf32>
    %204 = arith.maximumf %200, %203 : vector<1x64xf32>
    %205 = arith.addf %193, %204 : vector<1x64xf32>
    %206 = vector.extract_strided_slice %195 {offsets = [2, 0], sizes = [1, 64], strides = [1, 1]} : vector<10x64xf32> to vector<1x64xf32>
    %207 = vector.extract_strided_slice %195 {offsets = [3, 0], sizes = [1, 64], strides = [1, 1]} : vector<10x64xf32> to vector<1x64xf32>
    %208 = arith.maximumf %206, %207 : vector<1x64xf32>
    %209 = vector.extract_strided_slice %197 {offsets = [2, 0], sizes = [1, 64], strides = [1, 1]} : vector<10x64xf32> to vector<1x64xf32>
    %210 = vector.extract_strided_slice %197 {offsets = [3, 0], sizes = [1, 64], strides = [1, 1]} : vector<10x64xf32> to vector<1x64xf32>
    %211 = arith.maximumf %209, %210 : vector<1x64xf32>
    %212 = arith.maximumf %208, %211 : vector<1x64xf32>
    %213 = arith.addf %205, %212 : vector<1x64xf32>
    %214 = vector.extract_strided_slice %195 {offsets = [4, 0], sizes = [1, 64], strides = [1, 1]} : vector<10x64xf32> to vector<1x64xf32>
    %215 = vector.extract_strided_slice %195 {offsets = [5, 0], sizes = [1, 64], strides = [1, 1]} : vector<10x64xf32> to vector<1x64xf32>
    %216 = arith.maximumf %214, %215 : vector<1x64xf32>
    %217 = vector.extract_strided_slice %197 {offsets = [4, 0], sizes = [1, 64], strides = [1, 1]} : vector<10x64xf32> to vector<1x64xf32>
    %218 = vector.extract_strided_slice %197 {offsets = [5, 0], sizes = [1, 64], strides = [1, 1]} : vector<10x64xf32> to vector<1x64xf32>
    %219 = arith.maximumf %217, %218 : vector<1x64xf32>
    %220 = arith.maximumf %216, %219 : vector<1x64xf32>
    %221 = arith.addf %213, %220 : vector<1x64xf32>
    %222 = vector.extract_strided_slice %195 {offsets = [6, 0], sizes = [1, 64], strides = [1, 1]} : vector<10x64xf32> to vector<1x64xf32>
    %223 = vector.extract_strided_slice %195 {offsets = [7, 0], sizes = [1, 64], strides = [1, 1]} : vector<10x64xf32> to vector<1x64xf32>
    %224 = arith.maximumf %222, %223 : vector<1x64xf32>
    %225 = vector.extract_strided_slice %197 {offsets = [6, 0], sizes = [1, 64], strides = [1, 1]} : vector<10x64xf32> to vector<1x64xf32>
    %226 = vector.extract_strided_slice %197 {offsets = [7, 0], sizes = [1, 64], strides = [1, 1]} : vector<10x64xf32> to vector<1x64xf32>
    %227 = arith.maximumf %225, %226 : vector<1x64xf32>
    %228 = arith.maximumf %224, %227 : vector<1x64xf32>
    %229 = arith.addf %221, %228 : vector<1x64xf32>
    %230 = vector.extract_strided_slice %195 {offsets = [8, 0], sizes = [1, 64], strides = [1, 1]} : vector<10x64xf32> to vector<1x64xf32>
    %231 = vector.extract_strided_slice %195 {offsets = [9, 0], sizes = [1, 64], strides = [1, 1]} : vector<10x64xf32> to vector<1x64xf32>
    %232 = arith.maximumf %230, %231 : vector<1x64xf32>
    %233 = vector.extract_strided_slice %197 {offsets = [8, 0], sizes = [1, 64], strides = [1, 1]} : vector<10x64xf32> to vector<1x64xf32>
    %234 = vector.extract_strided_slice %197 {offsets = [9, 0], sizes = [1, 64], strides = [1, 1]} : vector<10x64xf32> to vector<1x64xf32>
    %235 = arith.maximumf %233, %234 : vector<1x64xf32>
    %236 = arith.maximumf %232, %235 : vector<1x64xf32>
    %237 = arith.addf %229, %236 : vector<1x64xf32>
    %cst_60 = arith.constant 4.000000e-02 : f32
    %238 = vector.broadcast %cst_60 : f32 to vector<1x64xf32>
    %239 = arith.mulf %237, %238 : vector<1x64xf32>
    %240 = vector.extract_strided_slice %239 {offsets = [0, 0], sizes = [1, 32], strides = [1, 1]} : vector<1x64xf32> to vector<1x32xf32>
    %c0_61 = arith.constant 0 : index
    %c0_62 = arith.constant 0 : index
    %241 = vector.load %arg29[%c0_61, %c0_62] : memref<2x32xf32, #tpu.memory_space<vmem>>, vector<1x32xf32>
    tpu.vector_store %arg29[%c0_61, %c0_62], %240 {strides = array<i32>} : memref<2x32xf32, #tpu.memory_space<vmem>>, vector<1x32xf32>,
    %242 = vector.extract_strided_slice %239 {offsets = [0, 32], sizes = [1, 32], strides = [1, 1]} : vector<1x64xf32> to vector<1x32xf32>
    %c1_63 = arith.constant 1 : index
    %c0_64 = arith.constant 0 : index
    %243 = vector.load %arg29[%c1_63, %c0_64] : memref<2x32xf32, #tpu.memory_space<vmem>>, vector<1x32xf32>
    tpu.vector_store %arg29[%c1_63, %c0_64], %242 {strides = array<i32>} : memref<2x32xf32, #tpu.memory_space<vmem>>, vector<1x32xf32>,
    %c0_65 = arith.constant 0 : index
    %c0_66 = arith.constant 0 : index
    %244 = vector.load %arg29[%c0_65, %c0_66] : memref<2x32xf32, #tpu.memory_space<vmem>>, vector<2x32xf32>
    %c0_67 = arith.constant 0 : index
    %c0_68 = arith.constant 0 : index
    %245 = vector.load %arg16[%c0_67, %c0_68] : memref<32x64xf32, #tpu.memory_space<vmem>>, vector<32x64xf32>
    %cst_69 = arith.constant dense<0.000000e+00> : vector<2x64xf32>
    %246 = tpu.matmul %244, %245, %cst_69 {dimension_numbers = #tpu.dot_dimension_numbers<[1], [0], [0], [1], [0, 0, 1, 1], [], []>} : vector<2x32xf32>, vector<32x64xf32>, vector<2x64xf32> -> vector<2x64xf32>
    %c0_70 = arith.constant 0 : index
    %c0_71 = arith.constant 0 : index
    %247 = vector.load %arg17[%c0_70, %c0_71] : memref<1x64xf32, #tpu.memory_space<vmem>>, vector<1x64xf32>
    %248 = vector.broadcast %247 : vector<1x64xf32> to vector<2x64xf32>
    %249 = arith.addf %246, %248 : vector<2x64xf32>
    %cst_72 = arith.constant 0.000000e+00 : f32
    %250 = vector.broadcast %cst_72 : f32 to vector<2x64xf32>
    %251 = arith.maximumf %249, %250 : vector<2x64xf32>
    %c0_73 = arith.constant 0 : index
    %c0_74 = arith.constant 0 : index
    %252 = vector.load %arg18[%c0_73, %c0_74] : memref<64x64xf32, #tpu.memory_space<vmem>>, vector<64x64xf32>
    %cst_75 = arith.constant dense<0.000000e+00> : vector<2x64xf32>
    %253 = tpu.matmul %251, %252, %cst_75 {dimension_numbers = #tpu.dot_dimension_numbers<[1], [0], [0], [1], [0, 0, 1, 1], [], []>} : vector<2x64xf32>, vector<64x64xf32>, vector<2x64xf32> -> vector<2x64xf32>
    %c0_76 = arith.constant 0 : index
    %c0_77 = arith.constant 0 : index
    %254 = vector.load %arg19[%c0_76, %c0_77] : memref<1x64xf32, #tpu.memory_space<vmem>>, vector<1x64xf32>
    %255 = vector.broadcast %254 : vector<1x64xf32> to vector<2x64xf32>
    %256 = arith.addf %253, %255 : vector<2x64xf32>
    %cst_78 = arith.constant 0.000000e+00 : f32
    %257 = vector.broadcast %cst_78 : f32 to vector<2x64xf32>
    %258 = arith.maximumf %256, %257 : vector<2x64xf32>
    %c0_79 = arith.constant 0 : index
    %c0_80 = arith.constant 0 : index
    %259 = vector.load %arg20[%c0_79, %c0_80] : memref<64x10xf32, #tpu.memory_space<vmem>>, vector<64x10xf32>
    %cst_81 = arith.constant dense<0.000000e+00> : vector<2x10xf32>
    %260 = tpu.matmul %258, %259, %cst_81 {dimension_numbers = #tpu.dot_dimension_numbers<[1], [0], [0], [1], [0, 0, 1, 1], [], []>} : vector<2x64xf32>, vector<64x10xf32>, vector<2x10xf32> -> vector<2x10xf32>
    %c0_82 = arith.constant 0 : index
    %c0_83 = arith.constant 0 : index
    %261 = vector.load %arg21[%c0_82, %c0_83] : memref<1x10xf32, #tpu.memory_space<vmem>>, vector<1x10xf32>
    %262 = vector.broadcast %261 : vector<1x10xf32> to vector<2x10xf32>
    %263 = arith.addf %260, %262 : vector<2x10xf32>
    %cst_84 = arith.constant dense<0xFF800000> : vector<2xf32>
    %264 = vector.multi_reduction <maximumf>, %263, %cst_84 [1] : vector<2x10xf32> to vector<2xf32>
    %265 = vector.shape_cast %264 : vector<2xf32> to vector<2x1xf32>
    %266 = vector.broadcast %265 : vector<2x1xf32> to vector<2x10xf32>
    %267 = arith.subf %263, %266 : vector<2x10xf32>
    %268 = math.exp %267 : vector<2x10xf32>
    %cst_85 = arith.constant dense<0.000000e+00> : vector<2xf32>
    %269 = vector.multi_reduction <add>, %268, %cst_85 [1] : vector<2x10xf32> to vector<2xf32>
    %270 = vector.shape_cast %269 : vector<2xf32> to vector<2x1xf32>
    %271 = math.log %270 : vector<2x1xf32>
    %272 = vector.broadcast %271 : vector<2x1xf32> to vector<2x10xf32>
    %273 = arith.subf %267, %272 : vector<2x10xf32>
    %c0_86 = arith.constant 0 : index
    %c0_87 = arith.constant 0 : index
    %274 = vector.load %arg22[%c0_86, %c0_87] : memref<2x10xf32, #tpu.memory_space<vmem>>, vector<2x10xf32>
    tpu.vector_store %arg22[%c0_86, %c0_87], %273 {strides = array<i32>} : memref<2x10xf32, #tpu.memory_space<vmem>>, vector<2x10xf32>,
    return
  }
  func.func @transform_0(%arg0: i32) -> (i32, i32, i32) {
    %c0_i32 = arith.constant 0 : i32
    %c0_i32_0 = arith.constant 0 : i32
    %c0_i32_1 = arith.constant 0 : i32
    return %arg0, %c0_i32, %c0_i32_0 : i32, i32, i32
  }
  func.func @transform_1(%arg0: i32) -> (i32, i32, i32) {
    %c0_i32 = arith.constant 0 : i32
    %c0_i32_0 = arith.constant 0 : i32
    %c0_i32_1 = arith.constant 0 : i32
    %c0_i32_2 = arith.constant 0 : i32
    return %c0_i32, %c0_i32_0, %c0_i32_1 : i32, i32, i32
  }
  func.func @transform_2(%arg0: i32) -> (i32, i32) {
    %c0_i32 = arith.constant 0 : i32
    %c0_i32_0 = arith.constant 0 : i32
    %c0_i32_1 = arith.constant 0 : i32
    return %c0_i32, %c0_i32_0 : i32, i32
  }
  func.func @transform_3(%arg0: i32) -> (i32, i32) {
    %c0_i32 = arith.constant 0 : i32
    %c0_i32_0 = arith.constant 0 : i32
    %c0_i32_1 = arith.constant 0 : i32
    return %c0_i32, %c0_i32_0 : i32, i32
  }
  func.func @transform_4(%arg0: i32) -> (i32, i32, i32) {
    %c0_i32 = arith.constant 0 : i32
    %c0_i32_0 = arith.constant 0 : i32
    %c0_i32_1 = arith.constant 0 : i32
    %c0_i32_2 = arith.constant 0 : i32
    return %c0_i32, %c0_i32_0, %c0_i32_1 : i32, i32, i32
  }
  func.func @transform_5(%arg0: i32) -> (i32, i32) {
    %c0_i32 = arith.constant 0 : i32
    %c0_i32_0 = arith.constant 0 : i32
    %c0_i32_1 = arith.constant 0 : i32
    return %c0_i32, %c0_i32_0 : i32, i32
  }
  func.func @transform_6(%arg0: i32) -> (i32, i32) {
    %c0_i32 = arith.constant 0 : i32
    %c0_i32_0 = arith.constant 0 : i32
    %c0_i32_1 = arith.constant 0 : i32
    return %c0_i32, %c0_i32_0 : i32, i32
  }
  func.func @transform_7(%arg0: i32) -> (i32, i32) {
    %c0_i32 = arith.constant 0 : i32
    %c0_i32_0 = arith.constant 0 : i32
    %c0_i32_1 = arith.constant 0 : i32
    return %c0_i32, %c0_i32_0 : i32, i32
  }
  func.func @transform_8(%arg0: i32) -> (i32, i32) {
    %c0_i32 = arith.constant 0 : i32
    %c0_i32_0 = arith.constant 0 : i32
    %c0_i32_1 = arith.constant 0 : i32
    return %c0_i32, %c0_i32_0 : i32, i32
  }
  func.func @transform_9(%arg0: i32) -> (i32, i32) {
    %c0_i32 = arith.constant 0 : i32
    %c0_i32_0 = arith.constant 0 : i32
    %c0_i32_1 = arith.constant 0 : i32
    return %c0_i32, %c0_i32_0 : i32, i32
  }
  func.func @transform_10(%arg0: i32) -> (i32, i32, i32) {
    %c0_i32 = arith.constant 0 : i32
    %c0_i32_0 = arith.constant 0 : i32
    %c0_i32_1 = arith.constant 0 : i32
    %c0_i32_2 = arith.constant 0 : i32
    return %c0_i32, %c0_i32_0, %c0_i32_1 : i32, i32, i32
  }
  func.func @transform_11(%arg0: i32) -> (i32, i32) {
    %c0_i32 = arith.constant 0 : i32
    %c0_i32_0 = arith.constant 0 : i32
    %c0_i32_1 = arith.constant 0 : i32
    return %c0_i32, %c0_i32_0 : i32, i32
  }
  func.func @transform_12(%arg0: i32) -> (i32, i32, i32) {
    %c0_i32 = arith.constant 0 : i32
    %c0_i32_0 = arith.constant 0 : i32
    %c0_i32_1 = arith.constant 0 : i32
    %c0_i32_2 = arith.constant 0 : i32
    return %c0_i32, %c0_i32_0, %c0_i32_1 : i32, i32, i32
  }
  func.func @transform_13(%arg0: i32) -> (i32, i32) {
    %c0_i32 = arith.constant 0 : i32
    %c0_i32_0 = arith.constant 0 : i32
    %c0_i32_1 = arith.constant 0 : i32
    return %c0_i32, %c0_i32_0 : i32, i32
  }
  func.func @transform_14(%arg0: i32) -> (i32, i32) {
    %c0_i32 = arith.constant 0 : i32
    %c0_i32_0 = arith.constant 0 : i32
    %c0_i32_1 = arith.constant 0 : i32
    return %c0_i32, %c0_i32_0 : i32, i32
  }
  func.func @transform_15(%arg0: i32) -> (i32, i32) {
    %c0_i32 = arith.constant 0 : i32
    %c0_i32_0 = arith.constant 0 : i32
    %c0_i32_1 = arith.constant 0 : i32
    return %c0_i32, %c0_i32_0 : i32, i32
  }
  func.func @transform_16(%arg0: i32) -> (i32, i32) {
    %c0_i32 = arith.constant 0 : i32
    %c0_i32_0 = arith.constant 0 : i32
    %c0_i32_1 = arith.constant 0 : i32
    return %c0_i32, %c0_i32_0 : i32, i32
  }
  func.func @transform_17(%arg0: i32) -> (i32, i32) {
    %c0_i32 = arith.constant 0 : i32
    %c0_i32_0 = arith.constant 0 : i32
    %c0_i32_1 = arith.constant 0 : i32
    return %c0_i32, %c0_i32_0 : i32, i32
  }
  func.func @transform_18(%arg0: i32) -> (i32, i32) {
    %c0_i32 = arith.constant 0 : i32
    %c0_i32_0 = arith.constant 0 : i32
    %c0_i32_1 = arith.constant 0 : i32
    return %c0_i32, %c0_i32_0 : i32, i32
  }
  func.func @transform_19(%arg0: i32) -> (i32, i32) {
    %c0_i32 = arith.constant 0 : i32
    %c0_i32_0 = arith.constant 0 : i32
    %c0_i32_1 = arith.constant 0 : i32
    return %c0_i32, %c0_i32_0 : i32, i32
  }
  func.func @transform_20(%arg0: i32) -> (i32, i32) {
    %c0_i32 = arith.constant 0 : i32
    %c0_i32_0 = arith.constant 0 : i32
    %c0_i32_1 = arith.constant 0 : i32
    return %c0_i32, %c0_i32_0 : i32, i32
  }
  func.func @transform_21(%arg0: i32) -> (i32, i32) {
    %c0_i32 = arith.constant 0 : i32
    %c0_i32_0 = arith.constant 0 : i32
    return %arg0, %c0_i32 : i32, i32
  }
}

</mosaic_0001>

<bundles_post_ra>
// kernel: tpu_custom_call.1
= control target key start
LH: loop header
LB: loop body
LE: loop exit
PB: predicated region body
PF: predicated region fallthrough
CT: control target
= control target key end

     0   :  { %s4245_s0 = inlined_call_operand.vmem [shape: f32[30,30,2], index: 0, kind: input, shape index: {}]   ;;  %s4246_s1 = inlined_call_operand.vmem [shape: f32[9,2,32], index: 1, kind: input, shape index: {}]   ;;  %s4247_s2 = inlined_call_operand.vmem [shape: f32[1,32], index: 2, kind: input, shape index: {}]   ;;  %s4248_s3 = inlined_call_operand.vmem [shape: f32[1,32], index: 3, kind: input, shape index: {}]   ;;  %s4249_s4 = inlined_call_operand.vmem [shape: f32[9,32,64], index: 4, kind: input, shape index: {}]   ;;  %s4250_s5 = inlined_call_operand.vmem [shape: f32[1,64], index: 5, kind: input, shape index: {}]   ;;  %s4251_s6 = inlined_call_operand.vmem [shape: f32[1,64], index: 6, kind: input, shape index: {}]   ;;  %s4252_s7 = inlined_call_operand.vmem [shape: f32[64,20], index: 7, kind: input, shape index: {}]   ;;  %s4253_s8 = inlined_call_operand.vmem [shape: f32[1,20], index: 8, kind: input, shape index: {}]   ;;  %s4254_s9 = inlined_call_operand.vmem [shape: f32[1,20], index: 9, kind: input, shape index: {}]   ;;  %s4255_s10 = inlined_call_operand.vmem [shape: f32[9,20,32], index: 10, kind: input, shape index: {}]   ;;  %s4256_s11 = inlined_call_operand.vmem [shape: f32[1,32], index: 11, kind: input, shape index: {}]   ;;  %s4257_s12 = inlined_call_operand.vmem [shape: f32[9,32,64], index: 12, kind: input, shape index: {}]   ;;  %s4258_s13 = inlined_call_operand.vmem [shape: f32[1,64], index: 13, kind: input, shape index: {}]   ;;  %s4259_s14 = inlined_call_operand.vmem [shape: f32[1,64], index: 14, kind: input, shape index: {}]   ;;  %s4260_s15 = inlined_call_operand.vmem [shape: f32[32,64], index: 15, kind: input, shape index: {}]   ;;  %s4261_s16 = inlined_call_operand.vmem [shape: f32[1,64], index: 16, kind: input, shape index: {}]   ;;  %s4262_s17 = inlined_call_operand.vmem [shape: f32[64,64], index: 17, kind: input, shape index: {}]   ;;  %s4263_s18 = inlined_call_operand.vmem [shape: f32[1,64], index: 18, kind: input, shape index: {}]   ;;  %s4264_s19 = inlined_call_operand.vmem [shape: f32[64,10], index: 19, kind: input, shape index: {}]   ;;  %s4265_s20 = inlined_call_operand.vmem [shape: f32[1,10], index: 20, kind: input, shape index: {}]   ;;  %s4266_s21 = inlined_call_operand.hbm [shape: f32[2,10], index: 21, kind: output, shape index: {}]  }
   0x1   :  { %4269 = sst [smem:[#allocation12_spill]] %s4245_s0 }
   0x2   :  { %4270 = sst [smem:[#allocation13_spill]] %s4246_s1 }
   0x3   :  { %4271 = sst [smem:[#allocation14_spill]] %s4247_s2 }
   0x4   :  { %4272 = sst [smem:[#allocation15_spill]] %s4248_s3 }
   0x5   :  { %4273 = sst [smem:[#allocation16_spill]] %s4249_s4 }
   0x6   :  { %4274 = sst [smem:[#allocation17_spill]] %s4250_s5 }
   0x7   :  { %26 = vsyncpa [#allocation10], 0  ;;  %vm69_vm0 = vcmask 261120   ;;  %v3043_v0 = vmov 0.0   ;;  %s4275_s26 = sld [smem:[#allocation14_spill]]  ;;  %vm73_vm1 = vcmask 259072  }
   0x8   :  { %70 = vst.msk [vmem:[#allocation2] sm:$0xff] %vm69_vm0, %v3043_v0  ;;  %s4276_s28 = sld [smem:[#allocation15_spill]]  ;;  %s3406_s29 = smov 0  }
   0x9   :  { %71 = vst.msk [vmem:[#allocation2 + $0x8] sm:$0xff] %vm69_vm0, %v3043_v0 }
   0xa   :  { %72 = vst.msk [vmem:[#allocation2 + $0x10] sm:$0xff] %vm69_vm0, %v3043_v0 }
   0xb   :  { %75 = vst.msk [vmem:[#allocation2 + $0x20] sm:$0xff] %vm69_vm0, %v3043_v0 }
   0xc   :  { %76 = vst.msk [vmem:[#allocation2 + $0x28] sm:$0xff] %vm69_vm0, %v3043_v0 }
   0xd   :  { %77 = vst.msk [vmem:[#allocation2 + $0x30] sm:$0xff] %vm69_vm0, %v3043_v0  ;;  %v3275_v1 = vld [vmem:[%s4275_s26] sm:$0x1] }
   0xe   :  { %79 = vst.msk [vmem:[#allocation2 + $0x40] sm:$0xff] %vm69_vm0, %v3043_v0  ;;  %v3280_v2 = vld [vmem:[%s4276_s28] sm:$0x1] }
   0xf   :  { %80 = vst.msk [vmem:[#allocation2 + $0x48] sm:$0xff] %vm69_vm0, %v3043_v0 }
  0x10   :  { %81 = vst.msk [vmem:[#allocation2 + $0x50] sm:$0xff] %vm69_vm0, %v3043_v0 }
  0x11   :  { %83 = vst.msk [vmem:[#allocation2 + $0x60] sm:$0xff] %vm69_vm0, %v3043_v0 }
  0x12   :  { %84 = vst.msk [vmem:[#allocation2 + $0x68] sm:$0xff] %vm69_vm0, %v3043_v0 }
  0x13   :  { %85 = vst.msk [vmem:[#allocation2 + $0x70] sm:$0xff] %vm69_vm0, %v3043_v0 }
  0x14   :  { %87 = vst.msk [vmem:[#allocation2 + $0x80] sm:$0xff] %vm69_vm0, %v3043_v0 }
  0x15   :  { %88 = vst.msk [vmem:[#allocation2 + $0x88] sm:$0xff] %vm69_vm0, %v3043_v0 }
  0x16   :  { %89 = vst.msk [vmem:[#allocation2 + $0x90] sm:$0xff] %vm69_vm0, %v3043_v0 }
  0x17   :  { %91 = vst.msk [vmem:[#allocation2 + $0xa0] sm:$0xff] %vm69_vm0, %v3043_v0 }
  0x18   :  { %92 = vst.msk [vmem:[#allocation2 + $0xa8] sm:$0xff] %vm69_vm0, %v3043_v0 }
  0x19   :  { %93 = vst.msk [vmem:[#allocation2 + $0xb0] sm:$0xff] %vm69_vm0, %v3043_v0 }
  0x1a   :  { %95 = vst.msk [vmem:[#allocation2 + $0xc0] sm:$0xff] %vm69_vm0, %v3043_v0 }
  0x1b   :  { %96 = vst.msk [vmem:[#allocation2 + $0xc8] sm:$0xff] %vm69_vm0, %v3043_v0 }
  0x1c   :  { %97 = vst.msk [vmem:[#allocation2 + $0xd0] sm:$0xff] %vm69_vm0, %v3043_v0 }
  0x1d   :  { %99 = vst.msk [vmem:[#allocation2 + $0xe0] sm:$0xff] %vm69_vm0, %v3043_v0 }
  0x1e   :  { %100 = vst.msk [vmem:[#allocation2 + $0xe8] sm:$0xff] %vm69_vm0, %v3043_v0 }
  0x1f   :  { %101 = vst.msk [vmem:[#allocation2 + $0xf0] sm:$0xff] %vm69_vm0, %v3043_v0 }
  0x20   :  { %103 = vst.msk [vmem:[#allocation2 + $0x100] sm:$0xff] %vm69_vm0, %v3043_v0 }
  0x21   :  { %104 = vst.msk [vmem:[#allocation2 + $0x108] sm:$0xff] %vm69_vm0, %v3043_v0 }
  0x22   :  { %105 = vst.msk [vmem:[#allocation2 + $0x110] sm:$0xff] %vm69_vm0, %v3043_v0 }
  0x23   :  { %107 = vst.msk [vmem:[#allocation2 + $0x120] sm:$0xff] %vm69_vm0, %v3043_v0 }
  0x24   :  { %108 = vst.msk [vmem:[#allocation2 + $0x128] sm:$0xff] %vm69_vm0, %v3043_v0 }
  0x25   :  { %109 = vst.msk [vmem:[#allocation2 + $0x130] sm:$0xff] %vm69_vm0, %v3043_v0 }
  0x26   :  { %111 = vst.msk [vmem:[#allocation2 + $0x140] sm:$0xff] %vm69_vm0, %v3043_v0 }
  0x27   :  { %112 = vst.msk [vmem:[#allocation2 + $0x148] sm:$0xff] %vm69_vm0, %v3043_v0 }
  0x28   :  { %113 = vst.msk [vmem:[#allocation2 + $0x150] sm:$0xff] %vm69_vm0, %v3043_v0 }
  0x29   :  { %115 = vst.msk [vmem:[#allocation2 + $0x160] sm:$0xff] %vm69_vm0, %v3043_v0 }
  0x2a   :  { %116 = vst.msk [vmem:[#allocation2 + $0x168] sm:$0xff] %vm69_vm0, %v3043_v0 }
  0x2b   :  { %117 = vst.msk [vmem:[#allocation2 + $0x170] sm:$0xff] %vm69_vm0, %v3043_v0 }
  0x2c   :  { %119 = vst.msk [vmem:[#allocation2 + $0x180] sm:$0xff] %vm69_vm0, %v3043_v0 }
  0x2d   :  { %120 = vst.msk [vmem:[#allocation2 + $0x188] sm:$0xff] %vm69_vm0, %v3043_v0 }
  0x2e   :  { %121 = vst.msk [vmem:[#allocation2 + $0x190] sm:$0xff] %vm69_vm0, %v3043_v0 }
  0x2f   :  { %123 = vst.msk [vmem:[#allocation2 + $0x1a0] sm:$0xff] %vm69_vm0, %v3043_v0 }
  0x30   :  { %124 = vst.msk [vmem:[#allocation2 + $0x1a8] sm:$0xff] %vm69_vm0, %v3043_v0 }
  0x31   :  { %125 = vst.msk [vmem:[#allocation2 + $0x1b0] sm:$0xff] %vm69_vm0, %v3043_v0 }
  0x32   :  { %127 = vst.msk [vmem:[#allocation2 + $0x1c0] sm:$0xff] %vm69_vm0, %v3043_v0 }
  0x33   :  { %128 = vst.msk [vmem:[#allocation2 + $0x1c8] sm:$0xff] %vm69_vm0, %v3043_v0 }
  0x34   :  { %129 = vst.msk [vmem:[#allocation2 + $0x1d0] sm:$0xff] %vm69_vm0, %v3043_v0 }
  0x35   :  { %131 = vst.msk [vmem:[#allocation2 + $0x1e0] sm:$0xff] %vm69_vm0, %v3043_v0 }
  0x36   :  { %132 = vst.msk [vmem:[#allocation2 + $0x1e8] sm:$0xff] %vm69_vm0, %v3043_v0 }
  0x37   :  { %133 = vst.msk [vmem:[#allocation2 + $0x1f0] sm:$0xff] %vm69_vm0, %v3043_v0 }
  0x38   :  { %135 = vst.msk [vmem:[#allocation2 + $0x200] sm:$0xff] %vm69_vm0, %v3043_v0 }
  0x39   :  { %136 = vst.msk [vmem:[#allocation2 + $0x208] sm:$0xff] %vm69_vm0, %v3043_v0 }
  0x3a   :  { %137 = vst.msk [vmem:[#allocation2 + $0x210] sm:$0xff] %vm69_vm0, %v3043_v0 }
  0x3b   :  { %139 = vst.msk [vmem:[#allocation2 + $0x220] sm:$0xff] %vm69_vm0, %v3043_v0 }
  0x3c   :  { %140 = vst.msk [vmem:[#allocation2 + $0x228] sm:$0xff] %vm69_vm0, %v3043_v0 }
  0x3d   :  { %141 = vst.msk [vmem:[#allocation2 + $0x230] sm:$0xff] %vm69_vm0, %v3043_v0 }
  0x3e   :  { %143 = vst.msk [vmem:[#allocation2 + $0x240] sm:$0xff] %vm69_vm0, %v3043_v0 }
  0x3f   :  { %144 = vst.msk [vmem:[#allocation2 + $0x248] sm:$0xff] %vm69_vm0, %v3043_v0 }
  0x40   :  { %145 = vst.msk [vmem:[#allocation2 + $0x250] sm:$0xff] %vm69_vm0, %v3043_v0 }
  0x41   :  { %147 = vst.msk [vmem:[#allocation2 + $0x260] sm:$0xff] %vm69_vm0, %v3043_v0 }
  0x42   :  { %148 = vst.msk [vmem:[#allocation2 + $0x268] sm:$0xff] %vm69_vm0, %v3043_v0 }
  0x43   :  { %149 = vst.msk [vmem:[#allocation2 + $0x270] sm:$0xff] %vm69_vm0, %v3043_v0 }
  0x44   :  { %151 = vst.msk [vmem:[#allocation2 + $0x280] sm:$0xff] %vm69_vm0, %v3043_v0 }
  0x45   :  { %152 = vst.msk [vmem:[#allocation2 + $0x288] sm:$0xff] %vm69_vm0, %v3043_v0 }
  0x46   :  { %153 = vst.msk [vmem:[#allocation2 + $0x290] sm:$0xff] %vm69_vm0, %v3043_v0 }
  0x47   :  { %155 = vst.msk [vmem:[#allocation2 + $0x2a0] sm:$0xff] %vm69_vm0, %v3043_v0 }
  0x48   :  { %156 = vst.msk [vmem:[#allocation2 + $0x2a8] sm:$0xff] %vm69_vm0, %v3043_v0 }
  0x49   :  { %157 = vst.msk [vmem:[#allocation2 + $0x2b0] sm:$0xff] %vm69_vm0, %v3043_v0 }
  0x4a   :  { %159 = vst.msk [vmem:[#allocation2 + $0x2c0] sm:$0xff] %vm69_vm0, %v3043_v0 }
  0x4b   :  { %160 = vst.msk [vmem:[#allocation2 + $0x2c8] sm:$0xff] %vm69_vm0, %v3043_v0 }
  0x4c   :  { %161 = vst.msk [vmem:[#allocation2 + $0x2d0] sm:$0xff] %vm69_vm0, %v3043_v0 }
  0x4d   :  { %163 = vst.msk [vmem:[#allocation2 + $0x2e0] sm:$0xff] %vm69_vm0, %v3043_v0 }
  0x4e   :  { %164 = vst.msk [vmem:[#allocation2 + $0x2e8] sm:$0xff] %vm69_vm0, %v3043_v0 }
  0x4f   :  { %165 = vst.msk [vmem:[#allocation2 + $0x2f0] sm:$0xff] %vm69_vm0, %v3043_v0 }
  0x50   :  { %167 = vst.msk [vmem:[#allocation2 + $0x300] sm:$0xff] %vm69_vm0, %v3043_v0 }
  0x51   :  { %168 = vst.msk [vmem:[#allocation2 + $0x308] sm:$0xff] %vm69_vm0, %v3043_v0 }
  0x52   :  { %169 = vst.msk [vmem:[#allocation2 + $0x310] sm:$0xff] %vm69_vm0, %v3043_v0 }
  0x53   :  { %171 = vst.msk [vmem:[#allocation2 + $0x320] sm:$0xff] %vm69_vm0, %v3043_v0 }
  0x54   :  { %172 = vst.msk [vmem:[#allocation2 + $0x328] sm:$0xff] %vm69_vm0, %v3043_v0 }
  0x55   :  { %173 = vst.msk [vmem:[#allocation2 + $0x330] sm:$0xff] %vm69_vm0, %v3043_v0 }
  0x56   :  { %175 = vst.msk [vmem:[#allocation2 + $0x340] sm:$0xff] %vm69_vm0, %v3043_v0 }
  0x57   :  { %176 = vst.msk [vmem:[#allocation2 + $0x348] sm:$0xff] %vm69_vm0, %v3043_v0 }
  0x58   :  { %177 = vst.msk [vmem:[#allocation2 + $0x350] sm:$0xff] %vm69_vm0, %v3043_v0 }
  0x59   :  { %179 = vst.msk [vmem:[#allocation2 + $0x360] sm:$0xff] %vm69_vm0, %v3043_v0 }
  0x5a   :  { %180 = vst.msk [vmem:[#allocation2 + $0x368] sm:$0xff] %vm69_vm0, %v3043_v0 }
  0x5b   :  { %181 = vst.msk [vmem:[#allocation2 + $0x370] sm:$0xff] %vm69_vm0, %v3043_v0 }
  0x5c   :  { %183 = vst.msk [vmem:[#allocation2 + $0x380] sm:$0xff] %vm69_vm0, %v3043_v0 }
  0x5d   :  { %184 = vst.msk [vmem:[#allocation2 + $0x388] sm:$0xff] %vm69_vm0, %v3043_v0 }
  0x5e   :  { %185 = vst.msk [vmem:[#allocation2 + $0x390] sm:$0xff] %vm69_vm0, %v3043_v0 }
  0x5f   :  { %187 = vst.msk [vmem:[#allocation2 + $0x3a0] sm:$0xff] %vm69_vm0, %v3043_v0 }
  0x60   :  { %188 = vst.msk [vmem:[#allocation2 + $0x3a8] sm:$0xff] %vm69_vm0, %v3043_v0 }
  0x61   :  { %189 = vst.msk [vmem:[#allocation2 + $0x3b0] sm:$0xff] %vm69_vm0, %v3043_v0 }
  0x62   :  { %74 = vst.msk [vmem:[#allocation2 + $0x18] sm:$0x3f] %vm73_vm1, %v3043_v0 }
  0x63   :  { %78 = vst.msk [vmem:[#allocation2 + $0x38] sm:$0x3f] %vm73_vm1, %v3043_v0 }
  0x64   :  { %82 = vst.msk [vmem:[#allocation2 + $0x58] sm:$0x3f] %vm73_vm1, %v3043_v0 }
  0x65   :  { %86 = vst.msk [vmem:[#allocation2 + $0x78] sm:$0x3f] %vm73_vm1, %v3043_v0 }
  0x66   :  { %90 = vst.msk [vmem:[#allocation2 + $0x98] sm:$0x3f] %vm73_vm1, %v3043_v0 }
  0x67   :  { %94 = vst.msk [vmem:[#allocation2 + $0xb8] sm:$0x3f] %vm73_vm1, %v3043_v0 }
  0x68   :  { %98 = vst.msk [vmem:[#allocation2 + $0xd8] sm:$0x3f] %vm73_vm1, %v3043_v0 }
  0x69   :  { %102 = vst.msk [vmem:[#allocation2 + $0xf8] sm:$0x3f] %vm73_vm1, %v3043_v0 }
  0x6a   :  { %106 = vst.msk [vmem:[#allocation2 + $0x118] sm:$0x3f] %vm73_vm1, %v3043_v0 }
  0x6b   :  { %110 = vst.msk [vmem:[#allocation2 + $0x138] sm:$0x3f] %vm73_vm1, %v3043_v0 }
  0x6c   :  { %114 = vst.msk [vmem:[#allocation2 + $0x158] sm:$0x3f] %vm73_vm1, %v3043_v0 }
  0x6d   :  { %118 = vst.msk [vmem:[#allocation2 + $0x178] sm:$0x3f] %vm73_vm1, %v3043_v0 }
  0x6e   :  { %122 = vst.msk [vmem:[#allocation2 + $0x198] sm:$0x3f] %vm73_vm1, %v3043_v0 }
  0x6f   :  { %126 = vst.msk [vmem:[#allocation2 + $0x1b8] sm:$0x3f] %vm73_vm1, %v3043_v0 }
  0x70   :  { %130 = vst.msk [vmem:[#allocation2 + $0x1d8] sm:$0x3f] %vm73_vm1, %v3043_v0 }
  0x71   :  { %134 = vst.msk [vmem:[#allocation2 + $0x1f8] sm:$0x3f] %vm73_vm1, %v3043_v0 }
  0x72   :  { %138 = vst.msk [vmem:[#allocation2 + $0x218] sm:$0x3f] %vm73_vm1, %v3043_v0 }
  0x73   :  { %142 = vst.msk [vmem:[#allocation2 + $0x238] sm:$0x3f] %vm73_vm1, %v3043_v0 }
  0x74   :  { %146 = vst.msk [vmem:[#allocation2 + $0x258] sm:$0x3f] %vm73_vm1, %v3043_v0 }
  0x75   :  { %150 = vst.msk [vmem:[#allocation2 + $0x278] sm:$0x3f] %vm73_vm1, %v3043_v0 }
  0x76   :  { %154 = vst.msk [vmem:[#allocation2 + $0x298] sm:$0x3f] %vm73_vm1, %v3043_v0 }
  0x77   :  { %158 = vst.msk [vmem:[#allocation2 + $0x2b8] sm:$0x3f] %vm73_vm1, %v3043_v0 }
  0x78   :  { %162 = vst.msk [vmem:[#allocation2 + $0x2d8] sm:$0x3f] %vm73_vm1, %v3043_v0 }
  0x79   :  { %166 = vst.msk [vmem:[#allocation2 + $0x2f8] sm:$0x3f] %vm73_vm1, %v3043_v0 }
  0x7a   :  { %170 = vst.msk [vmem:[#allocation2 + $0x318] sm:$0x3f] %vm73_vm1, %v3043_v0 }
  0x7b   :  { %174 = vst.msk [vmem:[#allocation2 + $0x338] sm:$0x3f] %vm73_vm1, %v3043_v0 }
  0x7c   :  { %178 = vst.msk [vmem:[#allocation2 + $0x358] sm:$0x3f] %vm73_vm1, %v3043_v0 }
  0x7d   :  { %182 = vst.msk [vmem:[#allocation2 + $0x378] sm:$0x3f] %vm73_vm1, %v3043_v0 }
  0x7e   :  { %186 = vst.msk [vmem:[#allocation2 + $0x398] sm:$0x3f] %vm73_vm1, %v3043_v0 }
  0x7f   :  { %190 = vst.msk [vmem:[#allocation2 + $0x3b8] sm:$0x3f] %vm73_vm1, %v3043_v0 }
  0x80 LB: > { %s4277_s30 = sld [smem:[#allocation13_spill]]  ;;  %vm225_vm2 = vcmask 1041408   ;;  %s2535_s25 = sshll.u32 %s3021_s29, 5  ;;  %vm212_vm3 = vcmask 15360   ;;  %vm708_vm4 = vcmask 257024   ;;  %s3021_s29 = sphi %s3406_s29, %s198_s29  }
  0x81   : > { %s4278_s3 = sld [smem:[#allocation12_spill]]  ;;  %s198_s29 = sadd.s32 1, %s3021_s29  }
  0x82   : > { %p195_p0 = scmp.ge.s32.totalorder %s198_s29, 28  }
  0x83   :  { %s4279_s0 = sld [smem:[#allocation17_spill]] (%p195_p0)  ;;  %s3557_s22 = smov (%p195_p0), 0  }
  0x86   : > { %v2536_v3 = vld [vmem:[%s4277_s30 + $0x2] sm:$0x3]  ;;  %v2547_v4 = vld [vmem:[%s4277_s30 + $0x4] sm:$0x3]  ;;  %v2558_v5 = vld [vmem:[%s4277_s30 + $0x6] sm:$0x3] }
  0x87   : > { %2865 = vmatpush.msk.msra.mxu1 %vm225_vm2, %v2536_v3  ;;  %2866 = vmatpush.msk.msra.mxu2 %vm225_vm2, %v2536_v3  ;;  %v205_v6 = vld [vmem:[%s4277_s30] sm:$0x3]  ;;  %s3433_s28 = scalar_lea.vmem %s4278_s3, %s2535_s25  ;;  %v2589_v7 = vld [vmem:[%s4277_s30 + $0xc] sm:$0x3]  ;;  %v2599_v8 = vld [vmem:[%s4277_s30 + $0xe] sm:$0x3] }
  0x88   : > { %2867 = vmatpush.msk.msra.mxu3 %vm225_vm2, %v2536_v3  ;;  %v207_v9 = vld [vmem:[%s3433_s28 + $0x9] sm:$0xff]  ;;  %v208_v10 = vld [vmem:[%s3433_s28 + $0x11] sm:$0xff]  ;;  %v209_v11 = vld [vmem:[%s3433_s28 + $0x19] sm:$0xf]  ;;  %2537 = vmatpush.msk.msra.mxu0 %vm225_vm2, %v2536_v3  ;;  %s3534_s3 = scalar_lea.vmem [#allocation2], %s2535_s25 }
  0x89   : > { %2548 = vmatpush.msk.msrb.mxu2 %vm225_vm2, %v2547_v4  ;;  %2542 = vmatpush.msk.msrb.mxu1 %vm225_vm2, %v205_v6  ;;  %v206_v12 = vld [vmem:[%s3433_s28 + $0x1] sm:$0xff]  ;;  %v2578_v14 = vld [vmem:[%s4277_s30 + $0xa] sm:$0x3]  ;;  %v2609_v15 = vld [vmem:[%s4277_s30 + $0x10] sm:$0x3] }
  0x8a   : > { %2559 = vmatpush.msk.msrb.mxu3 %vm225_vm2, %v2558_v5  ;;  %2539 = vmatmul.msk.f32.vlgmr.msra.gmra.mxu1 %vm212_vm3, %v207_v9  ;;  %v2568_v13 = vld [vmem:[%s4277_s30 + $0x8] sm:$0x3]  ;;  %v201_v16 = vld [vmem:[%s3433_s28] sm:$0xff]  ;;  %v303_v21 = vld [vmem:[%s3433_s28 + $0xa] sm:$0xff] }
  0x8b   : > { %2540 = vmatmul.msk.f32.vlgmr.msra.gmra.mxu2 %vm212_vm3, %v208_v10  ;;  %2541 = vmatmul.msk.f32.vlgmr.msra.gmra.mxu3 %vm212_vm3, %v209_v11  ;;  %v302_v17 = vld [vmem:[%s3433_s28 + $0x2] sm:$0xff]  ;;  %v203_v24 = vld [vmem:[%s3433_s28 + $0x10] sm:$0xff]  ;;  %v204_v28 = vld [vmem:[%s3433_s28 + $0x18] sm:$0xf] }
  0x8c   : > { %2590 = vmatpush.msk.msra.mxu2 %vm225_vm2, %v2589_v7  ;;  %2538 = vmatmul.msk.f32.vlgmr.msra.gmra.mxu0 %vm212_vm3, %v206_v12  ;;  %v2554_v18 = vld [vmem:[%s3433_s28 + $0x20] sm:$0xff]  ;;  %v202_v20 = vld [vmem:[%s3433_s28 + $0x8] sm:$0xff]  ;;  %v304_v25 = vld [vmem:[%s3433_s28 + $0x12] sm:$0xff] }
  0x8d   : > { %2600 = vmatpush.msk.msra.mxu3 %vm225_vm2, %v2599_v8  ;;  %2569 = vmatpush.msk.msrb.mxu0 %vm225_vm2, %v2568_v13  ;;  %v2564_v19 = vld [vmem:[%s3433_s28 + $0x21] sm:$0xff]  ;;  %v2565_v23 = vld [vmem:[%s3433_s28 + $0x29] sm:$0xff]  ;;  %v2566_v27 = vld [vmem:[%s3433_s28 + $0x31] sm:$0xff] }
  0x8e   : > { %2579 = vmatpush.msk.msra.mxu1 %vm225_vm2, %v2578_v14  ;;  %v2555_v22 = vld [vmem:[%s3433_s28 + $0x28] sm:$0xff]  ;;  %v2556_v26 = vld [vmem:[%s3433_s28 + $0x30] sm:$0xff]  ;;  %v305_v29 = vld [vmem:[%s3433_s28 + $0x1a] sm:$0xf] }
  0x8f   : > { %2610 = vmatpush.msk.msra.mxu0 %vm225_vm2, %v2609_v15  ;;  %v2557_v30 = vld [vmem:[%s3433_s28 + $0x38] sm:$0xf]  ;;  %v2574_v32 = vld [vmem:[%s3433_s28 + $0x22] sm:$0xff]  ;;  %v2575_v36 = vld [vmem:[%s3433_s28 + $0x2a] sm:$0xff] }
  0x90   : > { %v2567_v31 = vld [vmem:[%s3433_s28 + $0x39] sm:$0xf]  ;;  %v2585_v33 = vld [vmem:[%s3433_s28 + $0x40] sm:$0xff]  ;;  %v2586_v37 = vld [vmem:[%s3433_s28 + $0x48] sm:$0xff] }
  0x91   : > { %v2595_v34 = vld [vmem:[%s3433_s28 + $0x41] sm:$0xff]  ;;  %v2596_v38 = vld [vmem:[%s3433_s28 + $0x49] sm:$0xff]  ;;  %v2576_v40 = vld [vmem:[%s3433_s28 + $0x32] sm:$0xff] }
  0x92   : > { %2543 = vmatmul.msk.f32.vlgmr.msrb.gmra.mxu1 %vm212_vm3, %v201_v16  ;;  %v2605_v35 = vld [vmem:[%s3433_s28 + $0x42] sm:$0xff]  ;;  %v2606_v39 = vld [vmem:[%s3433_s28 + $0x4a] sm:$0xff]  ;;  %v2607_v43 = vld [vmem:[%s3433_s28 + $0x52] sm:$0xff] }
  0x93   : > { %2549 = vmatmul.msk.f32.vlgmr.msrb.gmra.mxu2 %vm212_vm3, %v302_v17  ;;  %2560 = vmatmul.msk.f32.vlgmr.msrb.gmra.mxu3 %vm212_vm3, %v2554_v18  ;;  %v2587_v41 = vld [vmem:[%s3433_s28 + $0x50] sm:$0xff]  ;;  %v2577_v44 = vld [vmem:[%s3433_s28 + $0x3a] sm:$0xf] }
  0x94   : > { %2570 = vmatmul.msk.f32.vlgmr.msrb.gmra.mxu0 %vm212_vm3, %v2564_v19  ;;  %v2597_v42 = vld [vmem:[%s3433_s28 + $0x51] sm:$0xff]  ;;  %v2598_v46 = vld [vmem:[%s3433_s28 + $0x59] sm:$0xf] }
  0x95   : > { %v2588_v45 = vld [vmem:[%s3433_s28 + $0x58] sm:$0xf] }
  0x96   : > { %v2608_v47 = vld [vmem:[%s3433_s28 + $0x5a] sm:$0xf] }
  0x9a   : > { %2544 = vmatmul.msk.f32.gmra.mxu1 %vm212_vm3, %v202_v20 }
  0x9b   : > { %2550 = vmatmul.msk.f32.gmra.mxu2 %vm212_vm3, %v303_v21  ;;  %2561 = vmatmul.msk.f32.gmra.mxu3 %vm212_vm3, %v2555_v22 }
  0x9c   : > { %2571 = vmatmul.msk.f32.gmra.mxu0 %vm212_vm3, %v2565_v23 }
  0xa2   : > { %2545 = vmatmul.msk.f32.gmra.mxu1 %vm212_vm3, %v203_v24 }
  0xa3   : > { %2551 = vmatmul.msk.f32.gmra.mxu2 %vm212_vm3, %v304_v25  ;;  %2562 = vmatmul.msk.f32.gmra.mxu3 %vm212_vm3, %v2556_v26  ;;  %v691_v25 = vperm.slane %v3275_v1, 0 }
  0xa4   : > { %2572 = vmatmul.msk.f32.gmra.mxu0 %vm212_vm3, %v2566_v27 }
  0xaa   : > { %2546 = vmatmul.msk.f32.gmra.mxu1 %vm212_vm3, %v204_v28 }
  0xab   : > { %2552 = vmatmul.msk.f32.gmra.mxu2 %vm212_vm3, %v305_v29  ;;  %2563 = vmatmul.msk.f32.gmra.mxu3 %vm212_vm3, %v2557_v30  ;;  %v698_v29 = vperm.slane %v3280_v2, 0 }
  0xac   : > { %2573 = vmatmul.msk.f32.gmra.mxu0 %vm212_vm3, %v2567_v31 }
  0xb2   : > { %2580 = vmatmul.msk.f32.vlgmr.msra.gmra.mxu1 %vm212_vm3, %v2574_v32 }
  0xb3   : > { %2591 = vmatmul.msk.f32.vlgmr.msra.gmra.mxu2 %vm212_vm3, %v2585_v33  ;;  %2601 = vmatmul.msk.f32.vlgmr.msra.gmra.mxu3 %vm212_vm3, %v2595_v34 }
  0xb4   : > { %2611 = vmatmul.msk.f32.vlgmr.msra.gmra.mxu0 %vm212_vm3, %v2605_v35 }
  0xba   : > { %2581 = vmatmul.msk.f32.gmra.mxu1 %vm212_vm3, %v2575_v36 }
  0xbb   : > { %2592 = vmatmul.msk.f32.gmra.mxu2 %vm212_vm3, %v2586_v37  ;;  %2602 = vmatmul.msk.f32.gmra.mxu3 %vm212_vm3, %v2596_v38 }
  0xbc   : > { %2612 = vmatmul.msk.f32.gmra.mxu0 %vm212_vm3, %v2606_v39 }
  0xc2   : > { %2582 = vmatmul.msk.f32.gmra.mxu1 %vm212_vm3, %v2576_v40 }
  0xc3   : > { %2593 = vmatmul.msk.f32.gmra.mxu2 %vm212_vm3, %v2587_v41  ;;  %2603 = vmatmul.msk.f32.gmra.mxu3 %vm212_vm3, %v2597_v42 }
  0xc4   : > { %2613 = vmatmul.msk.f32.gmra.mxu0 %vm212_vm3, %v2607_v43 }
  0xca   : > { %2583 = vmatmul.msk.f32.gmra.mxu1 %vm212_vm3, %v2577_v44 }
  0xcb   : > { %2594 = vmatmul.msk.f32.gmra.mxu2 %vm212_vm3, %v2588_v45  ;;  %2604 = vmatmul.msk.f32.gmra.mxu3 %vm212_vm3, %v2598_v46 }
  0xcc   : > { %2614 = vmatmul.msk.f32.gmra.mxu0 %vm212_vm3, %v2608_v47 }
 0x107   : > { %v249_v48 = vpop.f32.mrf.mxu1 }
 0x109   : > { %v246_v49 = vpop.f32.mrf.mxu0 }
 0x10e   : > { %v252_v50 = vpop.f32.mrf.mxu2  ;;  %v255_v51 = vpop.f32.mrf.mxu3 }
 0x10f   : > { %v290_v52 = vpop.f32.mrf.mxu1 }
 0x110   : > { %v291_v3 = vadd.f32 %v290_v52, %v246_v49 }
 0x111   : > { %v451_v53 = vpop.f32.mrf.mxu0 }
 0x116   : > { %v340_v54 = vpop.f32.mrf.mxu2  ;;  %v397_v55 = vpop.f32.mrf.mxu3 }
 0x117   : > { %v293_v56 = vpop.f32.mrf.mxu1  ;;  %v352_v5 = vadd.f32 %v340_v54, %v291_v3 }
 0x118   : > { %v294_v10 = vadd.f32 %v293_v56, %v249_v48 }
 0x119   : > { %v454_v57 = vpop.f32.mrf.mxu0  ;;  %v409_v7 = vadd.f32 %v397_v55, %v352_v5 }
 0x11b   : > { %v463_v12 = vadd.f32 %v451_v53, %v409_v7  ;;  %v3555_v7 = vld [vmem:[%s4251_s6] sm:$0x1] (%p195_p0) }
 0x11e   : > { %v343_v58 = vpop.f32.mrf.mxu2  ;;  %v400_v59 = vpop.f32.mrf.mxu3 }
 0x11f   : > { %v296_v60 = vpop.f32.mrf.mxu1  ;;  %v353_v13 = vadd.f32 %v343_v58, %v294_v10 }
 0x120   : > { %v297_v20 = vadd.f32 %v296_v60, %v252_v50 }
 0x121   : > { %v457_v61 = vpop.f32.mrf.mxu0  ;;  %v410_v16 = vadd.f32 %v400_v59, %v353_v13 }
 0x123   : > { %v464_v22 = vadd.f32 %v454_v57, %v410_v16 }
 0x126   : > { %v346_v62 = vpop.f32.mrf.mxu2  ;;  %v403_v63 = vpop.f32.mrf.mxu3 }
 0x127   : > { %v299_v0 = vpop.f32.mrf.mxu1  ;;  %v354_v23 = vadd.f32 %v346_v62, %v297_v20 }
 0x128   : > { %v300_v36 = vadd.f32 %v299_v0, %v255_v51 }
 0x129   : > { %v460_v4 = vpop.f32.mrf.mxu0  ;;  %v411_v31 = vadd.f32 %v403_v63, %v354_v23 }
 0x12b   : > { %v465_v39 = vadd.f32 %v457_v61, %v411_v31 }
 0x12e   : > { %v349_v6 = vpop.f32.mrf.mxu2  ;;  %v406_v8 = vpop.f32.mrf.mxu3 }
 0x12f   : > { %v505_v9 = vpop.f32.mrf.mxu1  ;;  %v355_v40 = vadd.f32 %v349_v6, %v300_v36  ;;  %v3550_v6 = vld [vmem:[%s4279_s0] sm:$0x1] (%p195_p0) }
 0x130   : > { %v517_v14 = vadd.f32 %v505_v9, %v463_v12 }
 0x131   : > { %v670_v11 = vpop.f32.mrf.mxu0  ;;  %v412_v46 = vadd.f32 %v406_v8, %v355_v40 }
 0x133   : > { %v466_v53 = vadd.f32 %v460_v4, %v412_v46 }
 0x136   : > { %v562_v15 = vpop.f32.mrf.mxu2  ;;  %v616_v18 = vpop.f32.mrf.mxu3 }
 0x137   : > { %v574_v17 = vadd.f32 %v562_v15, %v517_v14  ;;  %v508_v19 = vpop.f32.mrf.mxu1 }
 0x138   : > { %v518_v27 = vadd.f32 %v508_v19, %v464_v22 }
 0x139   : > { %v628_v21 = vadd.f32 %v616_v18, %v574_v17  ;;  %v673_v26 = vpop.f32.mrf.mxu0 }
 0x13b   : > { %v682_v24 = vadd.f32 %v670_v11, %v628_v21 }
 0x13d   : > { %v686_v28 = vmax.f32 %v682_v24, 0.0 }
 0x13e   : > { %v565_v30 = vpop.f32.mrf.mxu2  ;;  %v619_v34 = vpop.f32.mrf.mxu3 }
 0x13f   : > { %v693_v32 = vmul.f32 %v691_v25, %v686_v28  ;;  %v575_v33 = vadd.f32 %v565_v30, %v518_v27  ;;  %v511_v35 = vpop.f32.mrf.mxu1 }
 0x140   : > { %v519_v42 = vadd.f32 %v511_v35, %v465_v39 }
 0x141   : > { %v700_v37 = vadd.f32 %v698_v29, %v693_v32  ;;  %v629_v38 = vadd.f32 %v619_v34, %v575_v33  ;;  %v676_v45 = vpop.f32.mrf.mxu0 }
 0x143   : > { %2616 = vst.msk [vmem:[%s3534_s3 + $0x21] sm:$0xff] %vm69_vm0, %v700_v37  ;;  %v683_v41 = vadd.f32 %v673_v26, %v629_v38 }
 0x145   : > { %v687_v43 = vmax.f32 %v683_v41, 0.0 }
 0x146   : > { %v568_v44 = vpop.f32.mrf.mxu2  ;;  %v622_v49 = vpop.f32.mrf.mxu3 }
 0x147   : > { %v694_v47 = vmul.f32 %v691_v25, %v687_v43  ;;  %v576_v48 = vadd.f32 %v568_v44, %v519_v42  ;;  %v514_v52 = vpop.f32.mrf.mxu1 }
 0x148   : > { %v520_v55 = vadd.f32 %v514_v52, %v466_v53 }
 0x149   : > { %v701_v50 = vadd.f32 %v698_v29, %v694_v47  ;;  %v630_v51 = vadd.f32 %v622_v49, %v576_v48  ;;  %v679_v61 = vpop.f32.mrf.mxu0 }
 0x14b   : > { %2617 = vst.msk [vmem:[%s3534_s3 + $0x29] sm:$0xff] %vm69_vm0, %v701_v50  ;;  %v684_v54 = vadd.f32 %v676_v45, %v630_v51 }
 0x14d   : > { %v688_v56 = vmax.f32 %v684_v54, 0.0 }
 0x14e   : > { %v571_v57 = vpop.f32.mrf.mxu2  ;;  %v625_v60 = vpop.f32.mrf.mxu3 }
 0x14f   : > { %v695_v58 = vmul.f32 %v691_v25, %v688_v56  ;;  %v577_v59 = vadd.f32 %v571_v57, %v520_v55 }
 0x151   : > { %v702_v62 = vadd.f32 %v698_v29, %v695_v58  ;;  %v631_v63 = vadd.f32 %v625_v60, %v577_v59 }
 0x153   : > { %2618 = vst.msk [vmem:[%s3534_s3 + $0x31] sm:$0xff] %vm69_vm0, %v702_v62  ;;  %v685_v0 = vadd.f32 %v679_v61, %v631_v63 }
 0x155   : > { %v689_v3 = vmax.f32 %v685_v0, 0.0 }
 0x157   : > { %v696_v5 = vmul.f32 %v691_v25, %v689_v3  ;;  %197 = sbr.rel (!%p195_p0) target bundleno = 128 (0x80), region = 208 }
 0x159   : > { %v703_v4 = vadd.f32 %v698_v29, %v696_v5 }
 0x15b   : > { %2619 = vst.msk [vmem:[%s3534_s3 + $0x39] sm:$0xf] %vm708_vm4, %v703_v4 }
 0x15c LB: > { %s4280_s1 = sld [smem:[#allocation16_spill]]  ;;  %s2620_s26 = sshll.u32 %s3025_s22, 5  ;;  %vm1222_vm5 = vcmask 523264   ;;  %vm1226_vm6 = vcmask 519168   ;;  %s3025_s22 = sphi %s3557_s22, %s717_s22  }
 0x15d   : > { %s3577_s25 = scalar_lea.vmem [#allocation2], %s2620_s26  ;;  %s717_s22 = sadd.s32 1, %s3025_s22  }
 0x15e   : > { %p714_p1 = scmp.ge.s32.totalorder %s717_s22, 28  }
 0x15f   :  { %s3773_s24 = smov (%p714_p1), 0  }
 0x162   : > { %v2624_v1 = vld [vmem:[%s4280_s1 + $0x38] sm:$0xff]  ;;  %v2623_v2 = vld [vmem:[%s4280_s1 + $0x30] sm:$0xff]  ;;  %v2622_v8 = vld [vmem:[%s4280_s1 + $0x28] sm:$0xff] }
 0x163   : > { %2868 = vmatpush.msra.mxu1 %v2624_v1  ;;  %2869 = vmatpush.msra.mxu2 %v2624_v1  ;;  %v2621_v9 = vld [vmem:[%s4280_s1 + $0x20] sm:$0xff]  ;;  %v729_v10 = vld [vmem:[%s3577_s25 + $0x9] sm:$0xff]  ;;  %v730_v11 = vld [vmem:[%s3577_s25 + $0x11] sm:$0xff] }
 0x164   : > { %2870 = vmatpush.msra.mxu3 %v2624_v1  ;;  %761 = vmatpush.msra.mxu0 %v2624_v1  ;;  %v2636_v12 = vld [vmem:[%s4280_s1 + $0x58] sm:$0xff]  ;;  %v2635_v15 = vld [vmem:[%s4280_s1 + $0x50] sm:$0xff]  ;;  %v2634_v18 = vld [vmem:[%s4280_s1 + $0x48] sm:$0xff] }
 0x165   : > { %2871 = vmatpush.msra.mxu1 %v2623_v2  ;;  %2872 = vmatpush.msra.mxu2 %v2623_v2  ;;  %v727_v13 = vld [vmem:[%s4280_s1 + $0x18] sm:$0xff]  ;;  %v726_v17 = vld [vmem:[%s4280_s1 + $0x10] sm:$0xff]  ;;  %v725_v20 = vld [vmem:[%s4280_s1 + $0x8] sm:$0xff] }
 0x166   : > { %2873 = vmatpush.msra.mxu3 %v2623_v2  ;;  %762 = vmatpush.msra.mxu0 %v2623_v2  ;;  %v731_v14 = vld [vmem:[%s3577_s25 + $0x19] sm:$0xf]  ;;  %v2648_v19 = vld [vmem:[%s4280_s1 + $0x70] sm:$0xff]  ;;  %v728_v21 = vld [vmem:[%s3577_s25 + $0x1] sm:$0xff] }
 0x167   : > { %2874 = vmatpush.msra.mxu1 %v2622_v8  ;;  %2875 = vmatpush.msra.mxu2 %v2622_v8  ;;  %v2649_v16 = vld [vmem:[%s4280_s1 + $0x78] sm:$0xff]  ;;  %v2633_v22 = vld [vmem:[%s4280_s1 + $0x40] sm:$0xff]  ;;  %v2647_v23 = vld [vmem:[%s4280_s1 + $0x68] sm:$0xff] }
 0x168   : > { %2876 = vmatpush.msra.mxu3 %v2622_v8  ;;  %763 = vmatpush.msra.mxu0 %v2622_v8  ;;  %v724_v24 = vld [vmem:[%s4280_s1] sm:$0xff]  ;;  %v2686_v28 = vld [vmem:[%s4280_s1 + $0xd8] sm:$0xff]  ;;  %v2685_v33 = vld [vmem:[%s4280_s1 + $0xd0] sm:$0xff] }
 0x169   : > { %2877 = vmatpush.msra.mxu1 %v2621_v9  ;;  %2878 = vmatpush.msra.mxu2 %v2621_v9  ;;  %v819_v25 = vld [vmem:[%s3577_s25 + $0x2] sm:$0xff]  ;;  %v2661_v30 = vld [vmem:[%s4280_s1 + $0x98] sm:$0xff]  ;;  %v2660_v34 = vld [vmem:[%s4280_s1 + $0x90] sm:$0xff] }
 0x16a   : > { %2626 = vmatmul.msk.f32.vlgmr.msra.gmra.mxu1 %vm69_vm0, %v729_v10  ;;  %2627 = vmatmul.msk.f32.vlgmr.msra.gmra.mxu2 %vm69_vm0, %v730_v11  ;;  %v720_v26 = vld [vmem:[%s3577_s25] sm:$0xff]  ;;  %v2698_v31 = vld [vmem:[%s4280_s1 + $0xf8] sm:$0xff]  ;;  %v2697_v35 = vld [vmem:[%s4280_s1 + $0xf0] sm:$0xff] }
 0x16b   : > { %852 = vmatpush.msrb.mxu2 %v2636_v12  ;;  %2879 = vmatpush.msra.mxu3 %v2621_v9  ;;  %v2646_v27 = vld [vmem:[%s4280_s1 + $0x60] sm:$0xff]  ;;  %v2673_v32 = vld [vmem:[%s4280_s1 + $0xb8] sm:$0xff]  ;;  %v2672_v36 = vld [vmem:[%s4280_s1 + $0xb0] sm:$0xff] }
 0x16c   : > { %802 = vmatpush.msrb.mxu1 %v727_v13  ;;  %2628 = vmatmul.msk.f32.vlgmr.msra.gmra.mxu3 %vm69_vm0, %v731_v14  ;;  %v2642_v29 = vld [vmem:[%s3577_s25 + $0x20] sm:$0xff]  ;;  %v2684_v37 = vld [vmem:[%s4280_s1 + $0xc8] sm:$0xff]  ;;  %v2710_v46 = vld [vmem:[%s4280_s1 + $0x118] sm:$0xff] }
 0x16d   : > { %853 = vmatpush.msrb.mxu2 %v2635_v15  ;;  %909 = vmatpush.msrb.mxu3 %v2649_v16  ;;  %v2659_v38 = vld [vmem:[%s4280_s1 + $0x88] sm:$0xff]  ;;  %v2658_v43 = vld [vmem:[%s4280_s1 + $0x80] sm:$0xff]  ;;  %v2709_v50 = vld [vmem:[%s4280_s1 + $0x110] sm:$0xff] }
 0x16e   : > { %803 = vmatpush.msrb.mxu1 %v726_v17  ;;  %764 = vmatpush.msra.mxu0 %v2621_v9  ;;  %v2696_v39 = vld [vmem:[%s4280_s1 + $0xe8] sm:$0xff]  ;;  %v2683_v47 = vld [vmem:[%s4280_s1 + $0xc0] sm:$0xff]  ;;  %v821_v52 = vld [vmem:[%s3577_s25 + $0x12] sm:$0xff] }
 0x16f   : > { %854 = vmatpush.msrb.mxu2 %v2634_v18  ;;  %910 = vmatpush.msrb.mxu3 %v2648_v19  ;;  %v820_v40 = vld [vmem:[%s3577_s25 + $0xa] sm:$0xff]  ;;  %v2654_v45 = vld [vmem:[%s3577_s25 + $0x21] sm:$0xff]  ;;  %v822_v57 = vld [vmem:[%s3577_s25 + $0x1a] sm:$0xf] }
 0x170   : > { %804 = vmatpush.msrb.mxu1 %v725_v20  ;;  %2625 = vmatmul.msk.f32.vlgmr.msra.gmra.mxu0 %vm69_vm0, %v728_v21  ;;  %v2671_v41 = vld [vmem:[%s4280_s1 + $0xa8] sm:$0xff]  ;;  %v2695_v48 = vld [vmem:[%s4280_s1 + $0xe0] sm:$0xff]  ;;  %v722_v53 = vld [vmem:[%s3577_s25 + $0x10] sm:$0xff] }
 0x171   : > { %855 = vmatpush.msrb.mxu2 %v2633_v22  ;;  %911 = vmatpush.msrb.mxu3 %v2647_v23  ;;  %v721_v42 = vld [vmem:[%s3577_s25 + $0x8] sm:$0xff]  ;;  %v2670_v49 = vld [vmem:[%s4280_s1 + $0xa0] sm:$0xff]  ;;  %v2644_v55 = vld [vmem:[%s3577_s25 + $0x30] sm:$0xff] }
 0x172   : > { %805 = vmatpush.msrb.mxu1 %v724_v24  ;;  %2637 = vmatmul.msk.f32.vlgmr.msrb.gmra.mxu2 %vm69_vm0, %v819_v25  ;;  %v2643_v44 = vld [vmem:[%s3577_s25 + $0x28] sm:$0xff]  ;;  %v2707_v54 = vld [vmem:[%s4280_s1 + $0x100] sm:$0xff]  ;;  %v723_v58 = vld [vmem:[%s3577_s25 + $0x18] sm:$0xf] }
 0x173   : > { %2629 = vmatmul.msk.f32.vlgmr.msrb.gmra.mxu1 %vm69_vm0, %v720_v26  ;;  %912 = vmatpush.msrb.mxu3 %v2646_v27  ;;  %v2708_v51 = vld [vmem:[%s4280_s1 + $0x108] sm:$0xff]  ;;  %v2645_v59 = vld [vmem:[%s3577_s25 + $0x38] sm:$0xf]  ;;  %v2679_v61 = vld [vmem:[%s3577_s25 + $0x40] sm:$0xff] }
 0x174   : > { %1074 = vmatpush.msra.mxu2 %v2686_v28  ;;  %2650 = vmatmul.msk.f32.vlgmr.msrb.gmra.mxu3 %vm69_vm0, %v2642_v29  ;;  %v2655_v56 = vld [vmem:[%s3577_s25 + $0x29] sm:$0xff]  ;;  %v2656_v60 = vld [vmem:[%s3577_s25 + $0x31] sm:$0xff]  ;;  %v2657_v63 = vld [vmem:[%s3577_s25 + $0x39] sm:$0xf] }
 0x175   : > { %963 = vmatpush.msrb.mxu0 %v2661_v30  ;;  %1128 = vmatpush.msra.mxu3 %v2698_v31  ;;  %v2666_v62 = vld [vmem:[%s3577_s25 + $0x22] sm:$0xff]  ;;  %v2667_v5 = vld [vmem:[%s3577_s25 + $0x2a] sm:$0xff]  ;;  %v2668_v8 = vld [vmem:[%s3577_s25 + $0x32] sm:$0xff] }
 0x176   : > { %1017 = vmatpush.msra.mxu1 %v2673_v32  ;;  %1075 = vmatpush.msra.mxu2 %v2685_v33  ;;  %v2691_v0 = vld [vmem:[%s3577_s25 + $0x41] sm:$0xff]  ;;  %v2692_v4 = vld [vmem:[%s3577_s25 + $0x49] sm:$0xff]  ;;  %v2693_v9 = vld [vmem:[%s3577_s25 + $0x51] sm:$0xff] }
 0x177   : > { %964 = vmatpush.msrb.mxu0 %v2660_v34  ;;  %1129 = vmatpush.msra.mxu3 %v2697_v35  ;;  %v2680_v3 = vld [vmem:[%s3577_s25 + $0x48] sm:$0xff]  ;;  %v2681_v2 = vld [vmem:[%s3577_s25 + $0x50] sm:$0xff]  ;;  %v2682_v11 = vld [vmem:[%s3577_s25 + $0x58] sm:$0xf] }
 0x178   : > { %1018 = vmatpush.msra.mxu1 %v2672_v36  ;;  %1076 = vmatpush.msra.mxu2 %v2684_v37  ;;  %v2703_v1 = vld [vmem:[%s3577_s25 + $0x42] sm:$0xff]  ;;  %v2704_v10 = vld [vmem:[%s3577_s25 + $0x4a] sm:$0xff]  ;;  %v2669_v12 = vld [vmem:[%s3577_s25 + $0x3a] sm:$0xf] }
 0x179   : > { %965 = vmatpush.msrb.mxu0 %v2659_v38  ;;  %1130 = vmatpush.msra.mxu3 %v2696_v39  ;;  %v2694_v13 = vld [vmem:[%s3577_s25 + $0x59] sm:$0xf] }
 0x17a   : > { %2638 = vmatmul.msk.f32.gmra.mxu2 %vm69_vm0, %v820_v40  ;;  %1019 = vmatpush.msra.mxu1 %v2671_v41  ;;  %v2705_v14 = vld [vmem:[%s3577_s25 + $0x52] sm:$0xff]  ;;  %v2706_v15 = vld [vmem:[%s3577_s25 + $0x5a] sm:$0xf]  ;;  %s3751_s25 = scalar_lea.vmem [#allocation3], %s2620_s26 }
 0x17b   : > { %2630 = vmatmul.msk.f32.gmra.mxu1 %vm69_vm0, %v721_v42  ;;  %966 = vmatpush.msrb.mxu0 %v2658_v43 }
 0x17c   : > { %2651 = vmatmul.msk.f32.gmra.mxu3 %vm69_vm0, %v2643_v44  ;;  %2662 = vmatmul.msk.f32.vlgmr.msrb.gmra.mxu0 %vm69_vm0, %v2654_v45 }
 0x17d   : > { %1182 = vmatpush.msra.mxu0 %v2710_v46  ;;  %1077 = vmatpush.msra.mxu2 %v2683_v47 }
 0x17e   : > { %1131 = vmatpush.msra.mxu3 %v2695_v48  ;;  %1020 = vmatpush.msra.mxu1 %v2670_v49 }
 0x17f   : > { %1183 = vmatpush.msra.mxu0 %v2709_v50 }
 0x181   : > { %1184 = vmatpush.msra.mxu0 %v2708_v51 }
 0x182   : > { %2639 = vmatmul.msk.f32.gmra.mxu2 %vm69_vm0, %v821_v52 }
 0x183   : > { %2631 = vmatmul.msk.f32.gmra.mxu1 %vm69_vm0, %v722_v53  ;;  %1185 = vmatpush.msra.mxu0 %v2707_v54 }
 0x184   : > { %2652 = vmatmul.msk.f32.gmra.mxu3 %vm69_vm0, %v2644_v55  ;;  %2663 = vmatmul.msk.f32.gmra.mxu0 %vm69_vm0, %v2655_v56  ;;  %v1208_v55 = vperm.slane %v3550_v6, 0 }
 0x18a   : > { %2640 = vmatmul.msk.f32.gmra.mxu2 %vm69_vm0, %v822_v57 }
 0x18b   : > { %2632 = vmatmul.msk.f32.gmra.mxu1 %vm69_vm0, %v723_v58  ;;  %v1215_v58 = vperm.slane %v3555_v7, 0 }
 0x18c   : > { %2653 = vmatmul.msk.f32.gmra.mxu3 %vm69_vm0, %v2645_v59  ;;  %2664 = vmatmul.msk.f32.gmra.mxu0 %vm69_vm0, %v2656_v60 }
 0x192   : > { %2687 = vmatmul.msk.f32.vlgmr.msra.gmra.mxu2 %vm69_vm0, %v2679_v61 }
 0x193   : > { %2674 = vmatmul.msk.f32.vlgmr.msra.gmra.mxu1 %vm69_vm0, %v2666_v62 }
 0x194   : > { %2665 = vmatmul.msk.f32.gmra.mxu0 %vm69_vm0, %v2657_v63  ;;  %2699 = vmatmul.msk.f32.vlgmr.msra.gmra.mxu3 %vm69_vm0, %v2691_v0 }
 0x19a   : > { %2688 = vmatmul.msk.f32.gmra.mxu2 %vm69_vm0, %v2680_v3 }
 0x19b   : > { %2675 = vmatmul.msk.f32.gmra.mxu1 %vm69_vm0, %v2667_v5 }
 0x19c   : > { %2700 = vmatmul.msk.f32.gmra.mxu3 %vm69_vm0, %v2692_v4  ;;  %2711 = vmatmul.msk.f32.vlgmr.msra.gmra.mxu0 %vm69_vm0, %v2703_v1 }
 0x1a2   : > { %2689 = vmatmul.msk.f32.gmra.mxu2 %vm69_vm0, %v2681_v2 }
 0x1a3   : > { %2676 = vmatmul.msk.f32.gmra.mxu1 %vm69_vm0, %v2668_v8 }
 0x1a4   : > { %2701 = vmatmul.msk.f32.gmra.mxu3 %vm69_vm0, %v2693_v9  ;;  %2712 = vmatmul.msk.f32.gmra.mxu0 %vm69_vm0, %v2704_v10 }
 0x1aa   : > { %2690 = vmatmul.msk.f32.gmra.mxu2 %vm69_vm0, %v2682_v11 }
 0x1ab   : > { %2677 = vmatmul.msk.f32.gmra.mxu1 %vm69_vm0, %v2669_v12 }
 0x1ac   : > { %2702 = vmatmul.msk.f32.gmra.mxu3 %vm69_vm0, %v2694_v13  ;;  %2713 = vmatmul.msk.f32.gmra.mxu0 %vm69_vm0, %v2705_v14 }
 0x1b4   : > { %2714 = vmatmul.msk.f32.gmra.mxu0 %vm69_vm0, %v2706_v15 }
 0x1e7   : > { %v769_v16 = vpop.f32.mrf.mxu1 }
 0x1ed   : > { %v772_v17 = vpop.f32.mrf.mxu2  ;;  %v766_v19 = vpop.f32.mrf.mxu0 }
 0x1ef   : > { %v775_v18 = vpop.f32.mrf.mxu3 }
 0x1f0   : > { %v807_v20 = vpop.f32.mrf.mxu1 }
 0x1f1   : > { %v808_v31 = vadd.f32 %v807_v20, %v766_v19 }
 0x1f5   : > { %v857_v21 = vpop.f32.mrf.mxu2 }
 0x1f6   : > { %v869_v34 = vadd.f32 %v857_v21, %v808_v31 }
 0x1f7   : > { %v914_v22 = vpop.f32.mrf.mxu3 }
 0x1f8   : > { %v810_v23 = vpop.f32.mrf.mxu1  ;;  %v926_v36 = vadd.f32 %v914_v22, %v869_v34 }
 0x1f9   : > { %v968_v24 = vpop.f32.mrf.mxu0  ;;  %v811_v38 = vadd.f32 %v810_v23, %v769_v16 }
 0x1fa   : > { %v980_v41 = vadd.f32 %v968_v24, %v926_v36  ;;  %v3766_v36 = vld [vmem:[%s4253_s8] sm:$0x1] (%p714_p1) }
 0x1fd   : > { %v860_v25 = vpop.f32.mrf.mxu2 }
 0x1fe   : > { %v870_v42 = vadd.f32 %v860_v25, %v811_v38 }
 0x1ff   : > { %v917_v26 = vpop.f32.mrf.mxu3 }
 0x200   : > { %v813_v27 = vpop.f32.mrf.mxu1  ;;  %v927_v45 = vadd.f32 %v917_v26, %v870_v42 }
 0x201   : > { %v971_v28 = vpop.f32.mrf.mxu0  ;;  %v814_v48 = vadd.f32 %v813_v27, %v772_v17 }
 0x202   : > { %v981_v52 = vadd.f32 %v971_v28, %v927_v45 }
 0x205   : > { %v863_v29 = vpop.f32.mrf.mxu2 }
 0x206   : > { %v871_v53 = vadd.f32 %v863_v29, %v814_v48 }
 0x207   : > { %v920_v30 = vpop.f32.mrf.mxu3 }
 0x208   : > { %v816_v32 = vpop.f32.mrf.mxu1  ;;  %v928_v60 = vadd.f32 %v920_v30, %v871_v53 }
 0x209   : > { %v974_v33 = vpop.f32.mrf.mxu0  ;;  %v817_v0 = vadd.f32 %v816_v32, %v775_v18 }
 0x20a   : > { %v982_v2 = vadd.f32 %v974_v33, %v928_v60 }
 0x20d   : > { %v866_v35 = vpop.f32.mrf.mxu2 }
 0x20e   : > { %v872_v8 = vadd.f32 %v866_v35, %v817_v0 }
 0x20f   : > { %v923_v37 = vpop.f32.mrf.mxu3 }
 0x210   : > { %v1022_v39 = vpop.f32.mrf.mxu1  ;;  %v929_v13 = vadd.f32 %v923_v37, %v872_v8  ;;  %v3771_v37 = vld [vmem:[%s4254_s9] sm:$0x1] (%p714_p1) }
 0x211   : > { %v977_v40 = vpop.f32.mrf.mxu0  ;;  %v1034_v43 = vadd.f32 %v1022_v39, %v980_v41 }
 0x212   : > { %v983_v21 = vadd.f32 %v977_v40, %v929_v13 }
 0x215   : > { %v1079_v44 = vpop.f32.mrf.mxu2 }
 0x216   : > { %v1091_v46 = vadd.f32 %v1079_v44, %v1034_v43 }
 0x217   : > { %v1133_v47 = vpop.f32.mrf.mxu3 }
 0x218   : > { %v1025_v49 = vpop.f32.mrf.mxu1  ;;  %v1145_v50 = vadd.f32 %v1133_v47, %v1091_v46 }
 0x219   : > { %v1187_v51 = vpop.f32.mrf.mxu0  ;;  %v1035_v56 = vadd.f32 %v1025_v49, %v981_v52 }
 0x21a   : > { %v1199_v54 = vadd.f32 %v1187_v51, %v1145_v50 }
 0x21c   : > { %v1203_v57 = vmax.f32 %v1199_v54, 0.0 }
 0x21d   : > { %v1082_v59 = vpop.f32.mrf.mxu2 }
 0x21e   : > { %v1210_v61 = vmul.f32 %v1208_v55, %v1203_v57  ;;  %v1092_v62 = vadd.f32 %v1082_v59, %v1035_v56 }
 0x21f   : > { %v1136_v63 = vpop.f32.mrf.mxu3 }
 0x220   : > { %v1217_v3 = vadd.f32 %v1215_v58, %v1210_v61  ;;  %v1028_v5 = vpop.f32.mrf.mxu1  ;;  %v1146_v4 = vadd.f32 %v1136_v63, %v1092_v62 }
 0x221   : > { %v1190_v1 = vpop.f32.mrf.mxu0  ;;  %v1036_v10 = vadd.f32 %v1028_v5, %v982_v2 }
 0x222   : > { %1223 = vst.msk [vmem:[%s3751_s25] sm:$0xff] %vm1222_vm5, %v1217_v3  ;;  %v1200_v9 = vadd.f32 %v1190_v1, %v1146_v4 }
 0x224   : > { %v1204_v11 = vmax.f32 %v1200_v9, 0.0 }
 0x225   : > { %v1085_v12 = vpop.f32.mrf.mxu2 }
 0x226   : > { %v1211_v14 = vmul.f32 %v1208_v55, %v1204_v11  ;;  %v1093_v15 = vadd.f32 %v1085_v12, %v1036_v10 }
 0x227   : > { %v1139_v16 = vpop.f32.mrf.mxu3 }
 0x228   : > { %v1218_v17 = vadd.f32 %v1215_v58, %v1211_v14  ;;  %v1147_v18 = vadd.f32 %v1139_v16, %v1093_v15  ;;  %v1031_v19 = vpop.f32.mrf.mxu1 }
 0x229   : > { %v1193_v20 = vpop.f32.mrf.mxu0  ;;  %v1037_v23 = vadd.f32 %v1031_v19, %v983_v21 }
 0x22a   : > { %1224 = vst.msk [vmem:[%s3751_s25 + $0x8] sm:$0xff] %vm1222_vm5, %v1218_v17  ;;  %v1201_v22 = vadd.f32 %v1193_v20, %v1147_v18 }
 0x22c   : > { %v1205_v24 = vmax.f32 %v1201_v22, 0.0 }
 0x22d   : > { %v1088_v25 = vpop.f32.mrf.mxu2 }
 0x22e   : > { %v1212_v26 = vmul.f32 %v1208_v55, %v1205_v24  ;;  %v1094_v27 = vadd.f32 %v1088_v25, %v1037_v23 }
 0x22f   : > { %v1142_v28 = vpop.f32.mrf.mxu3 }
 0x230   : > { %v1219_v29 = vadd.f32 %v1215_v58, %v1212_v26  ;;  %v1148_v30 = vadd.f32 %v1142_v28, %v1094_v27 }
 0x231   : > { %v1196_v31 = vpop.f32.mrf.mxu0 }
 0x232   : > { %1225 = vst.msk [vmem:[%s3751_s25 + $0x10] sm:$0xff] %vm1222_vm5, %v1219_v29  ;;  %v1202_v32 = vadd.f32 %v1196_v31, %v1148_v30 }
 0x234   : > { %v1206_v33 = vmax.f32 %v1202_v32, 0.0 }
 0x236   : > { %v1213_v34 = vmul.f32 %v1208_v55, %v1206_v33  ;;  %716 = sbr.rel (!%p714_p1) target bundleno = 348 (0x15c), region = 219 }
 0x238   : > { %v1220_v35 = vadd.f32 %v1215_v58, %v1213_v34 }
 0x23a   : > { %1227 = vst.msk [vmem:[%s3751_s25 + $0x18] sm:$0xf] %vm1226_vm6, %v1220_v35 }
 0x23b LB: > { %v1249_v6 = vld [vmem:[%s4252_s7 + $0x38] sm:$0xff]  ;;  %v1248_v7 = vld [vmem:[%s4252_s7 + $0x30] sm:$0xff]  ;;  %v1247_v38 = vld [vmem:[%s4252_s7 + $0x28] sm:$0xff]  ;;  %s2715_s4 = sshll.u32 %s3029_s24, 5  ;;  %v1297_v48 = vperm.slane %v3766_v36, 0  ;;  %v1304_v52 = vperm.slane %v3771_v37, 0  ;;  %s3029_s24 = sphi %s3773_s24, %s1235_s24  }
 0x23c   : > { %2881 = vmatpush.msra.mxu2 %v1249_v6  ;;  %2882 = vmatpush.msra.mxu3 %v1249_v6  ;;  %v1246_v39 = vld [vmem:[%s4252_s7 + $0x20] sm:$0xff]  ;;  %v1245_v40 = vld [vmem:[%s4252_s7 + $0x18] sm:$0xff]  ;;  %v1244_v41 = vld [vmem:[%s4252_s7 + $0x10] sm:$0xff]  ;;  %s1237_s6 = scalar_lea.vmem [#allocation3], %s2715_s4  ;;  %vm1311_vm7 = vcmask 162816   ;;  %s1310_s22 = scalar_lea.vmem [#allocation4], %s2715_s4 }
 0x23d   : > { %1271 = vmatpush.msra.mxu0 %v1249_v6  ;;  %2880 = vmatpush.msra.mxu1 %v1249_v6  ;;  %v1243_v42 = vld [vmem:[%s4252_s7 + $0x8] sm:$0xff]  ;;  %v1242_v43 = vld [vmem:[%s4252_s7] sm:$0xff]  ;;  %vm1315_vm8 = vcmask 158720   ;;  %s1235_s24 = sadd.s32 1, %s3029_s24  }
 0x23e   : > { %2884 = vmatpush.msra.mxu2 %v1248_v7  ;;  %2885 = vmatpush.msra.mxu3 %v1248_v7  ;;  %p1232_p2 = scmp.ge.s32.totalorder %s1235_s24, 28  }
 0x23f   : > { %1272 = vmatpush.msra.mxu0 %v1248_v7  ;;  %2883 = vmatpush.msra.mxu1 %v1248_v7  ;;  %s3819_s1 = smov (%p1232_p2), 0  }
 0x240   : > { %2887 = vmatpush.msra.mxu2 %v1247_v38  ;;  %2888 = vmatpush.msra.mxu3 %v1247_v38 }
 0x241   : > { %1273 = vmatpush.msra.mxu0 %v1247_v38  ;;  %2886 = vmatpush.msra.mxu1 %v1247_v38  ;;  %v1240_v44 = vld [vmem:[%s1237_s6 + $0x10] sm:$0xff]  ;;  %v1241_v45 = vld [vmem:[%s1237_s6 + $0x18] sm:$0xf]  ;;  %v1238_v46 = vld [vmem:[%s1237_s6] sm:$0xff] }
 0x242   : > { %2890 = vmatpush.msra.mxu2 %v1246_v39  ;;  %2891 = vmatpush.msra.mxu3 %v1246_v39  ;;  %v1239_v47 = vld [vmem:[%s1237_s6 + $0x8] sm:$0xff] }
 0x243   : > { %1274 = vmatpush.msra.mxu0 %v1246_v39  ;;  %2889 = vmatpush.msra.mxu1 %v1246_v39 }
 0x244   : > { %2893 = vmatpush.msra.mxu2 %v1245_v40  ;;  %2894 = vmatpush.msra.mxu3 %v1245_v40 }
 0x245   : > { %1275 = vmatpush.msra.mxu0 %v1245_v40  ;;  %2892 = vmatpush.msra.mxu1 %v1245_v40 }
 0x246   : > { %2896 = vmatpush.msra.mxu2 %v1244_v41  ;;  %2897 = vmatpush.msra.mxu3 %v1244_v41 }
 0x247   : > { %1276 = vmatpush.msra.mxu0 %v1244_v41  ;;  %2895 = vmatpush.msra.mxu1 %v1244_v41 }
 0x248   : > { %2899 = vmatpush.msra.mxu2 %v1243_v42  ;;  %2900 = vmatpush.msra.mxu3 %v1243_v42 }
 0x249   : > { %1277 = vmatpush.msra.mxu0 %v1243_v42  ;;  %2898 = vmatpush.msra.mxu1 %v1243_v42 }
 0x24a   : > { %2902 = vmatpush.msra.mxu2 %v1242_v43  ;;  %2903 = vmatpush.msra.mxu3 %v1242_v43 }
 0x24b   : > { %2718 = vmatmul.msk.f32.vlgmr.msra.gmra.mxu2 %vm1222_vm5, %v1240_v44  ;;  %2719 = vmatmul.msk.f32.vlgmr.msra.gmra.mxu3 %vm1222_vm5, %v1241_v45 }
 0x24c   : > { %1278 = vmatpush.msra.mxu0 %v1242_v43  ;;  %2901 = vmatpush.msra.mxu1 %v1242_v43 }
 0x24d   : > { %2716 = vmatmul.msk.f32.vlgmr.msra.gmra.mxu0 %vm1222_vm5, %v1238_v46  ;;  %2717 = vmatmul.msk.f32.vlgmr.msra.gmra.mxu1 %vm1222_vm5, %v1239_v47 }
 0x2ca   : > { %v1280_v49 = vpop.f32.mrf.mxu0  ;;  %v1283_v50 = vpop.f32.mrf.mxu1 }
 0x2cb   : > { %v1292_v51 = vmax.f32 %v1280_v49, 0.0  ;;  %v1293_v53 = vmax.f32 %v1283_v50, 0.0 }
 0x2cd   : > { %v1299_v54 = vmul.f32 %v1297_v48, %v1292_v51  ;;  %v1300_v55 = vmul.f32 %v1297_v48, %v1293_v53 }
 0x2ce   : > { %v1286_v56 = vpop.f32.mrf.mxu2  ;;  %v1289_v57 = vpop.f32.mrf.mxu3 }
 0x2cf   : > { %v1306_v58 = vadd.f32 %v1304_v52, %v1299_v54  ;;  %v1307_v59 = vadd.f32 %v1304_v52, %v1300_v55  ;;  %v1294_v60 = vmax.f32 %v1286_v56, 0.0  ;;  %v1295_v61 = vmax.f32 %v1289_v57, 0.0 }
 0x2d1   : > { %1312 = vst.msk [vmem:[%s1310_s22] sm:$0xff] %vm1311_vm7, %v1306_v58  ;;  %v1301_v62 = vmul.f32 %v1297_v48, %v1294_v60  ;;  %v1302_v63 = vmul.f32 %v1297_v48, %v1295_v61 }
 0x2d2   : > { %1313 = vst.msk [vmem:[%s1310_s22 + $0x8] sm:$0xff] %vm1311_vm7, %v1307_v59  ;;  %1234 = sbr.rel (!%p1232_p2) target bundleno = 571 (0x23b), region = 230 }
 0x2d3   : > { %v1308_v0 = vadd.f32 %v1304_v52, %v1301_v62  ;;  %v1309_v3 = vadd.f32 %v1304_v52, %v1302_v63 }
 0x2d5   : > { %1314 = vst.msk [vmem:[%s1310_s22 + $0x10] sm:$0xff] %vm1311_vm7, %v1308_v0 }
 0x2d6   : > { %1316 = vst.msk [vmem:[%s1310_s22 + $0x18] sm:$0xf] %vm1315_vm8, %v1309_v3 }
 0x2d7 LB: > { %s2863_s2 = sshll.u32 %s3033_s1, 6  ;;  %s2728_s9 = sshll.u32 %s3033_s1, 4  ;;  %vm1347_vm9 = vcmask 155648   ;;  %vm1349_vm10 = vcmask 157698   ;;  %vm1351_vm11 = vcmask 159748   ;;  %vm1353_vm12 = vcmask 161798   ;;  %s3033_s1 = sphi %s3819_s1, %s1322_s1  }
 0x2d8   : > { %s1325_s8 = scalar_lea.vmem [#allocation4], %s2863_s2  ;;  %s1346_s7 = scalar_lea.vmem [#allocation5], %s2728_s9 }
 0x2d9   : > { %s1322_s1 = sadd.s32 1, %s3033_s1  }
 0x2da   : > { %p1319_p3 = scmp.ge.s32.totalorder %s1322_s1, 14  }
 0x2db   :  { %v3846_v24 = vld [vmem:[%s4256_s11] sm:$0x1] (%p1319_p3)  ;;  %s3848_s3 = smov (%p1319_p3), 0  }
 0x2dd   : > { %v1326_v5 = vld [vmem:[%s1325_s8] sm:$0xff]  ;;  %v1327_v1 = vld [vmem:[%s1325_s8 + $0x8] sm:$0xff]  ;;  %v1328_v9 = vld [vmem:[%s1325_s8 + $0x10] sm:$0xff] }
 0x2de   : > { %v2724_v4 = vld [vmem:[%s1325_s8 + $0x20] sm:$0xff]  ;;  %v2725_v8 = vld [vmem:[%s1325_s8 + $0x28] sm:$0xff]  ;;  %v2726_v10 = vld [vmem:[%s1325_s8 + $0x30] sm:$0xff] }
 0x2df   : > { %v1337_v2 = vmax.f32 %v1326_v5, %v2724_v4  ;;  %v1338_v11 = vmax.f32 %v1327_v1, %v2725_v8  ;;  %v1339_v13 = vmax.f32 %v1328_v9, %v2726_v10  ;;  %v1329_v15 = vld [vmem:[%s1325_s8 + $0x18] sm:$0xf] }
 0x2e0   : > { %v2727_v16 = vld [vmem:[%s1325_s8 + $0x38] sm:$0xf] }
 0x2e1   : > { %v1342_v12 = vrot.slane %v1337_v2, 1  ;;  %v1356_v14 = vrot.slane %v1338_v11, 1  ;;  %v1364_v19 = vrot.slane %v1339_v13, 1  ;;  %v1340_v20 = vmax.f32 %v1329_v15, %v2727_v16 }
 0x2e3   : > { %v1344_v17 = vmax.f32 %v1337_v2, %v1342_v12  ;;  %v1358_v18 = vmax.f32 %v1338_v11, %v1356_v14  ;;  %v1366_v21 = vmax.f32 %v1339_v13, %v1364_v19  ;;  %v1372_v22 = vrot.slane %v1340_v20, 1 }
 0x2e5   : > { %1348 = vst.msk [vmem:[%s1346_s7] sm:$0x1] %vm1347_vm9, %v1344_v17  ;;  %v1374_v23 = vmax.f32 %v1340_v20, %v1372_v22 }
 0x2e6   : > { %1350 = vst.msk [vmem:[%s1346_s7 - $0x1] sm:$0x4] %vm1349_vm10, %v1344_v17 }
 0x2e7   : > { %1352 = vst.msk [vmem:[%s1346_s7 - $0x2] sm:$0x10] %vm1351_vm11, %v1344_v17 }
 0x2e8   : > { %1354 = vst.msk [vmem:[%s1346_s7 - $0x3] sm:$0x40] %vm1353_vm12, %v1344_v17 }
 0x2e9   : > { %1359 = vst.msk [vmem:[%s1346_s7 + $0x4] sm:$0x1] %vm1347_vm9, %v1358_v18 }
 0x2ea   : > { %1360 = vst.msk [vmem:[%s1346_s7 + $0x3] sm:$0x4] %vm1349_vm10, %v1358_v18 }
 0x2eb   : > { %1361 = vst.msk [vmem:[%s1346_s7 + $0x2] sm:$0x10] %vm1351_vm11, %v1358_v18 }
 0x2ec   : > { %1362 = vst.msk [vmem:[%s1346_s7 + $0x1] sm:$0x40] %vm1353_vm12, %v1358_v18 }
 0x2ed   : > { %1367 = vst.msk [vmem:[%s1346_s7 + $0x8] sm:$0x1] %vm1347_vm9, %v1366_v21 }
 0x2ee   : > { %1368 = vst.msk [vmem:[%s1346_s7 + $0x7] sm:$0x4] %vm1349_vm10, %v1366_v21  ;;  %1321 = sbr.rel (!%p1319_p3) target bundleno = 727 (0x2d7), region = 241 }
 0x2ef   : > { %1369 = vst.msk [vmem:[%s1346_s7 + $0x6] sm:$0x10] %vm1351_vm11, %v1366_v21 }
 0x2f0   : > { %1370 = vst.msk [vmem:[%s1346_s7 + $0x5] sm:$0x40] %vm1353_vm12, %v1366_v21 }
 0x2f1   : > { %1375 = vst.msk [vmem:[%s1346_s7 + $0xc] sm:$0x1] %vm1347_vm9, %v1374_v23 }
 0x2f2   : > { %1376 = vst.msk [vmem:[%s1346_s7 + $0xb] sm:$0x4] %vm1349_vm10, %v1374_v23 }
 0x2f3 LB: > { %v2732_v25 = vld [vmem:[%s4255_s10 + $0x28] sm:$0xf]  ;;  %vm1404_vm13 = vcmask 1043456   ;;  %v2731_v26 = vld [vmem:[%s4255_s10 + $0x20] sm:$0xff]  ;;  %v2740_v28 = vld [vmem:[%s4255_s10 + $0x38] sm:$0xff]  ;;  %s2729_s6 = sshll.u32 %s3037_s3, 4  ;;  %s3037_s3 = sphi %s3848_s3, %s1383_s3  }
 0x2f4   : > { %2904 = vmatpush.msk.msra.mxu1 %vm1404_vm13, %v2732_v25  ;;  %v2741_v27 = vld [vmem:[%s4255_s10 + $0x40] sm:$0xf]  ;;  %2733 = vmatpush.msk.msra.mxu0 %vm1404_vm13, %v2732_v25  ;;  %v2730_v29 = vld [vmem:[%s4255_s10 + $0x18] sm:$0xff]  ;;  %v2739_v31 = vld [vmem:[%s4255_s10 + $0x30] sm:$0xff]  ;;  %s3884_s24 = scalar_lea.vmem [#allocation5], %s2729_s6  ;;  %s1383_s3 = sadd.s32 1, %s3037_s3  }
 0x2f5   : > { %2742 = vmatpush.msk.msra.mxu2 %vm1404_vm13, %v2741_v27  ;;  %v2750_v30 = vld [vmem:[%s4255_s10 + $0x58] sm:$0xf]  ;;  %v2749_v32 = vld [vmem:[%s4255_s10 + $0x50] sm:$0xff]  ;;  %v2775_v36 = vld [vmem:[%s4255_s10 + $0xa0] sm:$0xf]  ;;  %p1380_p4 = scmp.ge.s32.totalorder %s1383_s3, 12  }
 0x2f6   : > { %2905 = vmatpush.msra.mxu1 %v2731_v26  ;;  %2751 = vmatpush.msk.msra.mxu3 %vm1404_vm13, %v2750_v30  ;;  %v1390_v34 = vld [vmem:[%s4255_s10 + $0x10] sm:$0xf]  ;;  %v1389_v37 = vld [vmem:[%s4255_s10 + $0x8] sm:$0xff]  ;;  %v1388_v39 = vld [vmem:[%s4255_s10] sm:$0xff]  ;;  %s4003_s26 = smov (%p1380_p4), 0  }
 0x2f7   : > { %1492 = vmatpush.msra.mxu2 %v2740_v28  ;;  %1422 = vmatpush.msra.mxu0 %v2731_v26  ;;  %v2748_v6 = vld [vmem:[%s4255_s10 + $0x48] sm:$0xff]  ;;  %v2758_v40 = vld [vmem:[%s4255_s10 + $0x70] sm:$0xf]  ;;  %v2783_v41 = vld [vmem:[%s4255_s10 + $0xb8] sm:$0xf] }
 0x2f8   : > { %2906 = vmatpush.msra.mxu1 %v2730_v29  ;;  %1535 = vmatpush.msra.mxu3 %v2749_v32  ;;  %v2766_v42 = vld [vmem:[%s4255_s10 + $0x88] sm:$0xf]  ;;  %v2774_v44 = vld [vmem:[%s4255_s10 + $0x98] sm:$0xff]  ;;  %v2782_v46 = vld [vmem:[%s4255_s10 + $0xb0] sm:$0xff] }
 0x2f9   : > { %v1392_v33 = vld [vmem:[%s3884_s24 + $0x9] sm:$0xf]  ;;  %1493 = vmatpush.msra.mxu2 %v2739_v31  ;;  %v1391_v7 = vld [vmem:[%s3884_s24 + $0x1] sm:$0xff]  ;;  %v2746_v38 = vld [vmem:[%s3884_s24 + $0x10] sm:$0xff]  ;;  %1423 = vmatpush.msra.mxu0 %v2730_v29  ;;  %v1750_v31 = vperm.slane %v3846_v24, 0 }
 0x2fa   : > { %v1463_v35 = vld [vmem:[%s3884_s24 + $0x2] sm:$0xff]  ;;  %2735 = vmatmul.msk.f32.vlgmr.msra.gmra.mxu1 %vm1311_vm7, %v1392_v33  ;;  %1536 = vmatpush.msra.mxu3 %v2748_v6  ;;  %v1464_v47 = vld [vmem:[%s3884_s24 + $0xa] sm:$0xf]  ;;  %v2791_v50 = vld [vmem:[%s4255_s10 + $0xd0] sm:$0xf] }
 0x2fb   : > { %2736 = vmatpush.msk.msrb.mxu1 %vm1404_vm13, %v1390_v34  ;;  %2743 = vmatmul.msk.f32.vlgmr.msra.gmra.mxu2 %vm1311_vm7, %v1463_v35  ;;  %v2757_v43 = vld [vmem:[%s4255_s10 + $0x68] sm:$0xff]  ;;  %v1386_v45 = vld [vmem:[%s3884_s24] sm:$0xff]  ;;  %v2773_v51 = vld [vmem:[%s4255_s10 + $0x90] sm:$0xff] }
 0x2fc   : > { %2776 = vmatpush.msk.msrb.mxu2 %vm1404_vm13, %v2775_v36  ;;  %2734 = vmatmul.msk.f32.vlgmr.msra.gmra.mxu0 %vm1311_vm7, %v1391_v7  ;;  %v2756_v48 = vld [vmem:[%s4255_s10 + $0x60] sm:$0xff]  ;;  %v2781_v52 = vld [vmem:[%s4255_s10 + $0xa8] sm:$0xff]  ;;  %v2747_v53 = vld [vmem:[%s3884_s24 + $0x18] sm:$0xf] }
 0x2fd   : > { %1454 = vmatpush.msrb.mxu1 %v1389_v37  ;;  %2752 = vmatmul.msk.f32.vlgmr.msra.gmra.mxu3 %vm1311_vm7, %v2746_v38  ;;  %v2765_v49 = vld [vmem:[%s4255_s10 + $0x80] sm:$0xff]  ;;  %v2754_v54 = vld [vmem:[%s3884_s24 + $0x11] sm:$0xff]  ;;  %v2790_v56 = vld [vmem:[%s4255_s10 + $0xc8] sm:$0xff] }
 0x2fe   : > { %2759 = vmatpush.msk.msrb.mxu0 %vm1404_vm13, %v2758_v40  ;;  %2784 = vmatpush.msk.msrb.mxu3 %vm1404_vm13, %v2783_v41  ;;  %v2764_v55 = vld [vmem:[%s4255_s10 + $0x78] sm:$0xff]  ;;  %v2789_v57 = vld [vmem:[%s4255_s10 + $0xc0] sm:$0xff]  ;;  %v1387_v58 = vld [vmem:[%s3884_s24 + $0x8] sm:$0xf] }
 0x2ff   : > { %1455 = vmatpush.msrb.mxu1 %v1388_v39  ;;  %1658 = vmatpush.msrb.mxu2 %v2774_v44  ;;  %v2771_v59 = vld [vmem:[%s3884_s24 + $0x20] sm:$0xff]  ;;  %v2755_v60 = vld [vmem:[%s3884_s24 + $0x19] sm:$0xf]  ;;  %v2772_v63 = vld [vmem:[%s3884_s24 + $0x28] sm:$0xf] }
 0x300   : > { %1575 = vmatpush.msrb.mxu0 %v2757_v43  ;;  %1698 = vmatpush.msrb.mxu3 %v2782_v46  ;;  %v2779_v61 = vld [vmem:[%s3884_s24 + $0x21] sm:$0xff]  ;;  %v2762_v62 = vld [vmem:[%s3884_s24 + $0x12] sm:$0xff]  ;;  %v2780_v0 = vld [vmem:[%s3884_s24 + $0x29] sm:$0xf] }
 0x301   : > { %2767 = vmatpush.msk.msra.mxu1 %vm1404_vm13, %v2766_v42  ;;  %1659 = vmatpush.msrb.mxu2 %v2773_v51  ;;  %v2787_v3 = vld [vmem:[%s3884_s24 + $0x22] sm:$0xff]  ;;  %v2763_v5 = vld [vmem:[%s3884_s24 + $0x1a] sm:$0xf]  ;;  %v2788_v4 = vld [vmem:[%s3884_s24 + $0x2a] sm:$0xf]  ;;  %s1756_s24 = scalar_lea.vmem [#allocation6], %s2729_s6 }
 0x302   : > { %2737 = vmatmul.msk.f32.vlgmr.msrb.gmra.mxu1 %vm1311_vm7, %v1386_v45  ;;  %1576 = vmatpush.msrb.mxu0 %v2756_v48  ;;  %v3996_v44 = vld [vmem:[%s4258_s13] sm:$0x1] (%p1380_p4) }
 0x303   : > { %2744 = vmatmul.msk.f32.gmra.mxu2 %vm1311_vm7, %v1464_v47  ;;  %1615 = vmatpush.msra.mxu1 %v2765_v49  ;;  %v4001_v45 = vld [vmem:[%s4259_s14] sm:$0x1] (%p1380_p4) }
 0x304   : > { %2792 = vmatpush.msk.msra.mxu0 %vm1404_vm13, %v2791_v50  ;;  %1699 = vmatpush.msrb.mxu3 %v2781_v52 }
 0x305   : > { %2753 = vmatmul.msk.f32.gmra.mxu3 %vm1311_vm7, %v2747_v53  ;;  %2760 = vmatmul.msk.f32.vlgmr.msrb.gmra.mxu0 %vm1311_vm7, %v2754_v54 }
 0x306   : > { %1616 = vmatpush.msra.mxu1 %v2764_v55  ;;  %1738 = vmatpush.msra.mxu0 %v2790_v56 }
 0x308   : > { %1739 = vmatpush.msra.mxu0 %v2789_v57 }
 0x30a   : > { %2738 = vmatmul.msk.f32.gmra.mxu1 %vm1311_vm7, %v1387_v58 }
 0x30b   : > { %2777 = vmatmul.msk.f32.vlgmr.msrb.gmra.mxu2 %vm1311_vm7, %v2771_v59 }
 0x30d   : > { %2761 = vmatmul.msk.f32.gmra.mxu0 %vm1311_vm7, %v2755_v60  ;;  %2785 = vmatmul.msk.f32.vlgmr.msrb.gmra.mxu3 %vm1311_vm7, %v2779_v61 }
 0x312   : > { %2768 = vmatmul.msk.f32.vlgmr.msra.gmra.mxu1 %vm1311_vm7, %v2762_v62 }
 0x313   : > { %2778 = vmatmul.msk.f32.gmra.mxu2 %vm1311_vm7, %v2772_v63 }
 0x315   : > { %2786 = vmatmul.msk.f32.gmra.mxu3 %vm1311_vm7, %v2780_v0  ;;  %2793 = vmatmul.msk.f32.vlgmr.msra.gmra.mxu0 %vm1311_vm7, %v2787_v3 }
 0x31a   : > { %2769 = vmatmul.msk.f32.gmra.mxu1 %vm1311_vm7, %v2763_v5 }
 0x31d   : > { %2794 = vmatmul.msk.f32.gmra.mxu0 %vm1311_vm7, %v2788_v4 }
 0x377   : > { %v1428_v1 = vpop.f32.mrf.mxu1 }
 0x379   : > { %v1425_v2 = vpop.f32.mrf.mxu0 }
 0x37e   : > { %v1495_v8 = vpop.f32.mrf.mxu2 }
 0x37f   : > { %v1457_v9 = vpop.f32.mrf.mxu1 }
 0x380   : > { %v1538_v10 = vpop.f32.mrf.mxu3  ;;  %v1458_v11 = vadd.f32 %v1457_v9, %v1425_v2 }
 0x382   : > { %v1578_v12 = vpop.f32.mrf.mxu0  ;;  %v1501_v13 = vadd.f32 %v1495_v8, %v1458_v11 }
 0x384   : > { %v1544_v17 = vadd.f32 %v1538_v10, %v1501_v13 }
 0x386   : > { %v1498_v14 = vpop.f32.mrf.mxu2  ;;  %v1584_v20 = vadd.f32 %v1578_v12, %v1544_v17 }
 0x387   : > { %v1460_v15 = vpop.f32.mrf.mxu1 }
 0x388   : > { %v1541_v16 = vpop.f32.mrf.mxu3  ;;  %v1461_v18 = vadd.f32 %v1460_v15, %v1428_v1 }
 0x38a   : > { %v1581_v19 = vpop.f32.mrf.mxu0  ;;  %v1502_v21 = vadd.f32 %v1498_v14, %v1461_v18 }
 0x38c   : > { %v1545_v27 = vadd.f32 %v1541_v16, %v1502_v21 }
 0x38e   : > { %v1661_v22 = vpop.f32.mrf.mxu2  ;;  %v1585_v32 = vadd.f32 %v1581_v19, %v1545_v27 }
 0x38f   : > { %v1618_v23 = vpop.f32.mrf.mxu1 }
 0x390   : > { %v1624_v25 = vadd.f32 %v1618_v23, %v1584_v20  ;;  %v1701_v26 = vpop.f32.mrf.mxu3 }
 0x392   : > { %v1667_v28 = vadd.f32 %v1661_v22, %v1624_v25  ;;  %v1741_v29 = vpop.f32.mrf.mxu0 }
 0x394   : > { %v1707_v30 = vadd.f32 %v1701_v26, %v1667_v28 }
 0x396   : > { %v1747_v33 = vadd.f32 %v1741_v29, %v1707_v30  ;;  %v1664_v35 = vpop.f32.mrf.mxu2 }
 0x397   : > { %v1621_v34 = vpop.f32.mrf.mxu1 }
 0x398   : > { %v1752_v36 = vadd.f32 %v1750_v31, %v1747_v33  ;;  %v1625_v37 = vadd.f32 %v1621_v34, %v1585_v32  ;;  %v1704_v6 = vpop.f32.mrf.mxu3 }
 0x39a   : > { %v1754_v7 = vmax.f32 %v1752_v36, 0.0  ;;  %v1668_v38 = vadd.f32 %v1664_v35, %v1625_v37  ;;  %v1744_v39 = vpop.f32.mrf.mxu0 }
 0x39c   : > { %1757 = vst.msk [vmem:[%s1756_s24] sm:$0xff] %vm69_vm0, %v1754_v7  ;;  %v1708_v40 = vadd.f32 %v1704_v6, %v1668_v38 }
 0x39e   : > { %v1748_v41 = vadd.f32 %v1744_v39, %v1708_v40 }
 0x3a0   : > { %v1753_v42 = vadd.f32 %v1750_v31, %v1748_v41  ;;  %1382 = sbr.rel (!%p1380_p4) target bundleno = 755 (0x2f3), region = 252 }
 0x3a2   : > { %v1755_v43 = vmax.f32 %v1753_v42, 0.0 }
 0x3a4   : > { %1759 = vst.msk [vmem:[%s1756_s24 + $0x8] sm:$0xf] %vm708_vm4, %v1755_v43 }
 0x3a5 LB: > { %v2799_v24 = vld [vmem:[%s4257_s12 + $0x38] sm:$0xff]  ;;  %v2798_v46 = vld [vmem:[%s4257_s12 + $0x30] sm:$0xff]  ;;  %v2797_v49 = vld [vmem:[%s4257_s12 + $0x28] sm:$0xff]  ;;  %s2795_s7 = sshll.u32 %s3041_s26, 4  ;;  %vm2128_vm14 = vcmask 517120   ;;  %s1767_s26 = sadd.s32 1, %s3041_s26   ;;  %s3041_s26 = sphi %s4003_s26, %s1767_s26  }
 0x3a6   : > { %2907 = vmatpush.msra.mxu1 %v2799_v24  ;;  %v2807_v47 = vld [vmem:[%s4257_s12 + $0x58] sm:$0xff]  ;;  %1801 = vmatpush.msra.mxu0 %v2799_v24  ;;  %v2806_v48 = vld [vmem:[%s4257_s12 + $0x50] sm:$0xff]  ;;  %v2805_v51 = vld [vmem:[%s4257_s12 + $0x48] sm:$0xff]  ;;  %s4041_s25 = scalar_lea.vmem [#allocation6], %s2795_s7  ;;  %p1764_p5 = scmp.ge.s32.totalorder %s1767_s26, 10  }
 0x3a7   : > { %1866 = vmatpush.msra.mxu2 %v2807_v47  ;;  %v2816_v50 = vld [vmem:[%s4257_s12 + $0x78] sm:$0xff]  ;;  %v2815_v52 = vld [vmem:[%s4257_s12 + $0x70] sm:$0xff]  ;;  %v2796_v53 = vld [vmem:[%s4257_s12 + $0x20] sm:$0xff]  ;;  %vm2310_vm15 = vcmask (%p1764_p5), 253952   ;;  %s2443_s2 = sshll.u32 (%p1764_p5), %s4266_s21, 4  ;;  %s2444_s2 = int_to_ptr.hbm [resolvable:$true] %s2443_s2 }
 0x3a8   : > { %2908 = vmatpush.msra.mxu1 %v2798_v46  ;;  %1907 = vmatpush.msra.mxu3 %v2816_v50  ;;  %v2814_v54 = vld [vmem:[%s4257_s12 + $0x68] sm:$0xff]  ;;  %v2804_v56 = vld [vmem:[%s4257_s12 + $0x40] sm:$0xff]  ;;  %v1775_v57 = vld [vmem:[%s4257_s12 + $0x18] sm:$0xff] }
 0x3a9   : > { %1867 = vmatpush.msra.mxu2 %v2806_v48  ;;  %1802 = vmatpush.msra.mxu0 %v2798_v46  ;;  %v2841_v59 = vld [vmem:[%s4257_s12 + $0xd8] sm:$0xff]  ;;  %v1774_v60 = vld [vmem:[%s4257_s12 + $0x10] sm:$0xff]  ;;  %v2813_v61 = vld [vmem:[%s4257_s12 + $0x60] sm:$0xff] }
 0x3aa   : > { %2909 = vmatpush.msra.mxu1 %v2797_v49  ;;  %1908 = vmatpush.msra.mxu3 %v2815_v52  ;;  %v1773_v0 = vld [vmem:[%s4257_s12 + $0x8] sm:$0xff]  ;;  %v2824_v3 = vld [vmem:[%s4257_s12 + $0x98] sm:$0xff]  ;;  %v2840_v4 = vld [vmem:[%s4257_s12 + $0xd0] sm:$0xff] }
 0x3ab   : > { %v1777_v55 = vld [vmem:[%s4041_s25 + $0x9] sm:$0x3]  ;;  %1868 = vmatpush.msra.mxu2 %v2805_v51  ;;  %1803 = vmatpush.msra.mxu0 %v2797_v49  ;;  %v1776_v62 = vld [vmem:[%s4041_s25 + $0x1] sm:$0xff]  ;;  %v2811_v63 = vld [vmem:[%s4041_s25 + $0x10] sm:$0xff] }
 0x3ac   : > { %v1841_v58 = vld [vmem:[%s4041_s25 + $0x2] sm:$0xff]  ;;  %2910 = vmatpush.msra.mxu1 %v2796_v53  ;;  %1909 = vmatpush.msra.mxu3 %v2814_v54  ;;  %v2849_v5 = vld [vmem:[%s4257_s12 + $0xf8] sm:$0xff]  ;;  %v2823_v2 = vld [vmem:[%s4257_s12 + $0x90] sm:$0xff] }
 0x3ad   : > { %2801 = vmatmul.msk.f32.vlgmr.msra.gmra.mxu1 %vm69_vm0, %v1777_v55  ;;  %1869 = vmatpush.msra.mxu2 %v2804_v56  ;;  %v1772_v1 = vld [vmem:[%s4257_s12] sm:$0xff]  ;;  %v2848_v9 = vld [vmem:[%s4257_s12 + $0xf0] sm:$0xff]  ;;  %v2832_v10 = vld [vmem:[%s4257_s12 + $0xb8] sm:$0xff] }
 0x3ae   : > { %1830 = vmatpush.msrb.mxu1 %v1775_v57  ;;  %2808 = vmatmul.msk.f32.vlgmr.msra.gmra.mxu2 %vm69_vm0, %v1841_v58  ;;  %v1770_v8 = vld [vmem:[%s4041_s25] sm:$0xff]  ;;  %v2822_v11 = vld [vmem:[%s4257_s12 + $0x88] sm:$0xff]  ;;  %v2831_v15 = vld [vmem:[%s4257_s12 + $0xb0] sm:$0xff] }
 0x3af   : > { %2024 = vmatpush.msrb.mxu2 %v2841_v59  ;;  %1804 = vmatpush.msra.mxu0 %v2796_v53  ;;  %v1842_v12 = vld [vmem:[%s4041_s25 + $0xa] sm:$0x3]  ;;  %v2821_v14 = vld [vmem:[%s4257_s12 + $0x80] sm:$0xff]  ;;  %v2812_v17 = vld [vmem:[%s4041_s25 + $0x18] sm:$0x3] }
 0x3b0   : > { %1831 = vmatpush.msrb.mxu1 %v1774_v60  ;;  %1910 = vmatpush.msra.mxu3 %v2813_v61  ;;  %v2847_v13 = vld [vmem:[%s4257_s12 + $0xe8] sm:$0xff]  ;;  %v2819_v18 = vld [vmem:[%s4041_s25 + $0x11] sm:$0xff]  ;;  %v2838_v21 = vld [vmem:[%s4257_s12 + $0xc0] sm:$0xff] }
 0x3b1   : > { %2800 = vmatmul.msk.f32.vlgmr.msra.gmra.mxu0 %vm69_vm0, %v1776_v62  ;;  %2817 = vmatmul.msk.f32.vlgmr.msra.gmra.mxu3 %vm69_vm0, %v2811_v63  ;;  %v2839_v16 = vld [vmem:[%s4257_s12 + $0xc8] sm:$0xff]  ;;  %v2857_v20 = vld [vmem:[%s4257_s12 + $0x118] sm:$0xff]  ;;  %v2846_v22 = vld [vmem:[%s4257_s12 + $0xe0] sm:$0xff]  ;;  %v2116_v63 = vperm.slane %v3996_v44, 0 }
 0x3b2   : > { %1832 = vmatpush.msrb.mxu1 %v1773_v0  ;;  %1945 = vmatpush.msrb.mxu0 %v2824_v3  ;;  %v2830_v19 = vld [vmem:[%s4257_s12 + $0xa8] sm:$0xff]  ;;  %v2829_v23 = vld [vmem:[%s4257_s12 + $0xa0] sm:$0xff]  ;;  %v2856_v26 = vld [vmem:[%s4257_s12 + $0x110] sm:$0xff] }
 0x3b3   : > { %2062 = vmatpush.msrb.mxu3 %v2849_v5  ;;  %2025 = vmatpush.msrb.mxu2 %v2840_v4  ;;  %v1771_v25 = vld [vmem:[%s4041_s25 + $0x8] sm:$0x3]  ;;  %v2836_v27 = vld [vmem:[%s4041_s25 + $0x20] sm:$0xff]  ;;  %v2820_v31 = vld [vmem:[%s4041_s25 + $0x19] sm:$0x3]  ;;  %v2121_v4 = vperm.slane %v4001_v45, 0 }
 0x3b4   : > { %1833 = vmatpush.msrb.mxu1 %v1772_v1  ;;  %1946 = vmatpush.msrb.mxu0 %v2823_v2  ;;  %v2855_v28 = vld [vmem:[%s4257_s12 + $0x108] sm:$0xff]  ;;  %v2854_v30 = vld [vmem:[%s4257_s12 + $0x100] sm:$0xff]  ;;  %v2827_v32 = vld [vmem:[%s4041_s25 + $0x12] sm:$0xff]  ;;  %s3044_s12 = smov (%p1764_p5), 96  }
 0x3b5   : > { %2802 = vmatmul.msk.f32.vlgmr.msrb.gmra.mxu1 %vm69_vm0, %v1770_v8  ;;  %2063 = vmatpush.msrb.mxu3 %v2848_v9  ;;  %v2844_v29 = vld [vmem:[%s4041_s25 + $0x21] sm:$0xff]  ;;  %v2845_v34 = vld [vmem:[%s4041_s25 + $0x29] sm:$0x3]  ;;  %v2828_v36 = vld [vmem:[%s4041_s25 + $0x1a] sm:$0x3] }
 0x3b6   : > { %1983 = vmatpush.msra.mxu1 %v2832_v10  ;;  %1947 = vmatpush.msrb.mxu0 %v2822_v11  ;;  %v2837_v33 = vld [vmem:[%s4041_s25 + $0x28] sm:$0x3]  ;;  %v2853_v37 = vld [vmem:[%s4041_s25 + $0x2a] sm:$0x3] }
 0x3b7   : > { %2809 = vmatmul.msk.f32.gmra.mxu2 %vm69_vm0, %v1842_v12  ;;  %2064 = vmatpush.msrb.mxu3 %v2847_v13  ;;  %v2852_v35 = vld [vmem:[%s4041_s25 + $0x22] sm:$0xff]  ;;  %s2125_s25 = scalar_lea.vmem [#allocation7], %s2795_s7 }
 0x3b8   : > { %1948 = vmatpush.msrb.mxu0 %v2821_v14  ;;  %1984 = vmatpush.msra.mxu1 %v2831_v15 }
 0x3b9   : > { %2026 = vmatpush.msrb.mxu2 %v2839_v16  ;;  %2818 = vmatmul.msk.f32.gmra.mxu3 %vm69_vm0, %v2812_v17 }
 0x3ba   : > { %2825 = vmatmul.msk.f32.vlgmr.msrb.gmra.mxu0 %vm69_vm0, %v2819_v18  ;;  %1985 = vmatpush.msra.mxu1 %v2830_v19 }
 0x3bb   : > { %2100 = vmatpush.msra.mxu0 %v2857_v20  ;;  %2027 = vmatpush.msrb.mxu2 %v2838_v21 }
 0x3bc   : > { %2065 = vmatpush.msrb.mxu3 %v2846_v22  ;;  %1986 = vmatpush.msra.mxu1 %v2829_v23 }
 0x3bd   : > { %2803 = vmatmul.msk.f32.gmra.mxu1 %vm69_vm0, %v1771_v25  ;;  %2101 = vmatpush.msra.mxu0 %v2856_v26 }
 0x3bf   : > { %2842 = vmatmul.msk.f32.vlgmr.msrb.gmra.mxu2 %vm69_vm0, %v2836_v27  ;;  %2102 = vmatpush.msra.mxu0 %v2855_v28 }
 0x3c1   : > { %2850 = vmatmul.msk.f32.vlgmr.msrb.gmra.mxu3 %vm69_vm0, %v2844_v29  ;;  %2103 = vmatpush.msra.mxu0 %v2854_v30 }
 0x3c2   : > { %2826 = vmatmul.msk.f32.gmra.mxu0 %vm69_vm0, %v2820_v31 }
 0x3c5   : > { %2833 = vmatmul.msk.f32.vlgmr.msra.gmra.mxu1 %vm69_vm0, %v2827_v32 }
 0x3c7   : > { %2843 = vmatmul.msk.f32.gmra.mxu2 %vm69_vm0, %v2837_v33 }
 0x3c9   : > { %2851 = vmatmul.msk.f32.gmra.mxu3 %vm69_vm0, %v2845_v34 }
 0x3ca   : > { %2858 = vmatmul.msk.f32.vlgmr.msra.gmra.mxu0 %vm69_vm0, %v2852_v35 }
 0x3cd   : > { %2834 = vmatmul.msk.f32.gmra.mxu1 %vm69_vm0, %v2828_v36 }
 0x3d2   : > { %2859 = vmatmul.msk.f32.gmra.mxu0 %vm69_vm0, %v2853_v37 }
 0x42a   : > { %v1809_v6 = vpop.f32.mrf.mxu1 }
 0x42e   : > { %v1806_v7 = vpop.f32.mrf.mxu0 }
 0x431   : > { %v1871_v38 = vpop.f32.mrf.mxu2 }
 0x432   : > { %v1835_v39 = vpop.f32.mrf.mxu1 }
 0x433   : > { %v1836_v41 = vadd.f32 %v1835_v39, %v1806_v7 }
 0x434   : > { %v1912_v40 = vpop.f32.mrf.mxu3 }
 0x435   : > { %v1877_v43 = vadd.f32 %v1871_v38, %v1836_v41 }
 0x437   : > { %v1950_v42 = vpop.f32.mrf.mxu0  ;;  %v1918_v48 = vadd.f32 %v1912_v40, %v1877_v43 }
 0x439   : > { %v1956_v51 = vadd.f32 %v1950_v42, %v1918_v48 }
 0x43a   : > { %v1838_v24 = vpop.f32.mrf.mxu1  ;;  %v1874_v46 = vpop.f32.mrf.mxu2 }
 0x43b   : > { %v1839_v49 = vadd.f32 %v1838_v24, %v1809_v6 }
 0x43c   : > { %v1915_v47 = vpop.f32.mrf.mxu3 }
 0x43d   : > { %v1878_v52 = vadd.f32 %v1874_v46, %v1839_v49 }
 0x43f   : > { %v1953_v50 = vpop.f32.mrf.mxu0  ;;  %v1919_v57 = vadd.f32 %v1915_v47, %v1878_v52 }
 0x441   : > { %v1957_v61 = vadd.f32 %v1953_v50, %v1919_v57 }
 0x442   : > { %v1988_v53 = vpop.f32.mrf.mxu1  ;;  %v2029_v54 = vpop.f32.mrf.mxu2 }
 0x443   : > { %v1994_v55 = vadd.f32 %v1988_v53, %v1956_v51 }
 0x444   : > { %v2067_v56 = vpop.f32.mrf.mxu3 }
 0x445   : > { %v2035_v58 = vadd.f32 %v2029_v54, %v1994_v55 }
 0x447   : > { %v2073_v59 = vadd.f32 %v2067_v56, %v2035_v58  ;;  %v2105_v60 = vpop.f32.mrf.mxu0 }
 0x449   : > { %v2111_v62 = vadd.f32 %v2105_v60, %v2073_v59 }
 0x44a   : > { %v1991_v0 = vpop.f32.mrf.mxu1  ;;  %v2032_v3 = vpop.f32.mrf.mxu2 }
 0x44b   : > { %v2113_v5 = vmax.f32 %v2111_v62, 0.0  ;;  %v1995_v1 = vadd.f32 %v1991_v0, %v1957_v61 }
 0x44c   : > { %v2070_v2 = vpop.f32.mrf.mxu3 }
 0x44d   : > { %v2118_v8 = vmul.f32 %v2116_v63, %v2113_v5  ;;  %v2036_v9 = vadd.f32 %v2032_v3, %v1995_v1 }
 0x44f   : > { %v2123_v10 = vadd.f32 %v2121_v4, %v2118_v8  ;;  %v2074_v11 = vadd.f32 %v2070_v2, %v2036_v9  ;;  %v2108_v12 = vpop.f32.mrf.mxu0 }
 0x451   : > { %2127 = vst.msk [vmem:[%s2125_s25] sm:$0xff] %vm1222_vm5, %v2123_v10  ;;  %v2112_v13 = vadd.f32 %v2108_v12, %v2074_v11 }
 0x453   : > { %v2114_v14 = vmax.f32 %v2112_v13, 0.0 }
 0x455   : > { %v2119_v15 = vmul.f32 %v2116_v63, %v2114_v14  ;;  %1766 = sbr.rel (!%p1764_p5) target bundleno = 933 (0x3a5), region = 263 }
 0x457   : > { %v2124_v16 = vadd.f32 %v2121_v4, %v2119_v15 }
 0x459   : > { %2129 = vst.msk [vmem:[%s2125_s25 + $0x8] sm:$0x3] %vm2128_vm14, %v2124_v16 }
 0x460   :  { %v2130_v17 = vld [vmem:[#allocation7] sm:$0xff]  ;;  %v2131_v18 = vld [vmem:[#allocation7 + $0x8] sm:$0x3]  ;;  %v2133_v19 = vld [vmem:[#allocation7 + $0x10] sm:$0xff] }
 0x461   :  { %v2134_v20 = vld [vmem:[#allocation7 + $0x18] sm:$0x3]  ;;  %v2136_v21 = vrot.slane %v2130_v17, 1  ;;  %v2140_v22 = vrot.slane %v2133_v19, 1  ;;  %v2166_v23 = vld [vmem:[#allocation7 + $0x20] sm:$0xff]  ;;  %v2156_v25 = vrot.slane %v2131_v18, 1 }
 0x462   :  { %v2160_v26 = vrot.slane %v2134_v20, 1  ;;  %v2169_v27 = vld [vmem:[#allocation7 + $0x30] sm:$0xff]  ;;  %v2172_v30 = vrot.slane %v2166_v23, 1  ;;  %v2167_v7 = vld [vmem:[#allocation7 + $0x28] sm:$0x3]  ;;  %v2202_v39 = vld [vmem:[#allocation7 + $0x40] sm:$0xff] }
 0x463   :  { %v2138_v28 = vmax.f32 %v2130_v17, %v2136_v21  ;;  %v2142_v29 = vmax.f32 %v2133_v19, %v2140_v22  ;;  %v2176_v31 = vrot.slane %v2169_v27, 1  ;;  %v2158_v33 = vmax.f32 %v2131_v18, %v2156_v25  ;;  %v2170_v38 = vld [vmem:[#allocation7 + $0x38] sm:$0x3]  ;;  %v2205_v40 = vld [vmem:[#allocation7 + $0x50] sm:$0xff]  ;;  %v2203_v60 = vld [vmem:[#allocation7 + $0x48] sm:$0x3] }
 0x464   :  { %v2162_v34 = vmax.f32 %v2134_v20, %v2160_v26  ;;  %v2174_v37 = vmax.f32 %v2166_v23, %v2172_v30  ;;  %v2192_v24 = vrot.slane %v2167_v7, 1  ;;  %v2196_v46 = vrot.slane %v2170_v38, 1  ;;  %v2206_v61 = vld [vmem:[#allocation7 + $0x58] sm:$0x3]  ;;  %v2238_v62 = vld [vmem:[#allocation7 + $0x60] sm:$0xff]  ;;  %v2241_v63 = vld [vmem:[#allocation7 + $0x70] sm:$0xff] }
 0x465   :  { %v2143_v32 = vmax.f32 %v2138_v28, %v2142_v29  ;;  %v2178_v44 = vmax.f32 %v2169_v27, %v2176_v31  ;;  %v2208_v48 = vrot.slane %v2202_v39, 1  ;;  %v2212_v49 = vrot.slane %v2205_v40, 1  ;;  %v2239_v20 = vld [vmem:[#allocation7 + $0x68] sm:$0x3]  ;;  %v2242_v21 = vld [vmem:[#allocation7 + $0x78] sm:$0x3] }
 0x466   :  { %v2163_v42 = vmax.f32 %v2158_v33, %v2162_v34  ;;  %v2194_v52 = vmax.f32 %v2167_v7, %v2192_v24  ;;  %v2198_v53 = vmax.f32 %v2170_v38, %v2196_v46  ;;  %v2228_v4 = vrot.slane %v2203_v60, 1  ;;  %v2274_v22 = vld [vmem:[#allocation7 + $0x80] sm:$0xff]  ;;  %v2277_v23 = vld [vmem:[#allocation7 + $0x90] sm:$0xff] }
 0x467   :  { %v2146_v35 = vrot.slane %v2143_v32, 2  ;;  %v2149_v36 = vrot.slane %v2143_v32, 4  ;;  %v2152_v6 = vrot.slane %v2143_v32, 6  ;;  %v2179_v43 = vmax.f32 %v2174_v37, %v2178_v44 }
 0x468   :  { %v2210_v56 = vmax.f32 %v2202_v39, %v2208_v48  ;;  %v2214_v57 = vmax.f32 %v2205_v40, %v2212_v49  ;;  %v2199_v3 = vmax.f32 %v2194_v52, %v2198_v53  ;;  %v2232_v1 = vrot.slane %v2206_v61, 1  ;;  %v2275_v39 = vld [vmem:[#allocation7 + $0x88] sm:$0x3]  ;;  %v2278_v40 = vld [vmem:[#allocation7 + $0x98] sm:$0x3] }
 0x469   :  { %v2148_v45 = vadd.f32 %v2146_v35, %v2143_v32  ;;  %v2182_v51 = vrot.slane %v2179_v43, 2  ;;  %v2185_v55 = vrot.slane %v2179_v43, 4  ;;  %v2188_v59 = vrot.slane %v2179_v43, 6 }
 0x46a   :  { %v2215_v5 = vmax.f32 %v2210_v56, %v2214_v57  ;;  %v2244_v8 = vrot.slane %v2238_v62, 1  ;;  %v2248_v9 = vrot.slane %v2241_v63, 1  ;;  %v2230_v12 = vmax.f32 %v2203_v60, %v2228_v4  ;;  %v2355_v4 = vld [vmem:[%s4262_s17 + $0x28] sm:$0xff] }
 0x46b   :  { %v2151_v41 = vadd.f32 %v2149_v36, %v2148_v45  ;;  %v2234_v13 = vmax.f32 %v2206_v61, %v2232_v1  ;;  %v2264_v28 = vrot.slane %v2239_v20, 1  ;;  %v2268_v29 = vrot.slane %v2242_v21, 1  ;;  %v2321_v61 = vld [vmem:[%s4260_s15 + $0x18] sm:$0xff]  ;;  %v2354_v1 = vld [vmem:[%s4262_s17 + $0x20] sm:$0xff] }
 0x46c   :  { %v2218_v11 = vrot.slane %v2215_v5, 2  ;;  %v2221_v15 = vrot.slane %v2215_v5, 4  ;;  %v2246_v16 = vmax.f32 %v2238_v62, %v2244_v8  ;;  %v2250_v17 = vmax.f32 %v2241_v63, %v2248_v9  ;;  %v2320_v62 = vld [vmem:[%s4260_s15 + $0x10] sm:$0xff]  ;;  %2341 = vmatpush.msra.mxu0 %v2321_v61  ;;  %v2319_v63 = vld [vmem:[%s4260_s15 + $0x8] sm:$0xff] }
 0x46d   :  { %v2154_v47 = vadd.f32 %v2152_v6, %v2151_v41  ;;  %v2224_v19 = vrot.slane %v2215_v5, 6  ;;  %v2235_v26 = vmax.f32 %v2230_v12, %v2234_v13  ;;  %v2280_v31 = vrot.slane %v2274_v22, 1  ;;  %v2350_v12 = vld [vmem:[%s4262_s17] sm:$0xff]  ;;  %v2394_v13 = vld [vmem:[%s4264_s19 + $0x38] sm:$0xff] }
 0x46e   :  { %v2251_v27 = vmax.f32 %v2246_v16, %v2250_v17  ;;  %v2284_v32 = vrot.slane %v2277_v23, 1  ;;  %v2266_v35 = vmax.f32 %v2239_v20, %v2264_v28  ;;  %v2270_v36 = vmax.f32 %v2242_v21, %v2268_v29  ;;  %2342 = vmatpush.msra.mxu0 %v2320_v62  ;;  %2410 = vmatpush.msra.mxu2 %v2394_v13  ;;  %v2391_v16 = vld [vmem:[%s4264_s19 + $0x20] sm:$0xff]  ;;  %v2390_v17 = vld [vmem:[%s4264_s19 + $0x18] sm:$0xff] }
 0x46f   :  { %v2164_v50 = vadd.f32 %v2163_v42, %v2154_v47  ;;  %v2282_v45 = vmax.f32 %v2274_v22, %v2280_v31  ;;  %v2300_v46 = vrot.slane %v2275_v39, 1  ;;  %v2304_v47 = vrot.slane %v2278_v40, 1  ;;  %v2389_v22 = vld [vmem:[%s4264_s19 + $0x10] sm:$0xff] }
 0x470   :  { %v2254_v34 = vrot.slane %v2251_v27, 2  ;;  %v2257_v44 = vrot.slane %v2251_v27, 4  ;;  %v2286_v6 = vmax.f32 %v2277_v23, %v2284_v32  ;;  %v2260_v38 = vrot.slane %v2251_v27, 6  ;;  %2343 = vmatpush.msra.mxu0 %v2319_v63  ;;  %v2388_v23 = vld [vmem:[%s4264_s19 + $0x8] sm:$0xff] }
 0x471   :  { %v2180_v54 = vadd.f32 %v2179_v43, %v2164_v50  ;;  %v2271_v42 = vmax.f32 %v2266_v35, %v2270_v36  ;;  %v2302_v52 = vmax.f32 %v2275_v39, %v2300_v46  ;;  %v2306_v53 = vmax.f32 %v2278_v40, %v2304_v47 }
 0x472   :  { %v2287_v43 = vmax.f32 %v2282_v45, %v2286_v6 }
 0x473   :  { %v2184_v58 = vadd.f32 %v2182_v51, %v2180_v54  ;;  %v2307_v57 = vmax.f32 %v2302_v52, %v2306_v53 }
 0x474   :  { %v2290_v49 = vrot.slane %v2287_v43, 2  ;;  %v2293_v51 = vrot.slane %v2287_v43, 4 }
 0x475   :  { %v2187_v0 = vadd.f32 %v2185_v55, %v2184_v58  ;;  %v2296_v55 = vrot.slane %v2287_v43, 6 }
 0x477   :  { %v2190_v2 = vadd.f32 %v2188_v59, %v2187_v0  ;;  %v2318_v0 = vld [vmem:[%s4260_s15] sm:$0xff] }
 0x478   :  { %2344 = vmatpush.msra.mxu0 %v2318_v0 }
 0x479   :  { %v2200_v10 = vadd.f32 %v2199_v3, %v2190_v2  ;;  %v2357_v3 = vld [vmem:[%s4262_s17 + $0x38] sm:$0xff] }
 0x47a   :  { %2374 = vmatpush.msra.mxu1 %v2357_v3  ;;  %v2353_v2 = vld [vmem:[%s4262_s17 + $0x18] sm:$0xff] }
 0x47b   :  { %v2216_v14 = vadd.f32 %v2215_v5, %v2200_v10  ;;  %v2356_v5 = vld [vmem:[%s4262_s17 + $0x30] sm:$0xff] }
 0x47c   :  { %2375 = vmatpush.msra.mxu1 %v2356_v5  ;;  %v2352_v10 = vld [vmem:[%s4262_s17 + $0x10] sm:$0xff] }
 0x47d   :  { %v2220_v18 = vadd.f32 %v2218_v11, %v2216_v14  ;;  %v2351_v11 = vld [vmem:[%s4262_s17 + $0x8] sm:$0xff]  ;;  %v2393_v14 = vld [vmem:[%s4264_s19 + $0x30] sm:$0xff] }
 0x47e   :  { %2376 = vmatpush.msra.mxu1 %v2355_v4  ;;  %2411 = vmatpush.msra.mxu2 %v2393_v14 }
 0x47f   :  { %v2223_v25 = vadd.f32 %v2221_v15, %v2220_v18  ;;  %v2392_v15 = vld [vmem:[%s4264_s19 + $0x28] sm:$0xff]  ;;  %v2962_v18 = vld [vmem:[%s4261_s16] ss:$0 sm:$0xff] }
 0x480   :  { %2377 = vmatpush.msra.mxu1 %v2354_v1  ;;  %2412 = vmatpush.msra.mxu2 %v2392_v15 }
 0x481   :  { %v2226_v30 = vadd.f32 %v2224_v19, %v2223_v25  ;;  %v2387_v25 = vld [vmem:[%s4264_s19] sm:$0xff] }
 0x482   :  { %2378 = vmatpush.msra.mxu1 %v2353_v2  ;;  %2413 = vmatpush.msra.mxu2 %v2391_v16 }
 0x483   :  { %v2236_v33 = vadd.f32 %v2235_v26, %v2226_v30  ;;  %v2963_v26 = vld [vmem:[%s4263_s18] ss:$0 sm:$0xff]  ;;  %s3045_s18 = smov [#allocation9]  }
 0x484   :  { %2379 = vmatpush.msra.mxu1 %v2352_v10  ;;  %2414 = vmatpush.msra.mxu2 %v2390_v17  ;;  %v2964_v30 = vld [vmem:[%s4265_s20] ss:$0 sm:$0xff]  ;;  %s2441_s19 = sshll.u32 %s3045_s18, 4  ;;  %s2442_s19 = int_to_ptr.vmem [resolvable:$true] %s2441_s19 }
 0x485   :  { %v2252_v37 = vadd.f32 %v2251_v27, %v2236_v33 }
 0x486   :  { %2380 = vmatpush.msra.mxu1 %v2351_v11  ;;  %2415 = vmatpush.msra.mxu2 %v2389_v22 }
 0x487   :  { %v2256_v7 = vadd.f32 %v2254_v34, %v2252_v37 }
 0x488   :  { %2381 = vmatpush.msra.mxu1 %v2350_v12  ;;  %2416 = vmatpush.msra.mxu2 %v2388_v23 }
 0x489   :  { %v2259_v41 = vadd.f32 %v2257_v44, %v2256_v7 }
 0x48a   :  { %2417 = vmatpush.msra.mxu2 %v2387_v25 }
 0x48b   :  { %v2262_v24 = vadd.f32 %v2260_v38, %v2259_v41 }
 0x48d   :  { %v2272_v48 = vadd.f32 %v2271_v42, %v2262_v24 }
 0x48f   :  { %v2288_v50 = vadd.f32 %v2287_v43, %v2272_v48 }
 0x491   :  { %v2292_v54 = vadd.f32 %v2290_v49, %v2288_v50 }
 0x493   :  { %v2295_v56 = vadd.f32 %v2293_v51, %v2292_v54 }
 0x495   :  { %v2298_v58 = vadd.f32 %v2296_v55, %v2295_v56 }
 0x497   :  { %v2308_v59 = vadd.f32 %v2307_v57, %v2298_v58 }
 0x499   :  { %v2309_v60 = vmul.f32 0.04, %v2308_v59 }
 0x49b   :  { %2313 = vrot.lane.b32.xlu0 %v2309_v60, %s3044_s12  ;;  %2311 = vst.msk [vmem:[#allocation8] sm:$0x1] %vm2310_vm15, %v2309_v60 }
 0x50d   :  { %v2314_v8 = vpop.permute.xlu0 %2313 }
 0x50e   :  { %2316 = vst.msk [vmem:[#allocation8 + $0x1] sm:$0x1] %vm2310_vm15, %v2314_v8 }
 0x515   :  { %v2317_v9 = vld [vmem:[#allocation8] sm:$0x3] }
 0x516   :  { %2860 = vmatmul.msk.f32.vlgmr.msra.gmra.mxu0 %vm69_vm0, %v2317_v9  ;;  %vm2422_vm0 = vcmask 74752  }
 0x593   :  { %v2346_v19 = vpop.f32.mrf.mxu0 }
 0x594   :  { %v2347_v20 = vadd.f32 %v2962_v18, %v2346_v19 }
 0x596   :  { %v2349_v21 = vmax.f32 %v2347_v20, 0.0 }
 0x598   :  { %2861 = vmatmul.msk.f32.vlgmr.msra.gmra.mxu1 %vm1222_vm5, %v2349_v21 }
 0x615   :  { %v2383_v27 = vpop.f32.mrf.mxu1 }
 0x616   :  { %v2384_v28 = vadd.f32 %v2963_v26, %v2383_v27 }
 0x618   :  { %v2386_v29 = vmax.f32 %v2384_v28, 0.0 }
 0x61a   :  { %2862 = vmatmul.msk.f32.vlgmr.msra.gmra.mxu2 %vm1222_vm5, %v2386_v29 }
 0x69d   :  { %v2419_v31 = vpop.f32.mrf.mxu2 }
 0x69e   :  { %v2420_v32 = vadd.f32 %v2964_v30, %v2419_v31 }
 0x6a0   :  { %v2423_v33 = vsel %vm2422_vm0, %v2420_v32, -inf }
 0x6a1   :  { %2424 = vmax.xlane.f32.xlu0 %v2423_v33 }
 0x714   :  { %v2425_v34 = vpop.xlane.xlu0 %2424 }
 0x715   :  { %v2426_v35 = vsub.f32 %v2420_v32, %v2425_v34 }
 0x717   :  { %v2427_v36 = vmul.f32 1.442695, %v2426_v35 }
 0x719   :  { %2965 = vpow2.f32 %v2427_v36 }
 0x71f   :  { %v2966_v37 = vpop.eup %2965 }
 0x720   :  { %v2429_v44 = vsel %vm2422_vm0, %v2966_v37, 0.0 }
 0x721   :  { %2430 = vadd.xlane.f32.xlu1 %v2429_v44 }
 0x794   :  { %v2431_v45 = vpop.xlane.xlu1 %2430 }
 0x795   :  { %2967 = vlog2.f32 %v2431_v45 }
 0x79b   :  { %v2968_v6 = vpop.eup %2967 }
 0x79c   :  { %v2433_v7 = vmul.f32 0.6931472, %v2968_v6 }
 0x79e   :  { %v2434_v38 = vsub.f32 %v2426_v35, %v2433_v7 }
 0x7a0   :  { %2435 = vst.msk [vmem:[#allocation9] sm:$0x3] %vm2422_vm0, %v2434_v38 }
 0x7a1   :  { %2446 = dma.vmem_to_hbm [thread:$0]  %s2442_s19, 32, %s2444_s2, [#allocation10]  }
 0x7a2   :  { %3017 = dma.done.wait [#allocation10], 32  }
 0x7a3   :  { %3018 = vsyncadd [#allocation10], 4294967264 }
 0x7a4   :  { %2451 = vsyncpa [#allocation10], 1 }

</bundles_post_ra>
